<compile_context>
chip_gen: v5e
topology: v5e:2x2
jax: 0.10.0
libtpu: 0.0.40
codegen_flags: <defaults>
</compile_context>

<pallas_src>
import functools

import jax
import jax.numpy as jnp
from jax import lax
from jax.experimental import pallas as pl
from jax.experimental.pallas import tpu as pltpu


# ----------------------------------------------------------------------------
# Pallas kernel: grid = (batch_tiles, time_chunks); hidden state in VMEM.
# ----------------------------------------------------------------------------
def _gru_chunk_kernel(x_ref, wih_t_ref, whh_rz_t_ref, whh_n_t_ref,
                      bgi_ref, bhn_ref, out_ref, h_ref, gi_ref, *, ct, d, tb):
    # Time axis (grid axis 1) carries the recurrence; re-init the hidden state
    # at the start of every batch tile's time loop.
    @pl.when(pl.program_id(1) == 0)
    def _():
        h_ref[...] = jnp.zeros_like(h_ref)

    wih_t = wih_t_ref[...]                               # (D, 3D) act dtype
    whh_rz_t = whh_rz_t_ref[...]                         # (D, 2D)
    whh_n_t = whh_n_t_ref[...]                           # (D, D)
    bhn = bhn_ref[...].astype(jnp.float32)               # (1, D)

    # ---- fused input projection for the whole chunk: M = tb*ct MXU rows ----
    x = x_ref[...].reshape(tb * ct, d)                   # (tb*ct, D)
    gi = jnp.dot(x, wih_t, preferred_element_type=jnp.float32)
    gi = gi + bgi_ref[...].astype(jnp.float32)           # b_ih + b_hh_{r,z}
    gi_ref[...] = gi.reshape(tb, ct, 3 * d)              # park in VMEM scratch

    h = h_ref[...]                                       # (tb, D) f32 carry

    # Statically unrolled sequential loop over the CT timesteps of the chunk
    # (ct is capped at 16 by the wrapper to bound vreg live ranges).
    for i in range(ct):
        # TODO(synk): on v5e, cast h/weights to bf16 here for MXU peak
        # (needs a numerics check at realistic T).
        h_in = h.astype(whh_rz_t.dtype)
        gh_rz = jnp.dot(h_in, whh_rz_t,
                        preferred_element_type=jnp.float32)         # (tb, 2D)
        gh_n = jnp.dot(h_in, whh_n_t,
                       preferred_element_type=jnp.float32) + bhn    # (tb, D)

        gi_t = gi_ref[:, i, :]                                       # (tb, 3D)
        # TODO(synk): if D is not a multiple of 128 these column slices are
        # not lane-tile aligned; pad D to 128 for fully free slicing.
        r = jax.nn.sigmoid(gi_t[:, :d] + gh_rz[:, :d])
        z = jax.nn.sigmoid(gi_t[:, d:2 * d] + gh_rz[:, d:])
        n = jnp.tanh(gi_t[:, 2 * d:] + r * gh_n)
        h = n + z * (h - n)                                          # (1-z)n+zh

        out_ref[:, i, :] = h.astype(out_ref.dtype)

    h_ref[...] = h


def _round_up(x, m):
    return (x + m - 1) // m * m


def gru_decoder_pallas(h_enc, w_ih, w_hh, b_ih, b_hh, *,
                       time_chunk=None, batch_tile=None):
    """Run the GRU decoder (forward of RNNDec).

    h_enc : (B, T, D)  batch_first, like torch.nn.GRU(batch_first=True)
    w_ih  : (3D, D), w_hh : (3D, D), b_ih/b_hh : (3D,)  (gate order r, z, n)
    returns (B, T, D) — all hidden states (GRU output [0]).
    """
    B, T, D = h_enc.shape
    dtype = h_enc.dtype
    assert w_ih.shape == (3 * D, D) and w_hh.shape == (3 * D, D), \
        "RNNDec requires input_dim == hidden_dim"

    # ---- time chunk (multiple of 8; statically unrolled inside the kernel) --
    T_pad8 = _round_up(T, 8)
    if time_chunk is None:
        ct = min(16, T_pad8)
        if T_pad8 % ct != 0:
            ct = 8
    else:
        ct = time_chunk
    assert ct % 8 == 0, ct
    T_pad = _round_up(T, ct)

    # ---- batch tile (multiple of 8; >=2 tiles when possible for megacore) ---
    B_pad = _round_up(B, 8)
    if batch_tile is None:
        tb = B_pad // 2 if (B_pad % 16 == 0) else B_pad
    else:
        tb = batch_tile
    assert tb % 8 == 0 and B_pad % tb == 0, (B_pad, tb)

    # ---- pad activations (end-padding only: cannot affect real outputs) ----
    if (B_pad, T_pad) != (B, T):
        x = jnp.pad(h_enc, ((0, B_pad - B), (0, T_pad - T), (0, 0)))
    else:
        x = h_enc

    # ---- weights in the activation dtype; f32 accumulation in the kernel ---
    wih_t = jnp.transpose(w_ih).astype(dtype)               # (D, 3D)
    whh_rz_t = jnp.transpose(w_hh[:2 * D]).astype(dtype)    # (D, 2D)
    whh_n_t = jnp.transpose(w_hh[2 * D:]).astype(dtype)     # (D, D)

    # b_ih (all gates) + b_hh_{r,z} folded into one per-chunk bias; b_hh_n
    # must stay per-step (r-gated).
    bgi = (b_ih.astype(jnp.float32)
           + jnp.concatenate([b_hh[:2 * D].astype(jnp.float32),
                              jnp.zeros((D,), jnp.float32)])).reshape(1, 3 * D)
    bhn = b_hh[2 * D:].astype(jnp.float32).reshape(1, D)

    grid = (B_pad // tb, T_pad // ct)

    # ---- VMEM budget: single-buffered constants + double-buffered activ. ---
    itemsize = jnp.dtype(dtype).itemsize
    est = ((D * 3 * D + D * 2 * D + D * D) * itemsize      # weights (x1)
           + (3 * D + D) * 4                               # biases
           + 2 * tb * ct * D * itemsize                    # input blocks (x2)
           + 2 * tb * ct * D * itemsize                    # output blocks (x2)
           + tb * D * 4 + tb * ct * 3 * D * 4)             # scratch
    vmem_limit = int(min(max(2 * est + (8 << 20), 32 << 20), 64 << 20))

    out = pl.pallas_call(
        functools.partial(_gru_chunk_kernel, ct=ct, d=D, tb=tb),
        out_shape=jax.ShapeDtypeStruct((B_pad, T_pad, D), dtype),
        grid_spec=pltpu.PrefetchScalarGridSpec(
            num_scalar_prefetch=0,
            grid=grid,
            in_specs=[
                # streamed activations, batch_first
                pl.BlockSpec((tb, ct, D), lambda b, c: (b, c, 0)),
                # constant weights / biases: single-buffered (index never changes)
                pl.BlockSpec((D, 3 * D), lambda b, c: (0, 0),
                             pipeline_mode=pl.Buffered(1)),
                pl.BlockSpec((D, 2 * D), lambda b, c: (0, 0),
                             pipeline_mode=pl.Buffered(1)),
                pl.BlockSpec((D, D), lambda b, c: (0, 0),
                             pipeline_mode=pl.Buffered(1)),
                pl.BlockSpec((1, 3 * D), lambda b, c: (0, 0),
                             pipeline_mode=pl.Buffered(1)),
                pl.BlockSpec((1, D), lambda b, c: (0, 0),
                             pipeline_mode=pl.Buffered(1)),
            ],
            out_specs=pl.BlockSpec((tb, ct, D), lambda b, c: (b, c, 0)),
            scratch_shapes=[
                pltpu.VMEM((tb, D), jnp.float32),           # hidden-state carry
                pltpu.VMEM((tb, ct, 3 * D), jnp.float32),   # per-chunk input gates
            ],
        ),
        compiler_params=pltpu.CompilerParams(
            # batch tiles are independent -> megacore-parallel (v7x);
            # time axis carries the recurrence -> sequential.
            dimension_semantics=("parallel", "arbitrary"),
            vmem_limit_bytes=vmem_limit,
        ),
    )(x, wih_t, whh_rz_t, whh_n_t, bgi, bhn)

    if (B_pad, T_pad) != (B, T):
        out = out[:B, :T]
    return out


# ----------------------------------------------------------------------------
# Pure-JAX reference (lax.scan) for verification.
# ----------------------------------------------------------------------------
def gru_decoder_ref(h_enc, w_ih, w_hh, b_ih, b_hh):
    B, T, D = h_enc.shape

    def step(h, x_t):
        gi = x_t @ w_ih.T + b_ih
        gh = h @ w_hh.T + b_hh
        i_r, i_z, i_n = gi[:, :D], gi[:, D:2 * D], gi[:, 2 * D:]
        h_r, h_z, h_n = gh[:, :D], gh[:, D:2 * D], gh[:, 2 * D:]
        r = jax.nn.sigmoid(i_r + h_r)
        z = jax.nn.sigmoid(i_z + h_z)
        n = jnp.tanh(i_n + r * h_n)
        h_new = (1.0 - z) * n + z * h
        return h_new, h_new

    h0 = jnp.zeros((B, D), jnp.float32)
    _, ys = lax.scan(step, h0,
                     jnp.transpose(h_enc, (1, 0, 2)).astype(jnp.float32))
    return jnp.transpose(ys, (1, 0, 2)).astype(h_enc.dtype)


# ----------------------------------------------------------------------------
# Deterministic parameter init (mirrors RNNDec.initialize_decoder()).
# ----------------------------------------------------------------------------
def init_rnn_dec_params(key, input_dim):
    D = input_dim
    k_ih, k_hh = jax.random.split(key)

    # xavier_normal_ on weight_ih_l0: shape (3D, D), gain=1
    fan_out, fan_in = 3 * D, D
    std = (2.0 / (fan_in + fan_out)) ** 0.5
    w_ih = std * jax.random.normal(k_ih, (3 * D, D), dtype=jnp.float32)

    # orthogonal_ on weight_hh_l0: shape (3D, D)
    a = jax.random.normal(k_hh, (3 * D, D), dtype=jnp.float32)
    q, r = jnp.linalg.qr(a)                     # q: (3D, D)
    q = q * jnp.sign(jnp.diag(r))[None, :]      # sign fix (as in torch)
    w_hh = q

    b_ih = jnp.zeros((3 * D,), jnp.float32)     # constant_(..., 0)
    b_hh = jnp.zeros((3 * D,), jnp.float32)
    return w_ih, w_hh, b_ih, b_hh


if __name__ == "__main__":
    key = jax.random.PRNGKey(0)
    k_param, k_x = jax.random.split(key)

    B, T, D = 2, 8, 32   # batch, seq, input_dim == hidden_dim
    w_ih, w_hh, b_ih, b_hh = init_rnn_dec_params(k_param, D)
    h_enc = jax.random.normal(k_x, (B, T, D), dtype=jnp.float32)

    out = jax.jit(gru_decoder_pallas)(h_enc, w_ih, w_hh, b_ih, b_hh)
    out = jax.block_until_ready(out)

    ref = gru_decoder_ref(h_enc, w_ih, w_hh, b_ih, b_hh)
    assert out.shape == (B, T, D)
    err = jnp.max(jnp.abs(out.astype(jnp.float32) - ref.astype(jnp.float32)))
    assert err < 1e-4, f"max err {err}"

    print("KERNEL_OK")
</pallas_src>

<mosaic_0001>
module attributes {stable_mosaic.version = 11 : i64} {
  func.func @_gru_chunk_kernel(%arg0: i32, %arg1: i32, %arg2: memref<8x8x32xf32, #tpu.memory_space<vmem>>, %arg3: memref<32x96xf32, #tpu.memory_space<vmem>>, %arg4: memref<32x64xf32, #tpu.memory_space<vmem>>, %arg5: memref<32x32xf32, #tpu.memory_space<vmem>>, %arg6: memref<1x96xf32, #tpu.memory_space<vmem>>, %arg7: memref<1x32xf32, #tpu.memory_space<vmem>>, %arg8: memref<8x8x32xf32, #tpu.memory_space<vmem>>, %arg9: memref<8x32xf32, #tpu.memory_space<vmem>>, %arg10: memref<8x8x96xf32, #tpu.memory_space<vmem>>) attributes {dimension_semantics = [#tpu.dimension_semantics<parallel>, #tpu.dimension_semantics<arbitrary>], iteration_bounds = array<i64: 1, 1>, scalar_prefetch = 0 : i64, scratch_operands = 2 : i64, tpu.core_type = #tpu.core_type<tc>, window_params = [{transform_indices = @transform_0, window_bounds = array<i64: 8, 8, 32>}, {pipeline_mode = #tpu.pipeline_mode<synchronous>, transform_indices = @transform_1, window_bounds = array<i64: 32, 96>}, {pipeline_mode = #tpu.pipeline_mode<synchronous>, transform_indices = @transform_2, window_bounds = array<i64: 32, 64>}, {pipeline_mode = #tpu.pipeline_mode<synchronous>, transform_indices = @transform_3, window_bounds = array<i64: 32, 32>}, {pipeline_mode = #tpu.pipeline_mode<synchronous>, transform_indices = @transform_4, window_bounds = array<i64: 1, 96>}, {pipeline_mode = #tpu.pipeline_mode<synchronous>, transform_indices = @transform_5, window_bounds = array<i64: 1, 32>}, {transform_indices = @transform_6, window_bounds = array<i64: 8, 8, 32>}]} {
    %c0_i32 = arith.constant 0 : i32
    %0 = arith.cmpi eq, %arg1, %c0_i32 : i32
    %1 = arith.extui %0 : i1 to i32
    %c0_i32_0 = arith.constant 0 : i32
    %2 = arith.cmpi ne, %1, %c0_i32_0 : i32
    scf.if %2 {
      %cst_93 = arith.constant 0.000000e+00 : f32
      %273 = vector.broadcast %cst_93 : f32 to vector<8x32xf32>
      %c0_94 = arith.constant 0 : index
      %c0_95 = arith.constant 0 : index
      %274 = vector.load %arg9[%c0_94, %c0_95] : memref<8x32xf32, #tpu.memory_space<vmem>>, vector<8x32xf32>
      tpu.vector_store %arg9[%c0_94, %c0_95], %273 {strides = array<i32>} : memref<8x32xf32, #tpu.memory_space<vmem>>, vector<8x32xf32>,
    } else {
    }
    %c0 = arith.constant 0 : index
    %c0_1 = arith.constant 0 : index
    %3 = vector.load %arg3[%c0, %c0_1] : memref<32x96xf32, #tpu.memory_space<vmem>>, vector<32x96xf32>
    %c0_2 = arith.constant 0 : index
    %c0_3 = arith.constant 0 : index
    %4 = vector.load %arg4[%c0_2, %c0_3] : memref<32x64xf32, #tpu.memory_space<vmem>>, vector<32x64xf32>
    %c0_4 = arith.constant 0 : index
    %c0_5 = arith.constant 0 : index
    %5 = vector.load %arg5[%c0_4, %c0_5] : memref<32x32xf32, #tpu.memory_space<vmem>>, vector<32x32xf32>
    %c0_6 = arith.constant 0 : index
    %c0_7 = arith.constant 0 : index
    %6 = vector.load %arg7[%c0_6, %c0_7] : memref<1x32xf32, #tpu.memory_space<vmem>>, vector<1x32xf32>
    %c0_8 = arith.constant 0 : index
    %c0_9 = arith.constant 0 : index
    %c0_10 = arith.constant 0 : index
    %7 = vector.load %arg2[%c0_8, %c0_9, %c0_10] : memref<8x8x32xf32, #tpu.memory_space<vmem>>, vector<8x8x32xf32>
    %8 = vector.shape_cast %7 : vector<8x8x32xf32> to vector<64x32xf32>
    %cst = arith.constant dense<0.000000e+00> : vector<64x96xf32>
    %9 = tpu.matmul %8, %3, %cst {dimension_numbers = #tpu.dot_dimension_numbers<[1], [0], [0], [1], [0, 0, 1, 1], [], []>} : vector<64x32xf32>, vector<32x96xf32>, vector<64x96xf32> -> vector<64x96xf32>
    %c0_11 = arith.constant 0 : index
    %c0_12 = arith.constant 0 : index
    %10 = vector.load %arg6[%c0_11, %c0_12] : memref<1x96xf32, #tpu.memory_space<vmem>>, vector<1x96xf32>
    %11 = vector.broadcast %10 : vector<1x96xf32> to vector<64x96xf32>
    %12 = arith.addf %9, %11 : vector<64x96xf32>
    %13 = vector.shape_cast %12 : vector<64x96xf32> to vector<8x8x96xf32>
    %c0_13 = arith.constant 0 : index
    %c0_14 = arith.constant 0 : index
    %c0_15 = arith.constant 0 : index
    %14 = vector.load %arg10[%c0_13, %c0_14, %c0_15] : memref<8x8x96xf32, #tpu.memory_space<vmem>>, vector<8x8x96xf32>
    tpu.vector_store %arg10[%c0_13, %c0_14, %c0_15], %13 {strides = array<i32>} : memref<8x8x96xf32, #tpu.memory_space<vmem>>, vector<8x8x96xf32>,
    %c0_16 = arith.constant 0 : index
    %c0_17 = arith.constant 0 : index
    %15 = vector.load %arg9[%c0_16, %c0_17] : memref<8x32xf32, #tpu.memory_space<vmem>>, vector<8x32xf32>
    %cst_18 = arith.constant dense<0.000000e+00> : vector<8x64xf32>
    %16 = tpu.matmul %15, %4, %cst_18 {dimension_numbers = #tpu.dot_dimension_numbers<[1], [0], [0], [1], [0, 0, 1, 1], [], []>} : vector<8x32xf32>, vector<32x64xf32>, vector<8x64xf32> -> vector<8x64xf32>
    %cst_19 = arith.constant dense<0.000000e+00> : vector<8x32xf32>
    %17 = tpu.matmul %15, %5, %cst_19 {dimension_numbers = #tpu.dot_dimension_numbers<[1], [0], [0], [1], [0, 0, 1, 1], [], []>} : vector<8x32xf32>, vector<32x32xf32>, vector<8x32xf32> -> vector<8x32xf32>
    %18 = vector.broadcast %6 : vector<1x32xf32> to vector<8x32xf32>
    %19 = arith.addf %17, %18 : vector<8x32xf32>
    %c0_20 = arith.constant 0 : index
    %c0_21 = arith.constant 0 : index
    %c0_22 = arith.constant 0 : index
    %20 = vector.load %arg10[%c0_20, %c0_21, %c0_22] : memref<8x8x96xf32, #tpu.memory_space<vmem>>, vector<8x1x96xf32>
    %21 = vector.shape_cast %20 : vector<8x1x96xf32> to vector<8x96xf32>
    %22 = vector.extract_strided_slice %21 {offsets = [0, 0], sizes = [8, 32], strides = [1, 1]} : vector<8x96xf32> to vector<8x32xf32>
    %23 = vector.extract_strided_slice %16 {offsets = [0, 0], sizes = [8, 32], strides = [1, 1]} : vector<8x64xf32> to vector<8x32xf32>
    %24 = arith.addf %22, %23 : vector<8x32xf32>
    %25 = arith.negf %24 : vector<8x32xf32>
    %26 = math.exp %25 : vector<8x32xf32>
    %cst_23 = arith.constant 1.000000e+00 : f32
    %27 = vector.broadcast %cst_23 : f32 to vector<8x32xf32>
    %28 = arith.addf %27, %26 : vector<8x32xf32>
    %29 = arith.divf %27, %28 : vector<8x32xf32>
    %30 = vector.extract_strided_slice %21 {offsets = [0, 32], sizes = [8, 32], strides = [1, 1]} : vector<8x96xf32> to vector<8x32xf32>
    %31 = vector.extract_strided_slice %16 {offsets = [0, 32], sizes = [8, 32], strides = [1, 1]} : vector<8x64xf32> to vector<8x32xf32>
    %32 = arith.addf %30, %31 : vector<8x32xf32>
    %33 = arith.negf %32 : vector<8x32xf32>
    %34 = math.exp %33 : vector<8x32xf32>
    %cst_24 = arith.constant 1.000000e+00 : f32
    %35 = vector.broadcast %cst_24 : f32 to vector<8x32xf32>
    %36 = arith.addf %35, %34 : vector<8x32xf32>
    %37 = arith.divf %35, %36 : vector<8x32xf32>
    %38 = vector.extract_strided_slice %21 {offsets = [0, 64], sizes = [8, 32], strides = [1, 1]} : vector<8x96xf32> to vector<8x32xf32>
    %39 = arith.mulf %29, %19 : vector<8x32xf32>
    %40 = arith.addf %38, %39 : vector<8x32xf32>
    %41 = math.tanh %40 : vector<8x32xf32>
    %42 = arith.subf %15, %41 : vector<8x32xf32>
    %43 = arith.mulf %37, %42 : vector<8x32xf32>
    %44 = arith.addf %41, %43 : vector<8x32xf32>
    %c0_25 = arith.constant 0 : index
    %c0_26 = arith.constant 0 : index
    %c0_27 = arith.constant 0 : index
    %45 = vector.load %arg8[%c0_25, %c0_26, %c0_27] : memref<8x8x32xf32, #tpu.memory_space<vmem>>, vector<8x1x32xf32>
    %46 = vector.shape_cast %45 : vector<8x1x32xf32> to vector<8x32xf32>
    %47 = vector.shape_cast %44 : vector<8x32xf32> to vector<8x1x32xf32>
    tpu.vector_store %arg8[%c0_25, %c0_26, %c0_27], %47 {strides = array<i32>} : memref<8x8x32xf32, #tpu.memory_space<vmem>>, vector<8x1x32xf32>,
    %cst_28 = arith.constant dense<0.000000e+00> : vector<8x64xf32>
    %48 = tpu.matmul %44, %4, %cst_28 {dimension_numbers = #tpu.dot_dimension_numbers<[1], [0], [0], [1], [0, 0, 1, 1], [], []>} : vector<8x32xf32>, vector<32x64xf32>, vector<8x64xf32> -> vector<8x64xf32>
    %cst_29 = arith.constant dense<0.000000e+00> : vector<8x32xf32>
    %49 = tpu.matmul %44, %5, %cst_29 {dimension_numbers = #tpu.dot_dimension_numbers<[1], [0], [0], [1], [0, 0, 1, 1], [], []>} : vector<8x32xf32>, vector<32x32xf32>, vector<8x32xf32> -> vector<8x32xf32>
    %50 = vector.broadcast %6 : vector<1x32xf32> to vector<8x32xf32>
    %51 = arith.addf %49, %50 : vector<8x32xf32>
    %c0_30 = arith.constant 0 : index
    %c1 = arith.constant 1 : index
    %c0_31 = arith.constant 0 : index
    %52 = vector.load %arg10[%c0_30, %c1, %c0_31] : memref<8x8x96xf32, #tpu.memory_space<vmem>>, vector<8x1x96xf32>
    %53 = vector.shape_cast %52 : vector<8x1x96xf32> to vector<8x96xf32>
    %54 = vector.extract_strided_slice %53 {offsets = [0, 0], sizes = [8, 32], strides = [1, 1]} : vector<8x96xf32> to vector<8x32xf32>
    %55 = vector.extract_strided_slice %48 {offsets = [0, 0], sizes = [8, 32], strides = [1, 1]} : vector<8x64xf32> to vector<8x32xf32>
    %56 = arith.addf %54, %55 : vector<8x32xf32>
    %57 = arith.negf %56 : vector<8x32xf32>
    %58 = math.exp %57 : vector<8x32xf32>
    %cst_32 = arith.constant 1.000000e+00 : f32
    %59 = vector.broadcast %cst_32 : f32 to vector<8x32xf32>
    %60 = arith.addf %59, %58 : vector<8x32xf32>
    %61 = arith.divf %59, %60 : vector<8x32xf32>
    %62 = vector.extract_strided_slice %53 {offsets = [0, 32], sizes = [8, 32], strides = [1, 1]} : vector<8x96xf32> to vector<8x32xf32>
    %63 = vector.extract_strided_slice %48 {offsets = [0, 32], sizes = [8, 32], strides = [1, 1]} : vector<8x64xf32> to vector<8x32xf32>
    %64 = arith.addf %62, %63 : vector<8x32xf32>
    %65 = arith.negf %64 : vector<8x32xf32>
    %66 = math.exp %65 : vector<8x32xf32>
    %cst_33 = arith.constant 1.000000e+00 : f32
    %67 = vector.broadcast %cst_33 : f32 to vector<8x32xf32>
    %68 = arith.addf %67, %66 : vector<8x32xf32>
    %69 = arith.divf %67, %68 : vector<8x32xf32>
    %70 = vector.extract_strided_slice %53 {offsets = [0, 64], sizes = [8, 32], strides = [1, 1]} : vector<8x96xf32> to vector<8x32xf32>
    %71 = arith.mulf %61, %51 : vector<8x32xf32>
    %72 = arith.addf %70, %71 : vector<8x32xf32>
    %73 = math.tanh %72 : vector<8x32xf32>
    %74 = arith.subf %44, %73 : vector<8x32xf32>
    %75 = arith.mulf %69, %74 : vector<8x32xf32>
    %76 = arith.addf %73, %75 : vector<8x32xf32>
    %c0_34 = arith.constant 0 : index
    %c1_35 = arith.constant 1 : index
    %c0_36 = arith.constant 0 : index
    %77 = vector.load %arg8[%c0_34, %c1_35, %c0_36] : memref<8x8x32xf32, #tpu.memory_space<vmem>>, vector<8x1x32xf32>
    %78 = vector.shape_cast %77 : vector<8x1x32xf32> to vector<8x32xf32>
    %79 = vector.shape_cast %76 : vector<8x32xf32> to vector<8x1x32xf32>
    tpu.vector_store %arg8[%c0_34, %c1_35, %c0_36], %79 {strides = array<i32>} : memref<8x8x32xf32, #tpu.memory_space<vmem>>, vector<8x1x32xf32>,
    %cst_37 = arith.constant dense<0.000000e+00> : vector<8x64xf32>
    %80 = tpu.matmul %76, %4, %cst_37 {dimension_numbers = #tpu.dot_dimension_numbers<[1], [0], [0], [1], [0, 0, 1, 1], [], []>} : vector<8x32xf32>, vector<32x64xf32>, vector<8x64xf32> -> vector<8x64xf32>
    %cst_38 = arith.constant dense<0.000000e+00> : vector<8x32xf32>
    %81 = tpu.matmul %76, %5, %cst_38 {dimension_numbers = #tpu.dot_dimension_numbers<[1], [0], [0], [1], [0, 0, 1, 1], [], []>} : vector<8x32xf32>, vector<32x32xf32>, vector<8x32xf32> -> vector<8x32xf32>
    %82 = vector.broadcast %6 : vector<1x32xf32> to vector<8x32xf32>
    %83 = arith.addf %81, %82 : vector<8x32xf32>
    %c0_39 = arith.constant 0 : index
    %c2 = arith.constant 2 : index
    %c0_40 = arith.constant 0 : index
    %84 = vector.load %arg10[%c0_39, %c2, %c0_40] : memref<8x8x96xf32, #tpu.memory_space<vmem>>, vector<8x1x96xf32>
    %85 = vector.shape_cast %84 : vector<8x1x96xf32> to vector<8x96xf32>
    %86 = vector.extract_strided_slice %85 {offsets = [0, 0], sizes = [8, 32], strides = [1, 1]} : vector<8x96xf32> to vector<8x32xf32>
    %87 = vector.extract_strided_slice %80 {offsets = [0, 0], sizes = [8, 32], strides = [1, 1]} : vector<8x64xf32> to vector<8x32xf32>
    %88 = arith.addf %86, %87 : vector<8x32xf32>
    %89 = arith.negf %88 : vector<8x32xf32>
    %90 = math.exp %89 : vector<8x32xf32>
    %cst_41 = arith.constant 1.000000e+00 : f32
    %91 = vector.broadcast %cst_41 : f32 to vector<8x32xf32>
    %92 = arith.addf %91, %90 : vector<8x32xf32>
    %93 = arith.divf %91, %92 : vector<8x32xf32>
    %94 = vector.extract_strided_slice %85 {offsets = [0, 32], sizes = [8, 32], strides = [1, 1]} : vector<8x96xf32> to vector<8x32xf32>
    %95 = vector.extract_strided_slice %80 {offsets = [0, 32], sizes = [8, 32], strides = [1, 1]} : vector<8x64xf32> to vector<8x32xf32>
    %96 = arith.addf %94, %95 : vector<8x32xf32>
    %97 = arith.negf %96 : vector<8x32xf32>
    %98 = math.exp %97 : vector<8x32xf32>
    %cst_42 = arith.constant 1.000000e+00 : f32
    %99 = vector.broadcast %cst_42 : f32 to vector<8x32xf32>
    %100 = arith.addf %99, %98 : vector<8x32xf32>
    %101 = arith.divf %99, %100 : vector<8x32xf32>
    %102 = vector.extract_strided_slice %85 {offsets = [0, 64], sizes = [8, 32], strides = [1, 1]} : vector<8x96xf32> to vector<8x32xf32>
    %103 = arith.mulf %93, %83 : vector<8x32xf32>
    %104 = arith.addf %102, %103 : vector<8x32xf32>
    %105 = math.tanh %104 : vector<8x32xf32>
    %106 = arith.subf %76, %105 : vector<8x32xf32>
    %107 = arith.mulf %101, %106 : vector<8x32xf32>
    %108 = arith.addf %105, %107 : vector<8x32xf32>
    %c0_43 = arith.constant 0 : index
    %c2_44 = arith.constant 2 : index
    %c0_45 = arith.constant 0 : index
    %109 = vector.load %arg8[%c0_43, %c2_44, %c0_45] : memref<8x8x32xf32, #tpu.memory_space<vmem>>, vector<8x1x32xf32>
    %110 = vector.shape_cast %109 : vector<8x1x32xf32> to vector<8x32xf32>
    %111 = vector.shape_cast %108 : vector<8x32xf32> to vector<8x1x32xf32>
    tpu.vector_store %arg8[%c0_43, %c2_44, %c0_45], %111 {strides = array<i32>} : memref<8x8x32xf32, #tpu.memory_space<vmem>>, vector<8x1x32xf32>,
    %cst_46 = arith.constant dense<0.000000e+00> : vector<8x64xf32>
    %112 = tpu.matmul %108, %4, %cst_46 {dimension_numbers = #tpu.dot_dimension_numbers<[1], [0], [0], [1], [0, 0, 1, 1], [], []>} : vector<8x32xf32>, vector<32x64xf32>, vector<8x64xf32> -> vector<8x64xf32>
    %cst_47 = arith.constant dense<0.000000e+00> : vector<8x32xf32>
    %113 = tpu.matmul %108, %5, %cst_47 {dimension_numbers = #tpu.dot_dimension_numbers<[1], [0], [0], [1], [0, 0, 1, 1], [], []>} : vector<8x32xf32>, vector<32x32xf32>, vector<8x32xf32> -> vector<8x32xf32>
    %114 = vector.broadcast %6 : vector<1x32xf32> to vector<8x32xf32>
    %115 = arith.addf %113, %114 : vector<8x32xf32>
    %c0_48 = arith.constant 0 : index
    %c3 = arith.constant 3 : index
    %c0_49 = arith.constant 0 : index
    %116 = vector.load %arg10[%c0_48, %c3, %c0_49] : memref<8x8x96xf32, #tpu.memory_space<vmem>>, vector<8x1x96xf32>
    %117 = vector.shape_cast %116 : vector<8x1x96xf32> to vector<8x96xf32>
    %118 = vector.extract_strided_slice %117 {offsets = [0, 0], sizes = [8, 32], strides = [1, 1]} : vector<8x96xf32> to vector<8x32xf32>
    %119 = vector.extract_strided_slice %112 {offsets = [0, 0], sizes = [8, 32], strides = [1, 1]} : vector<8x64xf32> to vector<8x32xf32>
    %120 = arith.addf %118, %119 : vector<8x32xf32>
    %121 = arith.negf %120 : vector<8x32xf32>
    %122 = math.exp %121 : vector<8x32xf32>
    %cst_50 = arith.constant 1.000000e+00 : f32
    %123 = vector.broadcast %cst_50 : f32 to vector<8x32xf32>
    %124 = arith.addf %123, %122 : vector<8x32xf32>
    %125 = arith.divf %123, %124 : vector<8x32xf32>
    %126 = vector.extract_strided_slice %117 {offsets = [0, 32], sizes = [8, 32], strides = [1, 1]} : vector<8x96xf32> to vector<8x32xf32>
    %127 = vector.extract_strided_slice %112 {offsets = [0, 32], sizes = [8, 32], strides = [1, 1]} : vector<8x64xf32> to vector<8x32xf32>
    %128 = arith.addf %126, %127 : vector<8x32xf32>
    %129 = arith.negf %128 : vector<8x32xf32>
    %130 = math.exp %129 : vector<8x32xf32>
    %cst_51 = arith.constant 1.000000e+00 : f32
    %131 = vector.broadcast %cst_51 : f32 to vector<8x32xf32>
    %132 = arith.addf %131, %130 : vector<8x32xf32>
    %133 = arith.divf %131, %132 : vector<8x32xf32>
    %134 = vector.extract_strided_slice %117 {offsets = [0, 64], sizes = [8, 32], strides = [1, 1]} : vector<8x96xf32> to vector<8x32xf32>
    %135 = arith.mulf %125, %115 : vector<8x32xf32>
    %136 = arith.addf %134, %135 : vector<8x32xf32>
    %137 = math.tanh %136 : vector<8x32xf32>
    %138 = arith.subf %108, %137 : vector<8x32xf32>
    %139 = arith.mulf %133, %138 : vector<8x32xf32>
    %140 = arith.addf %137, %139 : vector<8x32xf32>
    %c0_52 = arith.constant 0 : index
    %c3_53 = arith.constant 3 : index
    %c0_54 = arith.constant 0 : index
    %141 = vector.load %arg8[%c0_52, %c3_53, %c0_54] : memref<8x8x32xf32, #tpu.memory_space<vmem>>, vector<8x1x32xf32>
    %142 = vector.shape_cast %141 : vector<8x1x32xf32> to vector<8x32xf32>
    %143 = vector.shape_cast %140 : vector<8x32xf32> to vector<8x1x32xf32>
    tpu.vector_store %arg8[%c0_52, %c3_53, %c0_54], %143 {strides = array<i32>} : memref<8x8x32xf32, #tpu.memory_space<vmem>>, vector<8x1x32xf32>,
    %cst_55 = arith.constant dense<0.000000e+00> : vector<8x64xf32>
    %144 = tpu.matmul %140, %4, %cst_55 {dimension_numbers = #tpu.dot_dimension_numbers<[1], [0], [0], [1], [0, 0, 1, 1], [], []>} : vector<8x32xf32>, vector<32x64xf32>, vector<8x64xf32> -> vector<8x64xf32>
    %cst_56 = arith.constant dense<0.000000e+00> : vector<8x32xf32>
    %145 = tpu.matmul %140, %5, %cst_56 {dimension_numbers = #tpu.dot_dimension_numbers<[1], [0], [0], [1], [0, 0, 1, 1], [], []>} : vector<8x32xf32>, vector<32x32xf32>, vector<8x32xf32> -> vector<8x32xf32>
    %146 = vector.broadcast %6 : vector<1x32xf32> to vector<8x32xf32>
    %147 = arith.addf %145, %146 : vector<8x32xf32>
    %c0_57 = arith.constant 0 : index
    %c4 = arith.constant 4 : index
    %c0_58 = arith.constant 0 : index
    %148 = vector.load %arg10[%c0_57, %c4, %c0_58] : memref<8x8x96xf32, #tpu.memory_space<vmem>>, vector<8x1x96xf32>
    %149 = vector.shape_cast %148 : vector<8x1x96xf32> to vector<8x96xf32>
    %150 = vector.extract_strided_slice %149 {offsets = [0, 0], sizes = [8, 32], strides = [1, 1]} : vector<8x96xf32> to vector<8x32xf32>
    %151 = vector.extract_strided_slice %144 {offsets = [0, 0], sizes = [8, 32], strides = [1, 1]} : vector<8x64xf32> to vector<8x32xf32>
    %152 = arith.addf %150, %151 : vector<8x32xf32>
    %153 = arith.negf %152 : vector<8x32xf32>
    %154 = math.exp %153 : vector<8x32xf32>
    %cst_59 = arith.constant 1.000000e+00 : f32
    %155 = vector.broadcast %cst_59 : f32 to vector<8x32xf32>
    %156 = arith.addf %155, %154 : vector<8x32xf32>
    %157 = arith.divf %155, %156 : vector<8x32xf32>
    %158 = vector.extract_strided_slice %149 {offsets = [0, 32], sizes = [8, 32], strides = [1, 1]} : vector<8x96xf32> to vector<8x32xf32>
    %159 = vector.extract_strided_slice %144 {offsets = [0, 32], sizes = [8, 32], strides = [1, 1]} : vector<8x64xf32> to vector<8x32xf32>
    %160 = arith.addf %158, %159 : vector<8x32xf32>
    %161 = arith.negf %160 : vector<8x32xf32>
    %162 = math.exp %161 : vector<8x32xf32>
    %cst_60 = arith.constant 1.000000e+00 : f32
    %163 = vector.broadcast %cst_60 : f32 to vector<8x32xf32>
    %164 = arith.addf %163, %162 : vector<8x32xf32>
    %165 = arith.divf %163, %164 : vector<8x32xf32>
    %166 = vector.extract_strided_slice %149 {offsets = [0, 64], sizes = [8, 32], strides = [1, 1]} : vector<8x96xf32> to vector<8x32xf32>
    %167 = arith.mulf %157, %147 : vector<8x32xf32>
    %168 = arith.addf %166, %167 : vector<8x32xf32>
    %169 = math.tanh %168 : vector<8x32xf32>
    %170 = arith.subf %140, %169 : vector<8x32xf32>
    %171 = arith.mulf %165, %170 : vector<8x32xf32>
    %172 = arith.addf %169, %171 : vector<8x32xf32>
    %c0_61 = arith.constant 0 : index
    %c4_62 = arith.constant 4 : index
    %c0_63 = arith.constant 0 : index
    %173 = vector.load %arg8[%c0_61, %c4_62, %c0_63] : memref<8x8x32xf32, #tpu.memory_space<vmem>>, vector<8x1x32xf32>
    %174 = vector.shape_cast %173 : vector<8x1x32xf32> to vector<8x32xf32>
    %175 = vector.shape_cast %172 : vector<8x32xf32> to vector<8x1x32xf32>
    tpu.vector_store %arg8[%c0_61, %c4_62, %c0_63], %175 {strides = array<i32>} : memref<8x8x32xf32, #tpu.memory_space<vmem>>, vector<8x1x32xf32>,
    %cst_64 = arith.constant dense<0.000000e+00> : vector<8x64xf32>
    %176 = tpu.matmul %172, %4, %cst_64 {dimension_numbers = #tpu.dot_dimension_numbers<[1], [0], [0], [1], [0, 0, 1, 1], [], []>} : vector<8x32xf32>, vector<32x64xf32>, vector<8x64xf32> -> vector<8x64xf32>
    %cst_65 = arith.constant dense<0.000000e+00> : vector<8x32xf32>
    %177 = tpu.matmul %172, %5, %cst_65 {dimension_numbers = #tpu.dot_dimension_numbers<[1], [0], [0], [1], [0, 0, 1, 1], [], []>} : vector<8x32xf32>, vector<32x32xf32>, vector<8x32xf32> -> vector<8x32xf32>
    %178 = vector.broadcast %6 : vector<1x32xf32> to vector<8x32xf32>
    %179 = arith.addf %177, %178 : vector<8x32xf32>
    %c0_66 = arith.constant 0 : index
    %c5 = arith.constant 5 : index
    %c0_67 = arith.constant 0 : index
    %180 = vector.load %arg10[%c0_66, %c5, %c0_67] : memref<8x8x96xf32, #tpu.memory_space<vmem>>, vector<8x1x96xf32>
    %181 = vector.shape_cast %180 : vector<8x1x96xf32> to vector<8x96xf32>
    %182 = vector.extract_strided_slice %181 {offsets = [0, 0], sizes = [8, 32], strides = [1, 1]} : vector<8x96xf32> to vector<8x32xf32>
    %183 = vector.extract_strided_slice %176 {offsets = [0, 0], sizes = [8, 32], strides = [1, 1]} : vector<8x64xf32> to vector<8x32xf32>
    %184 = arith.addf %182, %183 : vector<8x32xf32>
    %185 = arith.negf %184 : vector<8x32xf32>
    %186 = math.exp %185 : vector<8x32xf32>
    %cst_68 = arith.constant 1.000000e+00 : f32
    %187 = vector.broadcast %cst_68 : f32 to vector<8x32xf32>
    %188 = arith.addf %187, %186 : vector<8x32xf32>
    %189 = arith.divf %187, %188 : vector<8x32xf32>
    %190 = vector.extract_strided_slice %181 {offsets = [0, 32], sizes = [8, 32], strides = [1, 1]} : vector<8x96xf32> to vector<8x32xf32>
    %191 = vector.extract_strided_slice %176 {offsets = [0, 32], sizes = [8, 32], strides = [1, 1]} : vector<8x64xf32> to vector<8x32xf32>
    %192 = arith.addf %190, %191 : vector<8x32xf32>
    %193 = arith.negf %192 : vector<8x32xf32>
    %194 = math.exp %193 : vector<8x32xf32>
    %cst_69 = arith.constant 1.000000e+00 : f32
    %195 = vector.broadcast %cst_69 : f32 to vector<8x32xf32>
    %196 = arith.addf %195, %194 : vector<8x32xf32>
    %197 = arith.divf %195, %196 : vector<8x32xf32>
    %198 = vector.extract_strided_slice %181 {offsets = [0, 64], sizes = [8, 32], strides = [1, 1]} : vector<8x96xf32> to vector<8x32xf32>
    %199 = arith.mulf %189, %179 : vector<8x32xf32>
    %200 = arith.addf %198, %199 : vector<8x32xf32>
    %201 = math.tanh %200 : vector<8x32xf32>
    %202 = arith.subf %172, %201 : vector<8x32xf32>
    %203 = arith.mulf %197, %202 : vector<8x32xf32>
    %204 = arith.addf %201, %203 : vector<8x32xf32>
    %c0_70 = arith.constant 0 : index
    %c5_71 = arith.constant 5 : index
    %c0_72 = arith.constant 0 : index
    %205 = vector.load %arg8[%c0_70, %c5_71, %c0_72] : memref<8x8x32xf32, #tpu.memory_space<vmem>>, vector<8x1x32xf32>
    %206 = vector.shape_cast %205 : vector<8x1x32xf32> to vector<8x32xf32>
    %207 = vector.shape_cast %204 : vector<8x32xf32> to vector<8x1x32xf32>
    tpu.vector_store %arg8[%c0_70, %c5_71, %c0_72], %207 {strides = array<i32>} : memref<8x8x32xf32, #tpu.memory_space<vmem>>, vector<8x1x32xf32>,
    %cst_73 = arith.constant dense<0.000000e+00> : vector<8x64xf32>
    %208 = tpu.matmul %204, %4, %cst_73 {dimension_numbers = #tpu.dot_dimension_numbers<[1], [0], [0], [1], [0, 0, 1, 1], [], []>} : vector<8x32xf32>, vector<32x64xf32>, vector<8x64xf32> -> vector<8x64xf32>
    %cst_74 = arith.constant dense<0.000000e+00> : vector<8x32xf32>
    %209 = tpu.matmul %204, %5, %cst_74 {dimension_numbers = #tpu.dot_dimension_numbers<[1], [0], [0], [1], [0, 0, 1, 1], [], []>} : vector<8x32xf32>, vector<32x32xf32>, vector<8x32xf32> -> vector<8x32xf32>
    %210 = vector.broadcast %6 : vector<1x32xf32> to vector<8x32xf32>
    %211 = arith.addf %209, %210 : vector<8x32xf32>
    %c0_75 = arith.constant 0 : index
    %c6 = arith.constant 6 : index
    %c0_76 = arith.constant 0 : index
    %212 = vector.load %arg10[%c0_75, %c6, %c0_76] : memref<8x8x96xf32, #tpu.memory_space<vmem>>, vector<8x1x96xf32>
    %213 = vector.shape_cast %212 : vector<8x1x96xf32> to vector<8x96xf32>
    %214 = vector.extract_strided_slice %213 {offsets = [0, 0], sizes = [8, 32], strides = [1, 1]} : vector<8x96xf32> to vector<8x32xf32>
    %215 = vector.extract_strided_slice %208 {offsets = [0, 0], sizes = [8, 32], strides = [1, 1]} : vector<8x64xf32> to vector<8x32xf32>
    %216 = arith.addf %214, %215 : vector<8x32xf32>
    %217 = arith.negf %216 : vector<8x32xf32>
    %218 = math.exp %217 : vector<8x32xf32>
    %cst_77 = arith.constant 1.000000e+00 : f32
    %219 = vector.broadcast %cst_77 : f32 to vector<8x32xf32>
    %220 = arith.addf %219, %218 : vector<8x32xf32>
    %221 = arith.divf %219, %220 : vector<8x32xf32>
    %222 = vector.extract_strided_slice %213 {offsets = [0, 32], sizes = [8, 32], strides = [1, 1]} : vector<8x96xf32> to vector<8x32xf32>
    %223 = vector.extract_strided_slice %208 {offsets = [0, 32], sizes = [8, 32], strides = [1, 1]} : vector<8x64xf32> to vector<8x32xf32>
    %224 = arith.addf %222, %223 : vector<8x32xf32>
    %225 = arith.negf %224 : vector<8x32xf32>
    %226 = math.exp %225 : vector<8x32xf32>
    %cst_78 = arith.constant 1.000000e+00 : f32
    %227 = vector.broadcast %cst_78 : f32 to vector<8x32xf32>
    %228 = arith.addf %227, %226 : vector<8x32xf32>
    %229 = arith.divf %227, %228 : vector<8x32xf32>
    %230 = vector.extract_strided_slice %213 {offsets = [0, 64], sizes = [8, 32], strides = [1, 1]} : vector<8x96xf32> to vector<8x32xf32>
    %231 = arith.mulf %221, %211 : vector<8x32xf32>
    %232 = arith.addf %230, %231 : vector<8x32xf32>
    %233 = math.tanh %232 : vector<8x32xf32>
    %234 = arith.subf %204, %233 : vector<8x32xf32>
    %235 = arith.mulf %229, %234 : vector<8x32xf32>
    %236 = arith.addf %233, %235 : vector<8x32xf32>
    %c0_79 = arith.constant 0 : index
    %c6_80 = arith.constant 6 : index
    %c0_81 = arith.constant 0 : index
    %237 = vector.load %arg8[%c0_79, %c6_80, %c0_81] : memref<8x8x32xf32, #tpu.memory_space<vmem>>, vector<8x1x32xf32>
    %238 = vector.shape_cast %237 : vector<8x1x32xf32> to vector<8x32xf32>
    %239 = vector.shape_cast %236 : vector<8x32xf32> to vector<8x1x32xf32>
    tpu.vector_store %arg8[%c0_79, %c6_80, %c0_81], %239 {strides = array<i32>} : memref<8x8x32xf32, #tpu.memory_space<vmem>>, vector<8x1x32xf32>,
    %cst_82 = arith.constant dense<0.000000e+00> : vector<8x64xf32>
    %240 = tpu.matmul %236, %4, %cst_82 {dimension_numbers = #tpu.dot_dimension_numbers<[1], [0], [0], [1], [0, 0, 1, 1], [], []>} : vector<8x32xf32>, vector<32x64xf32>, vector<8x64xf32> -> vector<8x64xf32>
    %cst_83 = arith.constant dense<0.000000e+00> : vector<8x32xf32>
    %241 = tpu.matmul %236, %5, %cst_83 {dimension_numbers = #tpu.dot_dimension_numbers<[1], [0], [0], [1], [0, 0, 1, 1], [], []>} : vector<8x32xf32>, vector<32x32xf32>, vector<8x32xf32> -> vector<8x32xf32>
    %242 = vector.broadcast %6 : vector<1x32xf32> to vector<8x32xf32>
    %243 = arith.addf %241, %242 : vector<8x32xf32>
    %c0_84 = arith.constant 0 : index
    %c7 = arith.constant 7 : index
    %c0_85 = arith.constant 0 : index
    %244 = vector.load %arg10[%c0_84, %c7, %c0_85] : memref<8x8x96xf32, #tpu.memory_space<vmem>>, vector<8x1x96xf32>
    %245 = vector.shape_cast %244 : vector<8x1x96xf32> to vector<8x96xf32>
    %246 = vector.extract_strided_slice %245 {offsets = [0, 0], sizes = [8, 32], strides = [1, 1]} : vector<8x96xf32> to vector<8x32xf32>
    %247 = vector.extract_strided_slice %240 {offsets = [0, 0], sizes = [8, 32], strides = [1, 1]} : vector<8x64xf32> to vector<8x32xf32>
    %248 = arith.addf %246, %247 : vector<8x32xf32>
    %249 = arith.negf %248 : vector<8x32xf32>
    %250 = math.exp %249 : vector<8x32xf32>
    %cst_86 = arith.constant 1.000000e+00 : f32
    %251 = vector.broadcast %cst_86 : f32 to vector<8x32xf32>
    %252 = arith.addf %251, %250 : vector<8x32xf32>
    %253 = arith.divf %251, %252 : vector<8x32xf32>
    %254 = vector.extract_strided_slice %245 {offsets = [0, 32], sizes = [8, 32], strides = [1, 1]} : vector<8x96xf32> to vector<8x32xf32>
    %255 = vector.extract_strided_slice %240 {offsets = [0, 32], sizes = [8, 32], strides = [1, 1]} : vector<8x64xf32> to vector<8x32xf32>
    %256 = arith.addf %254, %255 : vector<8x32xf32>
    %257 = arith.negf %256 : vector<8x32xf32>
    %258 = math.exp %257 : vector<8x32xf32>
    %cst_87 = arith.constant 1.000000e+00 : f32
    %259 = vector.broadcast %cst_87 : f32 to vector<8x32xf32>
    %260 = arith.addf %259, %258 : vector<8x32xf32>
    %261 = arith.divf %259, %260 : vector<8x32xf32>
    %262 = vector.extract_strided_slice %245 {offsets = [0, 64], sizes = [8, 32], strides = [1, 1]} : vector<8x96xf32> to vector<8x32xf32>
    %263 = arith.mulf %253, %243 : vector<8x32xf32>
    %264 = arith.addf %262, %263 : vector<8x32xf32>
    %265 = math.tanh %264 : vector<8x32xf32>
    %266 = arith.subf %236, %265 : vector<8x32xf32>
    %267 = arith.mulf %261, %266 : vector<8x32xf32>
    %268 = arith.addf %265, %267 : vector<8x32xf32>
    %c0_88 = arith.constant 0 : index
    %c7_89 = arith.constant 7 : index
    %c0_90 = arith.constant 0 : index
    %269 = vector.load %arg8[%c0_88, %c7_89, %c0_90] : memref<8x8x32xf32, #tpu.memory_space<vmem>>, vector<8x1x32xf32>
    %270 = vector.shape_cast %269 : vector<8x1x32xf32> to vector<8x32xf32>
    %271 = vector.shape_cast %268 : vector<8x32xf32> to vector<8x1x32xf32>
    tpu.vector_store %arg8[%c0_88, %c7_89, %c0_90], %271 {strides = array<i32>} : memref<8x8x32xf32, #tpu.memory_space<vmem>>, vector<8x1x32xf32>,
    %c0_91 = arith.constant 0 : index
    %c0_92 = arith.constant 0 : index
    %272 = vector.load %arg9[%c0_91, %c0_92] : memref<8x32xf32, #tpu.memory_space<vmem>>, vector<8x32xf32>
    tpu.vector_store %arg9[%c0_91, %c0_92], %268 {strides = array<i32>} : memref<8x32xf32, #tpu.memory_space<vmem>>, vector<8x32xf32>,
    return
  }
  func.func @transform_0(%arg0: i32, %arg1: i32) -> (i32, i32, i32) {
    %c0_i32 = arith.constant 0 : i32
    %c0_i32_0 = arith.constant 0 : i32
    return %arg0, %arg1, %c0_i32 : i32, i32, i32
  }
  func.func @transform_1(%arg0: i32, %arg1: i32) -> (i32, i32) {
    %c0_i32 = arith.constant 0 : i32
    %c0_i32_0 = arith.constant 0 : i32
    %c0_i32_1 = arith.constant 0 : i32
    return %c0_i32, %c0_i32_0 : i32, i32
  }
  func.func @transform_2(%arg0: i32, %arg1: i32) -> (i32, i32) {
    %c0_i32 = arith.constant 0 : i32
    %c0_i32_0 = arith.constant 0 : i32
    %c0_i32_1 = arith.constant 0 : i32
    return %c0_i32, %c0_i32_0 : i32, i32
  }
  func.func @transform_3(%arg0: i32, %arg1: i32) -> (i32, i32) {
    %c0_i32 = arith.constant 0 : i32
    %c0_i32_0 = arith.constant 0 : i32
    %c0_i32_1 = arith.constant 0 : i32
    return %c0_i32, %c0_i32_0 : i32, i32
  }
  func.func @transform_4(%arg0: i32, %arg1: i32) -> (i32, i32) {
    %c0_i32 = arith.constant 0 : i32
    %c0_i32_0 = arith.constant 0 : i32
    %c0_i32_1 = arith.constant 0 : i32
    return %c0_i32, %c0_i32_0 : i32, i32
  }
  func.func @transform_5(%arg0: i32, %arg1: i32) -> (i32, i32) {
    %c0_i32 = arith.constant 0 : i32
    %c0_i32_0 = arith.constant 0 : i32
    %c0_i32_1 = arith.constant 0 : i32
    return %c0_i32, %c0_i32_0 : i32, i32
  }
  func.func @transform_6(%arg0: i32, %arg1: i32) -> (i32, i32, i32) {
    %c0_i32 = arith.constant 0 : i32
    %c0_i32_0 = arith.constant 0 : i32
    return %arg0, %arg1, %c0_i32 : i32, i32, i32
  }
}

</mosaic_0001>

<bundles_post_ra>
// kernel: gru_decoder_pallas.1
= control target key start
LH: loop header
LB: loop body
LE: loop exit
PB: predicated region body
PF: predicated region fallthrough
CT: control target
= control target key end

     0   :  { %vm6904_vm0 = vcmask 261120   ;;  %v4207_v2 = vmov 0.0   ;;  %vm120_vm1 = vcmask 785408   ;;  %s4208_s14 = smov 64   ;;  %s4210_s15 = smov 96   ;;  %s6897_s1 = inlined_call_operand.vmem [shape: f32[32,96], index: 1, kind: input, shape index: {}]   ;;  %s6898_s2 = inlined_call_operand.vmem [shape: f32[32,64], index: 2, kind: input, shape index: {}]   ;;  %s6899_s0 = inlined_call_operand.vmem [shape: f32[8,8,32], index: 0, kind: input, shape index: {}]   ;;  %s6900_s3 = inlined_call_operand.vmem [shape: f32[32,32], index: 3, kind: input, shape index: {}]   ;;  %s6901_s4 = inlined_call_operand.vmem [shape: f32[1,96], index: 4, kind: input, shape index: {}]   ;;  %s6902_s5 = inlined_call_operand.vmem [shape: f32[1,32], index: 5, kind: input, shape index: {}]   ;;  %s6903_s6 = inlined_call_operand.vmem [shape: f32[8,8,32], index: 6, kind: output, shape index: {}]  }
   0x1   :  { %v32_v0 = vld [vmem:[%s6897_s1 + $0x18] sm:$0xff]  ;;  %v31_v1 = vld [vmem:[%s6897_s1 + $0x10] sm:$0xff]  ;;  %28 = vst.msk [vmem:[#allocation2] sm:$0xff] %vm6904_vm0, %v4207_v2  ;;  %v30_v3 = vld [vmem:[%s6897_s1 + $0x8] sm:$0xff] }
   0x2   :  { %91 = vmatpush.msra.mxu0 %v32_v0  ;;  %3790 = vmatpush.msra.mxu2 %v32_v0  ;;  %v4259_v4 = vld [vmem:[%s6898_s2 + $0x18] sm:$0xff]  ;;  %v4264_v5 = vld [vmem:[%s6898_s2 + $0x10] sm:$0xff]  ;;  %v29_v6 = vld [vmem:[%s6897_s1] sm:$0xff]  ;;  %s4209_s1 = smov 32  }
   0x3   :  { %3791 = vmatpush.msra.mxu3 %v32_v0  ;;  %145 = vmatpush.msra.mxu1 %v4259_v4  ;;  %v42_v7 = vld [vmem:[%s6899_s0] sm:$0xff]  ;;  %v48_v8 = vld [vmem:[%s6899_s0 + $0x30] sm:$0xff]  ;;  %v49_v9 = vld [vmem:[%s6899_s0 + $0x38] sm:$0xff] }
   0x4   :  { %92 = vmatpush.msra.mxu0 %v31_v1  ;;  %3792 = vmatpush.msra.mxu2 %v31_v1  ;;  %v4283_v10 = vld [vmem:[%s6898_s2 + $0x8] sm:$0xff]  ;;  %v4288_v11 = vld [vmem:[%s6900_s3 + $0x18] sm:$0xff]  ;;  %v4296_v12 = vld [vmem:[%s6898_s2] sm:$0xff] }
   0x5   :  { %3793 = vmatpush.msra.mxu3 %v31_v1  ;;  %146 = vmatpush.msra.mxu1 %v4264_v5  ;;  %v4301_v13 = vld [vmem:[%s6900_s3 + $0x10] sm:$0xff]  ;;  %v4310_v15 = vld [vmem:[%s6900_s3 + $0x8] sm:$0xff]  ;;  %v4323_v17 = vld [vmem:[%s6900_s3] sm:$0xff] }
   0x6   :  { %93 = vmatpush.msra.mxu0 %v30_v3  ;;  %3794 = vmatpush.msra.mxu2 %v30_v3  ;;  %v43_v16 = vld [vmem:[%s6899_s0 + $0x8] sm:$0xff]  ;;  %v44_v18 = vld [vmem:[%s6899_s0 + $0x10] sm:$0xff]  ;;  %v45_v19 = vld [vmem:[%s6899_s0 + $0x18] sm:$0xff] }
   0x7   :  { %3795 = vmatpush.msra.mxu3 %v30_v3  ;;  %147 = vmatpush.msra.mxu1 %v4283_v10  ;;  %v46_v20 = vld [vmem:[%s6899_s0 + $0x20] sm:$0xff]  ;;  %v47_v21 = vld [vmem:[%s6899_s0 + $0x28] sm:$0xff] }
   0x8   :  { %94 = vmatpush.msra.mxu0 %v29_v6  ;;  %3796 = vmatpush.msra.mxu2 %v29_v6  ;;  %v4304_v14 = vld [vmem:[#allocation2] sm:$0xff] }
   0x9   :  { %3797 = vmatpush.msra.mxu3 %v29_v6  ;;  %3702 = vmatmul.msk.f32.vlgmr.msra.gmra.mxu0 %vm6904_vm0, %v42_v7  ;;  %v4372_v22 = vld [vmem:[%s6901_s4] ss:$0 sm:$0xff] }
   0xa   :  { %3708 = vmatmul.msk.f32.vlgmr.msra.gmra.mxu2 %vm6904_vm0, %v48_v8  ;;  %3709 = vmatmul.msk.f32.vlgmr.msra.gmra.mxu3 %vm6904_vm0, %v49_v9  ;;  %v4413_v63 = vld [vmem:[%s6902_s5] ss:$0 sm:$0xff] }
   0xb   :  { %168 = vmatpush.msrb.mxu2 %v4288_v11  ;;  %616 = vmatpush.msrb.mxu3 %v4259_v4 }
   0xc   :  { %148 = vmatpush.msra.mxu1 %v4296_v12 }
   0xd   :  { %169 = vmatpush.msrb.mxu2 %v4301_v13  ;;  %3710 = vmatmul.msk.f32.vlgmr.msra.gmra.mxu1 %vm6904_vm0, %v4304_v14 }
   0xe   :  { %617 = vmatpush.msrb.mxu3 %v4264_v5  ;;  %636 = vmatpush.msrb.mxu1 %v4288_v11 }
   0xf   :  { %170 = vmatpush.msrb.mxu2 %v4310_v15 }
  0x10   :  { %618 = vmatpush.msrb.mxu3 %v4283_v10  ;;  %637 = vmatpush.msrb.mxu1 %v4301_v13 }
  0x11   :  { %3703 = vmatmul.msk.f32.gmra.mxu0 %vm6904_vm0, %v43_v16  ;;  %171 = vmatpush.msrb.mxu2 %v4323_v17 }
  0x12   :  { %3711 = vmatmul.msk.f32.vlgmr.msrb.gmra.mxu2 %vm6904_vm0, %v4304_v14  ;;  %619 = vmatpush.msrb.mxu3 %v4296_v12 }
  0x13   :  { %1058 = vmatpush.msra.mxu2 %v4259_v4  ;;  %638 = vmatpush.msrb.mxu1 %v4310_v15 }
  0x14   :  { %1078 = vmatpush.msra.mxu3 %v4288_v11 }
  0x15   :  { %1059 = vmatpush.msra.mxu2 %v4264_v5  ;;  %639 = vmatpush.msrb.mxu1 %v4323_v17 }
  0x16   :  { %1079 = vmatpush.msra.mxu3 %v4301_v13 }
  0x17   :  { %1060 = vmatpush.msra.mxu2 %v4283_v10  ;;  %1500 = vmatpush.msra.mxu1 %v4259_v4 }
  0x18   :  { %1080 = vmatpush.msra.mxu3 %v4310_v15 }
  0x19   :  { %3704 = vmatmul.msk.f32.gmra.mxu0 %vm6904_vm0, %v44_v18  ;;  %1061 = vmatpush.msra.mxu2 %v4296_v12 }
  0x1a   :  { %1081 = vmatpush.msra.mxu3 %v4323_v17  ;;  %1501 = vmatpush.msra.mxu1 %v4264_v5 }
  0x1b   :  { %1520 = vmatpush.msrb.mxu2 %v4288_v11 }
  0x1c   :  { %1502 = vmatpush.msra.mxu1 %v4283_v10 }
  0x1d   :  { %1521 = vmatpush.msrb.mxu2 %v4301_v13 }
  0x1e   :  { %1503 = vmatpush.msra.mxu1 %v4296_v12 }
  0x1f   :  { %1522 = vmatpush.msrb.mxu2 %v4310_v15 }
  0x21   :  { %1523 = vmatpush.msrb.mxu2 %v4323_v17  ;;  %3705 = vmatmul.msk.f32.gmra.mxu0 %vm6904_vm0, %v45_v19 }
  0x29   :  { %3706 = vmatmul.msk.f32.gmra.mxu0 %vm6904_vm0, %v46_v20 }
  0x31   :  { %3707 = vmatmul.msk.f32.gmra.mxu0 %vm6904_vm0, %v47_v21 }
  0x86   :  { %v96_v23 = vpop.f32.mrf.mxu0 }
  0x87   :  { %v97_v24 = vadd.f32 %v4372_v22, %v96_v23 }
  0x89   :  { %121 = vst.msk [vmem:[#allocation3] sm:$0xff] %vm120_vm1, %v97_v24 }
  0x8a   :  { %v4378_v30 = vpop.f32.mrf.mxu1 }
  0x8b   :  { %v190_v35 = vrot.slane %v4378_v30, 6  ;;  %v185_v36 = vrot.slane %v4378_v30, 1  ;;  %v191_v37 = vrot.slane %v4378_v30, 7  ;;  %v186_v50 = vrot.slane %v4378_v30, 2 }
  0x8c   :  { %v187_v1 = vrot.slane %v4378_v30, 3 }
  0x8d   :  { %v114_v25 = vpop.f32.mrf.mxu2  ;;  %v117_v26 = vpop.f32.mrf.mxu3 }
  0x8e   :  { %v115_v27 = vadd.f32 %v4372_v22, %v114_v25  ;;  %v118_v28 = vadd.f32 %v4372_v22, %v117_v26  ;;  %v99_v29 = vpop.f32.mrf.mxu0 }
  0x8f   :  { %v100_v31 = vadd.f32 %v4372_v22, %v99_v29 }
  0x90   :  { %127 = vst.msk [vmem:[#allocation3 + $0x30] sm:$0xff] %vm120_vm1, %v115_v27  ;;  %v4382_v32 = vld [vmem:[#allocation3] sm:$0x1] }
  0x91   :  { %128 = vst.msk [vmem:[#allocation3 + $0x38] sm:$0xff] %vm120_vm1, %v118_v28  ;;  %v200_v33 = vadd.f32 %v4382_v32, %v4378_v30 }
  0x92   :  { %122 = vst.msk [vmem:[#allocation3 + $0x8] sm:$0xff] %vm120_vm1, %v100_v31 }
  0x93   :  { %v3712_v34 = vmul.f32 -1.442695, %v200_v33  ;;  %v188_v33 = vrot.slane %v4378_v30, 4 }
  0x95   :  { %3804 = vpow2.f32 %v3712_v34  ;;  %v173_v3 = vpop.f32.mrf.mxu2 }
  0x96   :  { %v102_v38 = vpop.f32.mrf.mxu0  ;;  %v4426_v20 = vadd.f32 %v4413_v63, %v173_v3 }
  0x97   :  { %v4391_v39 = vld [vmem:[#allocation3 + $0x30] sm:$0x1]  ;;  %v103_v40 = vadd.f32 %v4372_v22, %v102_v38 }
  0x98   :  { %v4394_v41 = vld [vmem:[#allocation3 + $0x38] sm:$0x1]  ;;  %v206_v42 = vadd.f32 %v190_v35, %v4391_v39 }
  0x99   :  { %123 = vst.msk [vmem:[#allocation3 + $0x10] sm:$0xff] %vm120_vm1, %v103_v40  ;;  %v4398_v43 = vld [vmem:[#allocation3 + $0x8] sm:$0x1]  ;;  %v207_v44 = vadd.f32 %v191_v37, %v4394_v41 }
  0x9a   :  { %v3718_v45 = vmul.f32 -1.442695, %v206_v42  ;;  %v201_v46 = vadd.f32 %v185_v36, %v4398_v43 }
  0x9b   :  { %v3805_v47 = vpop.eup %3804  ;;  %v3719_v51 = vmul.f32 -1.442695, %v207_v44 }
  0x9c   :  { %v232_v48 = vadd.f32 1.0, %v3805_v47  ;;  %v3713_v49 = vmul.f32 -1.442695, %v201_v46  ;;  %3806 = vpow2.f32 %v3718_v45 }
  0x9e   :  { %v105_v52 = vpop.f32.mrf.mxu0  ;;  %3808 = vrcp.f32 %v232_v48  ;;  %v251_v8 = vand.u32 2147483648, %v232_v48  ;;  %v249_v18 = vand.u32 2147483647, %v232_v48  ;;  %vm245_vm3 = vweird.f32 %v232_v48 }
  0x9f   :  { %v106_v53 = vadd.f32 %v4372_v22, %v105_v52  ;;  %3810 = vpow2.f32 %v3713_v49 }
  0xa0   :  { %v4404_v54 = vld [vmem:[#allocation3 + $0x10] sm:$0x1]  ;;  %3812 = vpow2.f32 %v3719_v51  ;;  %v252_v26 = vor.u32 1.1754944e-38, %v251_v8  ;;  %vm250_vm5 = vcmp.eq.f32.partialorder %v249_v18, 8.507059e+37  ;;  %v361_v51 = vrot.slane %v4426_v20, 1 }
  0xa1   :  { %124 = vst.msk [vmem:[#allocation3 + $0x18] sm:$0xff] %vm120_vm1, %v106_v53  ;;  %v202_v55 = vadd.f32 %v186_v50, %v4404_v54  ;;  %v362_v18 = vrot.slane %v4426_v20, 2 }
  0xa2   :  { %v3807_v56 = vpop.eup %3806 }
  0xa3   :  { %v3714_v57 = vmul.f32 -1.442695, %v202_v55  ;;  %v4408_v58 = vadd.f32 1.0, %v3807_v56 }
  0xa4   :  { %v3809_v59 = vpop.eup %3808 }
  0xa5   :  { %v3811_v60 = vpop.eup %3810  ;;  %v241_v61 = vmul.f32 %v3809_v59, %v232_v48  ;;  %3814 = vpow2.f32 %v3714_v57  ;;  %vm246_vm2 = vweird.f32 %v3809_v59  ;;  %vm335_vm11 = vweird.f32 %v4408_v58 }
  0xa6   :  { %v108_v62 = vpop.f32.mrf.mxu0  ;;  %v4415_v0 = vadd.f32 1.0, %v3811_v60  ;;  %3816 = vrcp.f32 %v4408_v58  ;;  %v3813_v7 = vpop.eup %3812  ;;  %vm247_vm4 = vmor %vm245_vm3, %vm246_vm2 }
  0xa7   :  { %v109_v2 = vadd.f32 %v4372_v22, %v108_v62  ;;  %v242_v6 = vsub.f32 1.0, %v241_v61  ;;  %v4428_v25 = vadd.f32 1.0, %v3813_v7 }
  0xa8   :  { %3818 = vrcp.f32 %v4415_v0  ;;  %v4421_v9 = vld [vmem:[#allocation3 + $0x18] sm:$0x1]  ;;  %v266_v45 = vand.u32 2147483648, %v4415_v0  ;;  %v264_v48 = vand.u32 2147483647, %v4415_v0  ;;  %vm260_vm7 = vweird.f32 %v4415_v0 }
  0xa9   :  { %125 = vst.msk [vmem:[#allocation3 + $0x20] sm:$0xff] %vm120_vm1, %v109_v2  ;;  %v243_v16 = vmul.f32 %v3809_v59, %v242_v6  ;;  %v203_v19 = vadd.f32 %v187_v1, %v4421_v9 }
  0xaa   :  { %v267_v60 = vor.u32 1.1754944e-38, %v266_v45  ;;  %vm265_vm9 = vcmp.eq.f32.partialorder %v264_v48, 8.507059e+37 }
  0xab   :  { %v3815_v21 = vpop.eup %3814  ;;  %v244_v23 = vadd.f32 %v3809_v59, %v243_v16  ;;  %v3715_v24 = vmul.f32 -1.442695, %v203_v19 }
  0xac   :  { %v4430_v27 = vadd.f32 1.0, %v3815_v21  ;;  %v4432_v28 = vpop.eup %3816 }
  0xad   :  { %v248_v29 = vsel %vm247_vm4, %v3809_v59, %v244_v23  ;;  %3820 = vpow2.f32 %v3715_v24  ;;  %v331_v40 = vmul.f32 %v4432_v28, %v4408_v58  ;;  %v189_v59 = vrot.slane %v4378_v30, 5 }
  0xae   :  { %v3819_v31 = vpop.eup %3818  ;;  %v111_v34 = vpop.f32.mrf.mxu0  ;;  %v4435_v35 = vsel %vm250_vm5, %v252_v26, %v248_v29  ;;  %3822 = vrcp.f32 %v4430_v27  ;;  %v279_v1 = vand.u32 2147483647, %v4430_v27  ;;  %v281_v3 = vand.u32 2147483648, %v4430_v27 }
  0xaf   :  { %v112_v36 = vadd.f32 %v4372_v22, %v111_v34  ;;  %v376_v37 = vmul.f32 %v4435_v35, %v4426_v20  ;;  %v256_v38 = vmul.f32 %v3819_v31, %v4415_v0  ;;  %3824 = vrcp.f32 %v4428_v25 }
  0xb0   :  { %v4445_v42 = vld [vmem:[#allocation3 + $0x20] sm:$0x1]  ;;  %vm261_vm6 = vweird.f32 %v3819_v31  ;;  %v332_v52 = vsub.f32 1.0, %v331_v40  ;;  %vm275_vm12 = vweird.f32 %v4430_v27  ;;  %vm336_vm13 = vweird.f32 %v4432_v28 }
  0xb1   :  { %126 = vst.msk [vmem:[#allocation3 + $0x28] sm:$0xff] %vm120_vm1, %v112_v36  ;;  %392 = vrot.lane.b32.xlu1 %v376_v37, %s4208_s14  ;;  %v257_v44 = vsub.f32 1.0, %v256_v38  ;;  %v204_v22 = vadd.f32 %v188_v33, %v4445_v42  ;;  %vm262_vm8 = vmor %vm260_vm7, %vm261_vm6  ;;  %vm280_vm15 = vcmp.eq.f32.partialorder %v279_v1, 8.507059e+37  ;;  %v282_v26 = vor.u32 1.1754944e-38, %v281_v3 }
  0xb2   :  { %v333_v0 = vmul.f32 %v4432_v28, %v332_v52  ;;  %v339_v40 = vand.u32 2147483647, %v4408_v58  ;;  %vm4491_vm1 = vmor %vm335_vm11, %vm336_vm13  ;;  %vm350_vm5 = vweird.f32 %v4428_v25 }
  0xb3   :  { %v3821_v46 = vpop.eup %3820  ;;  %v258_v47 = vmul.f32 %v3819_v31, %v257_v44  ;;  %v3716_v49 = vmul.f32 -1.442695, %v204_v22 }
  0xb4   :  { %v3823_v50 = vpop.eup %3822  ;;  %v4453_v53 = vadd.f32 1.0, %v3821_v46  ;;  %v334_v34 = vadd.f32 %v4432_v28, %v333_v0  ;;  %vm340_vm3 = vcmp.eq.f32.partialorder %v339_v40, 8.507059e+37 }
  0xb5   :  { %v4455_v55 = vpop.eup %3824  ;;  %v259_v56 = vadd.f32 %v3819_v31, %v258_v47  ;;  %v271_v57 = vmul.f32 %v3823_v50, %v4430_v27  ;;  %3826 = vpow2.f32 %v3716_v49  ;;  %vm276_vm10 = vweird.f32 %v3823_v50 }
  0xb6   :  { %3828 = vrcp.f32 %v4453_v53  ;;  %v346_v6 = vmul.f32 %v4455_v55, %v4428_v25  ;;  %vm277_vm14 = vmor %vm275_vm12, %vm276_vm10  ;;  %v341_v27 = vand.u32 2147483648, %v4408_v58  ;;  %v296_v45 = vand.u32 2147483648, %v4453_v53 }
  0xb7   :  { %v263_v61 = vsel %vm262_vm8, %v3819_v31, %v259_v56  ;;  %v272_v62 = vsub.f32 1.0, %v271_v57  ;;  %v338_v47 = vsel %vm4491_vm1, %v4432_v28, %v334_v34  ;;  %v294_v49 = vand.u32 2147483647, %v4453_v53 }
  0xb8   :  { %v4462_v2 = vsel %vm265_vm9, %v267_v60, %v263_v61  ;;  %v4468_v7 = vld [vmem:[#allocation3 + $0x28] sm:$0x1]  ;;  %v347_v31 = vsub.f32 1.0, %v346_v6  ;;  %v363_v58 = vrot.slane %v4426_v20, 3  ;;  %vm290_vm4 = vweird.f32 %v4453_v53 }
  0xb9   :  { %v377_v30 = vmul.f32 %v361_v51, %v4462_v2  ;;  %v273_v8 = vmul.f32 %v3823_v50, %v272_v62  ;;  %v205_v16 = vadd.f32 %v189_v59, %v4468_v7  ;;  %v366_v51 = vrot.slane %v4426_v20, 6 }
  0xba   :  { %v348_v46 = vmul.f32 %v4455_v55, %v347_v31  ;;  %v297_v59 = vor.u32 1.1754944e-38, %v296_v45  ;;  %vm351_vm7 = vweird.f32 %v4455_v55  ;;  %vm295_vm8 = vcmp.eq.f32.partialorder %v294_v49, 8.507059e+37 }
  0xbb   :  { %v3827_v19 = vpop.eup %3826  ;;  %394 = vrot.lane.b32.xlu0 %v377_v30, %s4208_s14  ;;  %v274_v21 = vadd.f32 %v3823_v50, %v273_v8  ;;  %v3717_v23 = vmul.f32 -1.442695, %v205_v16  ;;  %v354_v30 = vand.u32 2147483647, %v4428_v25  ;;  %vm4520_vm9 = vmor %vm350_vm5, %vm351_vm7  ;;  %vm6910_vm5 = vcmask 1042434  }
  0xbc   :  { %v3829_v24 = vpop.eup %3828  ;;  %v4477_v29 = vadd.f32 1.0, %v3827_v19  ;;  %v349_v1 = vadd.f32 %v4455_v55, %v348_v46  ;;  %vm6908_vm7 = vcmask 1044484  }
  0xbd   :  { %v278_v33 = vsel %vm277_vm14, %v3823_v50, %v274_v21  ;;  %v286_v36 = vmul.f32 %v3829_v24, %v4453_v53  ;;  %3830 = vpow2.f32 %v3717_v23  ;;  %vm291_vm2 = vweird.f32 %v3829_v24 }
  0xbe   :  { %v4481_v37 = vsel %vm280_vm15, %v282_v26, %v278_v33  ;;  %3832 = vrcp.f32 %v4477_v29  ;;  %v342_v50 = vor.u32 1.1754944e-38, %v341_v27  ;;  %vm292_vm6 = vmor %vm290_vm4, %vm291_vm2  ;;  %v356_v53 = vand.u32 2147483648, %v4428_v25 }
  0xbf   :  { %v378_v38 = vmul.f32 %v362_v18, %v4481_v37  ;;  %v287_v44 = vsub.f32 1.0, %v286_v36  ;;  %v311_v16 = vand.u32 2147483648, %v4477_v29  ;;  %v309_v21 = vand.u32 2147483647, %v4477_v29 }
  0xc0   :  { %v4506_v28 = vsel %vm340_vm3, %v342_v50, %v338_v47  ;;  %v353_v23 = vsel %vm4520_vm9, %v4455_v55, %v349_v1  ;;  %vm305_vm11 = vweird.f32 %v4477_v29  ;;  %vm355_vm12 = vcmp.eq.f32.partialorder %v354_v30, 8.507059e+37 }
  0xc1   :  { %v288_v48 = vmul.f32 %v3829_v24, %v287_v44  ;;  %v382_v8 = vmul.f32 %v366_v51, %v4506_v28  ;;  %v367_v25 = vrot.slane %v4426_v20, 7  ;;  %v312_v33 = vor.u32 1.1754944e-38, %v311_v16 }
  0xc2   :  { %vm310_vm14 = vcmp.eq.f32.partialorder %v309_v21, 8.507059e+37  ;;  %v364_v27 = vrot.slane %v4426_v20, 4  ;;  %v365_v50 = vrot.slane %v4426_v20, 5  ;;  %vm6911_vm4 = vcmask 1041409  }
  0xc3   :  { %v3831_v52 = vpop.eup %3830  ;;  %396 = vrot.lane.b32.xlu0 %v378_v38, %s4208_s14  ;;  %v289_v56 = vadd.f32 %v3829_v24, %v288_v48  ;;  %vm6906_vm9 = vcmask 1046534  }
  0xc4   :  { %v3833_v57 = vpop.eup %3832  ;;  %v237_v60 = vadd.f32 1.0, %v3831_v52 }
  0xc5   :  { %v293_v61 = vsel %vm292_vm6, %v3829_v24, %v289_v56  ;;  %v301_v62 = vmul.f32 %v3833_v57, %v4477_v29  ;;  %vm306_vm10 = vweird.f32 %v3833_v57  ;;  %v357_v24 = vor.u32 1.1754944e-38, %v356_v53 }
  0xc6   :  { %v4511_v3 = vsel %vm295_vm8, %v297_v59, %v293_v61  ;;  %3834 = vrcp.f32 %v237_v60  ;;  %vm307_vm13 = vmor %vm305_vm11, %vm306_vm10  ;;  %v326_v22 = vand.u32 2147483648, %v237_v60  ;;  %v324_v46 = vand.u32 2147483647, %v237_v60 }
  0xc7   :  { %v379_v0 = vmul.f32 %v363_v58, %v4511_v3  ;;  %v302_v6 = vsub.f32 1.0, %v301_v62  ;;  %v4532_v34 = vsel %vm355_vm12, %v357_v24, %v353_v23  ;;  %vm320_vm1 = vweird.f32 %v237_v60 }
  0xc8   :  { %v383_v44 = vmul.f32 %v367_v25, %v4532_v34  ;;  %v327_v48 = vor.u32 1.1754944e-38, %v326_v22  ;;  %vm325_vm3 = vcmp.eq.f32.partialorder %v324_v46, 8.507059e+37  ;;  %vm6909_vm6 = vcmask 1043459  }
  0xc9   :  { %398 = vrot.lane.b32.xlu1 %v379_v0, %s4208_s14  ;;  %v303_v19 = vmul.f32 %v3833_v57, %v302_v6  ;;  %vm6907_vm8 = vcmask 1045509   ;;  %vm6905_vm10 = vcmask 1047559  }
  0xcb   :  { %404 = vrot.lane.b32.xlu0 %v382_v8, %s4208_s14  ;;  %v304_v26 = vadd.f32 %v3833_v57, %v303_v19 }
  0xcc   :  { %v3835_v31 = vpop.eup %3834 }
  0xcd   :  { %v308_v36 = vsel %vm307_vm13, %v3833_v57, %v304_v26  ;;  %v316_v38 = vmul.f32 %v3835_v31, %v237_v60  ;;  %vm321_vm15 = vweird.f32 %v3835_v31 }
  0xce   :  { %v4535_v55 = vsel %vm310_vm14, %v312_v33, %v308_v36  ;;  %vm322_vm2 = vmor %vm320_vm1, %vm321_vm15 }
  0xcf   :  { %v380_v40 = vmul.f32 %v364_v27, %v4535_v55  ;;  %v317_v29 = vsub.f32 1.0, %v316_v38 }
  0xd1   :  { %400 = vrot.lane.b32.xlu2 %v380_v40, %s4208_s14  ;;  %406 = vrot.lane.b32.xlu1 %v383_v44, %s4208_s14  ;;  %v318_v45 = vmul.f32 %v3835_v31, %v317_v29 }
  0xd3   :  { %v319_v47 = vadd.f32 %v3835_v31, %v318_v45 }
  0xd5   :  { %v323_v49 = vsel %vm322_vm2, %v3835_v31, %v319_v47 }
  0xd6   :  { %v4542_v51 = vsel %vm325_vm3, %v327_v48, %v323_v49 }
  0xd7   :  { %v381_v58 = vmul.f32 %v365_v50, %v4542_v51 }
  0xd9   :  { %402 = vrot.lane.b32.xlu2 %v381_v58, %s4208_s14 }
 0x123   :  { %v393_v57 = vpop.permute.xlu1 %392 }
 0x124   :  { %v416_v62 = vadd.f32 %v393_v57, %v4382_v32 }
 0x12b   :  { %v401_v56 = vpop.permute.xlu2 %400 }
 0x12c   :  { %v420_v1 = vadd.f32 %v401_v56, %v4445_v42 }
 0x12d   :  { %v395_v52 = vpop.permute.xlu0 %394 }
 0x12e   :  { %v417_v59 = vadd.f32 %v395_v52, %v4398_v43 }
 0x130   :  { %3836 = vtanh.f32 %v417_v59 }
 0x133   :  { %v403_v20 = vpop.permute.xlu2 %402 }
 0x134   :  { %v421_v0 = vadd.f32 %v403_v20, %v4468_v7 }
 0x135   :  { %v397_v61 = vpop.permute.xlu0 %396 }
 0x136   :  { %v418_v60 = vadd.f32 %v397_v61, %v4404_v54  ;;  %v4552_v8 = vpop.eup %3836 }
 0x137   :  { %v440_v54 = vrot.slane %v4552_v8, 7 }
 0x138   :  { %3838 = vtanh.f32 %v418_v60 }
 0x139   :  { %3840 = vtanh.f32 %v416_v62 }
 0x13a   :  { %3842 = vtanh.f32 %v420_v1 }
 0x13b   :  { %v399_v53 = vpop.permute.xlu1 %398 }
 0x13c   :  { %v419_v6 = vadd.f32 %v399_v53, %v4421_v9 }
 0x13d   :  { %v405_v30 = vpop.permute.xlu0 %404 }
 0x13e   :  { %3844 = vtanh.f32 %v419_v6  ;;  %v4554_v43 = vpop.eup %3838  ;;  %v422_v32 = vadd.f32 %v405_v30, %v4391_v39 }
 0x13f   :  { %3846 = vtanh.f32 %v421_v0  ;;  %v4558_v42 = vpop.eup %3840  ;;  %v443_v16 = vrot.slane %v4554_v43, 6 }
 0x140   :  { %v4561_v7 = vpop.eup %3842  ;;  %3848 = vtanh.f32 %v422_v32  ;;  %v442_v39 = vsel %vm6911_vm4, %v440_v54, %v4558_v42 }
 0x141   :  { %v449_v24 = vrot.slane %v4561_v7, 4  ;;  %v445_v26 = vsel %vm6910_vm5, %v443_v16, %v442_v39 }
 0x143   :  { %v407_v9 = vpop.permute.xlu1 %406 }
 0x144   :  { %v4563_v18 = vpop.eup %3844  ;;  %v423_v19 = vadd.f32 %v407_v9, %v4394_v41 }
 0x145   :  { %v446_v21 = vrot.slane %v4563_v18, 5  ;;  %v4569_v23 = vpop.eup %3846 }
 0x146   :  { %3850 = vtanh.f32 %v423_v19  ;;  %v4575_v41 = vpop.eup %3848  ;;  %v452_v33 = vrot.slane %v4569_v23, 3 }
 0x147   :  { %v448_v25 = vsel %vm6909_vm6, %v446_v21, %v445_v26  ;;  %v455_v38 = vrot.slane %v4575_v41, 2 }
 0x148   :  { %v451_v31 = vsel %vm6908_vm7, %v449_v24, %v448_v25 }
 0x149   :  { %v454_v36 = vsel %vm6907_vm8, %v452_v33, %v451_v31 }
 0x14a   :  { %v457_v44 = vsel %vm6906_vm9, %v455_v38, %v454_v36 }
 0x14c   :  { %v4579_v27 = vpop.eup %3850 }
 0x14d   :  { %v458_v40 = vrot.slane %v4579_v27, 1 }
 0x14f   :  { %v460_v29 = vsel %vm6905_vm10, %v458_v40, %v457_v44 }
 0x150   :  { %461 = vrot.lane.b32.xlu2 %v460_v29, %s4208_s14 }
 0x1aa   :  { %v462_v22 = vpop.permute.xlu2 %461 }
 0x1ab   :  { %v464_v45 = vsub.f32 %v4304_v14, %v462_v22 }
 0x1ad   :  { %473 = vrot.lane.b32.xlu2 %v464_v45, %s4209_s1  ;;  %v467_v46 = vrot.slane %v464_v45, 2  ;;  %v466_v47 = vrot.slane %v464_v45, 1  ;;  %v470_v48 = vrot.slane %v464_v45, 5  ;;  %v469_v49 = vrot.slane %v464_v45, 4 }
 0x1ae   :  { %v468_v50 = vrot.slane %v464_v45, 3  ;;  %v472_v58 = vrot.slane %v464_v45, 7  ;;  %v471_v14 = vrot.slane %v464_v45, 6 }
 0x1af   :  { %477 = vrot.lane.b32.xlu1 %v467_v46, %s4209_s1  ;;  %475 = vrot.lane.b32.xlu0 %v466_v47, %s4209_s1  ;;  %v4661_v46 = vld [vmem:[#allocation3 + $0x1] sm:$0x1]  ;;  %v4663_v47 = vld [vmem:[#allocation3 + $0x9] sm:$0x1] }
 0x1b5   :  { %483 = vrot.lane.b32.xlu2 %v470_v48, %s4209_s1 }
 0x1b7   :  { %481 = vrot.lane.b32.xlu1 %v469_v49, %s4209_s1  ;;  %479 = vrot.lane.b32.xlu0 %v468_v50, %s4209_s1  ;;  %v4672_v50 = vld [vmem:[#allocation3 + $0x29] sm:$0x1] }
 0x1bf   :  { %487 = vrot.lane.b32.xlu1 %v472_v58, %s4209_s1  ;;  %485 = vrot.lane.b32.xlu0 %v471_v14, %s4209_s1 }
 0x207   :  { %v474_v52 = vpop.permute.xlu2 %473 }
 0x208   :  { %v497_v56 = vmul.f32 %v474_v52, %v4435_v35 }
 0x20a   :  { %513 = vrot.lane.b32.xlu1 %v497_v56, %s4209_s1 }
 0x20f   :  { %v484_v57 = vpop.permute.xlu2 %483 }
 0x210   :  { %v502_v59 = vmul.f32 %v484_v57, %v4542_v51 }
 0x212   :  { %523 = vrot.lane.b32.xlu1 %v502_v59, %s4209_s1 }
 0x221   :  { %v478_v61 = vpop.permute.xlu1 %477  ;;  %v476_v60 = vpop.permute.xlu0 %475 }
 0x222   :  { %v499_v62 = vmul.f32 %v478_v61, %v4481_v37  ;;  %v498_v1 = vmul.f32 %v476_v60, %v4462_v2 }
 0x224   :  { %517 = vrot.lane.b32.xlu0 %v499_v62, %s4209_s1  ;;  %515 = vrot.lane.b32.xlu2 %v498_v1, %s4209_s1 }
 0x229   :  { %v482_v20 = vpop.permute.xlu1 %481  ;;  %v480_v53 = vpop.permute.xlu0 %479 }
 0x22a   :  { %v501_v35 = vmul.f32 %v482_v20, %v4535_v55  ;;  %v500_v0 = vmul.f32 %v480_v53, %v4511_v3 }
 0x22c   :  { %521 = vrot.lane.b32.xlu0 %v501_v35, %s4209_s1  ;;  %519 = vrot.lane.b32.xlu2 %v500_v0, %s4209_s1  ;;  %v4679_v35 = vld [vmem:[#allocation3 + $0x39] sm:$0x1]  ;;  %v4681_v0 = vld [vmem:[#allocation3 + $0x31] sm:$0x1] }
 0x231   :  { %v488_v51 = vpop.permute.xlu1 %487  ;;  %v486_v6 = vpop.permute.xlu0 %485 }
 0x232   :  { %v504_v37 = vmul.f32 %v488_v51, %v4532_v34  ;;  %v503_v2 = vmul.f32 %v486_v6, %v4506_v28 }
 0x234   :  { %527 = vrot.lane.b32.xlu0 %v504_v37, %s4209_s1  ;;  %525 = vrot.lane.b32.xlu2 %v503_v2, %s4209_s1 }
 0x27c   :  { %v514_v32 = vpop.permute.xlu1 %513 }
 0x27d   :  { %v4620_v28 = vadd.f32 %v4558_v42, %v514_v32 }
 0x27e   :  { %v516_v30 = vpop.permute.xlu2 %515 }
 0x27f   :  { %v4612_v55 = vadd.f32 %v4552_v8, %v516_v30  ;;  %6947 = vst [vmem:[#allocation5_spill] sm:$0xff] %v4620_v28 }
 0x281   :  { %v586_v9 = vrot.slane %v4612_v55, 7 }
 0x283   :  { %v587_v8 = vsel %vm6911_vm4, %v586_v9, %v4620_v28 }
 0x284   :  { %v524_v39 = vpop.permute.xlu1 %523 }
 0x285   :  { %v4632_v26 = vadd.f32 %v4569_v23, %v524_v39 }
 0x286   :  { %v520_v3 = vpop.permute.xlu2 %519 }
 0x287   :  { %v4623_v19 = vadd.f32 %v4563_v18, %v520_v3  ;;  %6950 = vst [vmem:[#allocation8_spill] sm:$0xff] %v4632_v26 }
 0x289   :  { %6948 = vst [vmem:[#allocation6_spill] sm:$0xff] %v4623_v19  ;;  %v590_v25 = vrot.slane %v4623_v19, 5 }
 0x28e   :  { %v526_v42 = vpop.permute.xlu2 %525 }
 0x28f   :  { %v4638_v33 = vadd.f32 %v4575_v41, %v526_v42 }
 0x291   :  { %6951 = vst [vmem:[#allocation9_spill] sm:$0xff] %v4638_v33  ;;  %v596_v44 = vrot.slane %v4638_v33, 2 }
 0x296   :  { %v518_v54 = vpop.permute.xlu0 %517 }
 0x297   :  { %v4615_v16 = vadd.f32 %v4554_v43, %v518_v54 }
 0x299   :  { %6946 = vst [vmem:[#allocation4_spill] sm:$0xff] %v4615_v16  ;;  %v588_v34 = vrot.slane %v4615_v16, 6 }
 0x29b   :  { %v589_v43 = vsel %vm6910_vm5, %v588_v34, %v587_v8 }
 0x29c   :  { %v591_v18 = vsel %vm6909_vm6, %v590_v25, %v589_v43 }
 0x29e   :  { %v522_v21 = vpop.permute.xlu0 %521 }
 0x29f   :  { %v4628_v24 = vadd.f32 %v4561_v7, %v522_v21  ;;  %v594_v7 = vrot.slane %v4632_v26, 3 }
 0x2a1   :  { %6949 = vst [vmem:[#allocation7_spill] sm:$0xff] %v4628_v24  ;;  %v592_v31 = vrot.slane %v4628_v24, 4 }
 0x2a3   :  { %v593_v36 = vsel %vm6908_vm7, %v592_v31, %v591_v18 }
 0x2a4   :  { %v595_v23 = vsel %vm6907_vm8, %v594_v7, %v593_v36 }
 0x2a5   :  { %v597_v22 = vsel %vm6906_vm9, %v596_v44, %v595_v23 }
 0x2a6   :  { %v528_v38 = vpop.permute.xlu0 %527 }
 0x2a7   :  { %v4643_v40 = vadd.f32 %v4579_v27, %v528_v38 }
 0x2a9   :  { %6952 = vst [vmem:[#allocation10_spill] sm:$0xff] %v4643_v40  ;;  %v598_v29 = vrot.slane %v4643_v40, 1 }
 0x2ab   :  { %v599_v45 = vsel %vm6905_vm10, %v598_v29, %v597_v22 }
 0x2ac   :  { %600 = vrot.lane.b32.xlu1 %v599_v45, %s4208_s14 }
 0x31e   :  { %v601_v41 = vpop.permute.xlu1 %600 }
 0x31f   :  { %3720 = vmatmul.msk.f32.vlgmr.msrb.gmra.mxu3 %vm6904_vm0, %v601_v41  ;;  %3721 = vmatmul.msk.f32.vlgmr.msrb.gmra.mxu1 %vm6904_vm0, %v601_v41 }
 0x320   :  { %1942 = vmatpush.msrb.mxu3 %v4259_v4  ;;  %1962 = vmatpush.msrb.mxu1 %v4288_v11  ;;  %v4665_v4 = vld [vmem:[#allocation3 + $0x11] sm:$0x1] }
 0x322   :  { %1943 = vmatpush.msrb.mxu3 %v4264_v5  ;;  %1963 = vmatpush.msrb.mxu1 %v4301_v13  ;;  %v4667_v13 = vld [vmem:[#allocation3 + $0x19] sm:$0x1] }
 0x324   :  { %1944 = vmatpush.msrb.mxu3 %v4283_v10  ;;  %1964 = vmatpush.msrb.mxu1 %v4310_v15  ;;  %v4669_v10 = vld [vmem:[#allocation3 + $0x21] sm:$0x1] }
 0x326   :  { %1945 = vmatpush.msrb.mxu3 %v4296_v12  ;;  %1965 = vmatpush.msrb.mxu1 %v4323_v17 }
 0x39c   :  { %v641_v30 = vpop.f32.mrf.mxu1 }
 0x39d   :  { %v4691_v8 = vadd.f32 %v4413_v63, %v641_v30 }
 0x39f   :  { %v830_v38 = vrot.slane %v4691_v8, 2  ;;  %v829_v23 = vrot.slane %v4691_v8, 1 }
 0x3a2   :  { %v621_v27 = vpop.f32.mrf.mxu3 }
 0x3a3   :  { %v653_v11 = vrot.slane %v621_v27, 1  ;;  %v654_v48 = vrot.slane %v621_v27, 2  ;;  %v655_v5 = vrot.slane %v621_v27, 3  ;;  %v656_v49 = vrot.slane %v621_v27, 4 }
 0x3a4   :  { %v657_v15 = vrot.slane %v621_v27, 5  ;;  %v668_v12 = vadd.f32 %v4661_v46, %v621_v27  ;;  %v659_v59 = vrot.slane %v621_v27, 7  ;;  %v658_v62 = vrot.slane %v621_v27, 6 }
 0x3a5   :  { %v669_v17 = vadd.f32 %v653_v11, %v4663_v47  ;;  %v670_v58 = vadd.f32 %v654_v48, %v4665_v4  ;;  %v671_v14 = vadd.f32 %v655_v5, %v4667_v13  ;;  %v672_v52 = vadd.f32 %v656_v49, %v4669_v10 }
 0x3a6   :  { %v673_v56 = vadd.f32 %v657_v15, %v4672_v50  ;;  %v3722_v57 = vmul.f32 -1.442695, %v668_v12  ;;  %v675_v51 = vadd.f32 %v659_v59, %v4679_v35  ;;  %v674_v6 = vadd.f32 %v658_v62, %v4681_v0 }
 0x3a7   :  { %v3723_v61 = vmul.f32 -1.442695, %v669_v17  ;;  %v3724_v60 = vmul.f32 -1.442695, %v670_v58  ;;  %v3726_v1 = vmul.f32 -1.442695, %v672_v52 }
 0x3a8   :  { %3852 = vpow2.f32 %v3722_v57  ;;  %v3727_v20 = vmul.f32 -1.442695, %v673_v56  ;;  %v3725_v53 = vmul.f32 -1.442695, %v671_v14  ;;  %v3729_v32 = vmul.f32 -1.442695, %v675_v51 }
 0x3a9   :  { %3854 = vpow2.f32 %v3724_v60  ;;  %v3728_v9 = vmul.f32 -1.442695, %v674_v6 }
 0x3aa   :  { %3856 = vpow2.f32 %v3723_v61 }
 0x3ab   :  { %3858 = vpow2.f32 %v3727_v20 }
 0x3ac   :  { %3860 = vpow2.f32 %v3726_v1 }
 0x3ad   :  { %3862 = vpow2.f32 %v3725_v53 }
 0x3ae   :  { %v3853_v37 = vpop.eup %3852 }
 0x3af   :  { %v3855_v2 = vpop.eup %3854  ;;  %v4685_v54 = vadd.f32 1.0, %v3853_v37 }
 0x3b0   :  { %v3857_v3 = vpop.eup %3856  ;;  %v4687_v34 = vadd.f32 1.0, %v3855_v2 }
 0x3b1   :  { %v3859_v39 = vpop.eup %3858  ;;  %3864 = vrcp.f32 %v4685_v54  ;;  %v4694_v25 = vadd.f32 1.0, %v3857_v3  ;;  %v717_v31 = vand.u32 2147483647, %v4685_v54  ;;  %v719_v36 = vand.u32 2147483648, %v4685_v54 }
 0x3b2   :  { %v3861_v21 = vpop.eup %3860  ;;  %3866 = vrcp.f32 %v4687_v34  ;;  %v4696_v42 = vadd.f32 1.0, %v3859_v39  ;;  %v747_v7 = vand.u32 2147483647, %v4687_v34  ;;  %v749_v63 = vand.u32 2147483648, %v4687_v34 }
 0x3b3   :  { %v3863_v43 = vpop.eup %3862  ;;  %3868 = vpow2.f32 %v3729_v32  ;;  %v4699_v18 = vadd.f32 1.0, %v3861_v21  ;;  %vm713_vm11 = vweird.f32 %v4685_v54  ;;  %vm743_vm12 = vweird.f32 %v4687_v34 }
 0x3b4   :  { %3870 = vpow2.f32 %v3728_v9  ;;  %v4708_v44 = vadd.f32 1.0, %v3863_v43  ;;  %v734_v22 = vand.u32 2147483648, %v4694_v25  ;;  %vm4715_vm13 = vcmp.eq.f32.partialorder %v717_v31, 8.507059e+37 }
 0x3b5   :  { %3872 = vrcp.f32 %v4694_v25  ;;  %v732_v11 = vand.u32 2147483647, %v4694_v25  ;;  %v794_v48 = vand.u32 2147483648, %v4696_v42  ;;  %v720_v49 = vor.u32 1.1754944e-38, %v719_v36 }
 0x3b6   :  { %3874 = vrcp.f32 %v4696_v42  ;;  %vm4722_vm14 = vcmp.eq.f32.partialorder %v747_v7, 8.507059e+37  ;;  %v750_v17 = vor.u32 1.1754944e-38, %v749_v63  ;;  %vm728_vm15 = vweird.f32 %v4694_v25 }
 0x3b7   :  { %v3865_v29 = vpop.eup %3864  ;;  %3876 = vrcp.f32 %v4699_v18  ;;  %v792_v52 = vand.u32 2147483647, %v4696_v42  ;;  %v735_v59 = vor.u32 1.1754944e-38, %v734_v22  ;;  %vm788_vm2 = vweird.f32 %v4696_v42 }
 0x3b8   :  { %v3867_v45 = vpop.eup %3866  ;;  %v709_v41 = vmul.f32 %v3865_v29, %v4685_v54  ;;  %3878 = vrcp.f32 %v4708_v44  ;;  %vm714_vm1 = vweird.f32 %v3865_v29  ;;  %vm4731_vm0 = vcmp.eq.f32.partialorder %v732_v11, 8.507059e+37 }
 0x3b9   :  { %v3869_v5 = vpop.eup %3868  ;;  %v739_v15 = vmul.f32 %v3867_v45, %v4687_v34  ;;  %vm744_vm3 = vweird.f32 %v3867_v45  ;;  %v795_v20 = vor.u32 1.1754944e-38, %v794_v48  ;;  %vm773_vm10 = vweird.f32 %v4699_v18  ;;  %vm715_vm7 = vmor %vm713_vm11, %vm714_vm1 }
 0x3ba   :  { %v3871_v58 = vpop.eup %3870  ;;  %v710_v14 = vsub.f32 1.0, %v709_v41  ;;  %v777_v37 = vand.u32 2147483647, %v4699_v18  ;;  %v779_v2 = vand.u32 2147483648, %v4699_v18  ;;  %vm4739_vm8 = vcmp.eq.f32.partialorder %v792_v52, 8.507059e+37  ;;  %vm745_vm4 = vmor %vm743_vm12, %vm744_vm3 }
 0x3bb   :  { %v3873_v56 = vpop.eup %3872  ;;  %v740_v57 = vsub.f32 1.0, %v739_v15  ;;  %v4750_v63 = vadd.f32 1.0, %v3869_v5 }
 0x3bc   :  { %v3875_v61 = vpop.eup %3874  ;;  %v711_v60 = vmul.f32 %v3865_v29, %v710_v14  ;;  %v724_v62 = vmul.f32 %v3873_v56, %v4694_v25  ;;  %vm729_vm9 = vweird.f32 %v3873_v56 }
 0x3bd   :  { %v3877_v53 = vpop.eup %3876  ;;  %v741_v51 = vmul.f32 %v3867_v45, %v740_v57  ;;  %v784_v6 = vmul.f32 %v3875_v61, %v4696_v42  ;;  %vm789_vm6 = vweird.f32 %v3875_v61  ;;  %3880 = vrcp.f32 %v4750_v63 }
 0x3be   :  { %v712_v30 = vadd.f32 %v3865_v29, %v711_v60  ;;  %v725_v32 = vsub.f32 1.0, %v724_v62  ;;  %v769_v9 = vmul.f32 %v3877_v53, %v4699_v18  ;;  %vm774_vm5 = vweird.f32 %v3877_v53  ;;  %v3879_v43 = vpop.eup %3878 }
 0x3bf   :  { %v742_v39 = vadd.f32 %v3867_v45, %v741_v51  ;;  %v785_v21 = vsub.f32 1.0, %v784_v6  ;;  %v754_v11 = vmul.f32 %v3879_v43, %v4708_v44  ;;  %vm759_vm11 = vweird.f32 %v3879_v43 }
 0x3c0   :  { %v716_v31 = vsel %vm715_vm7, %v3865_v29, %v712_v30  ;;  %v726_v36 = vmul.f32 %v3873_v56, %v725_v32  ;;  %v770_v7 = vsub.f32 1.0, %v769_v9  ;;  %vm790_vm7 = vmor %vm788_vm2, %vm789_vm6  ;;  %v780_v57 = vor.u32 1.1754944e-38, %v779_v2 }
 0x3c1   :  { %v4754_v22 = vsel %vm4715_vm13, %v720_v49, %v716_v31  ;;  %v746_v54 = vsel %vm745_vm4, %v3867_v45, %v742_v39  ;;  %v786_v41 = vmul.f32 %v3875_v61, %v785_v21  ;;  %vm730_vm4 = vmor %vm728_vm15, %vm729_vm9  ;;  %v755_v27 = vsub.f32 1.0, %v754_v11 }
 0x3c2   :  { %v844_v48 = vmul.f32 %v4754_v22, %v4691_v8  ;;  %v4761_v29 = vsel %vm4722_vm14, %v750_v17, %v746_v54  ;;  %v727_v34 = vadd.f32 %v3873_v56, %v726_v36  ;;  %v771_v15 = vmul.f32 %v3877_v53, %v770_v7  ;;  %vm775_vm9 = vmor %vm773_vm10, %vm774_vm5 }
 0x3c3   :  { %v846_v5 = vmul.f32 %v830_v38, %v4761_v29  ;;  %v787_v45 = vadd.f32 %v3875_v61, %v786_v41  ;;  %v764_v49 = vand.u32 2147483648, %v4708_v44  ;;  %v706_v17 = vadd.f32 1.0, %v3871_v58 }
 0x3c4   :  { %860 = vrot.lane.b32.xlu1 %v844_v48, %s4208_s14  ;;  %v731_v14 = vsel %vm730_vm4, %v3873_v56, %v727_v34  ;;  %v772_v12 = vadd.f32 %v3877_v53, %v771_v15  ;;  %v756_v52 = vmul.f32 %v3879_v43, %v755_v27  ;;  %v762_v58 = vand.u32 2147483647, %v4708_v44 }
 0x3c5   :  { %864 = vrot.lane.b32.xlu0 %v846_v5, %s4208_s14  ;;  %v4778_v25 = vsel %vm4731_vm0, %v735_v59, %v731_v14  ;;  %v791_v38 = vsel %vm790_vm7, %v3875_v61, %v787_v45  ;;  %vm778_vm0 = vcmp.eq.f32.partialorder %v777_v37, 8.507059e+37  ;;  %vm758_vm6 = vweird.f32 %v4708_v44 }
 0x3c6   :  { %v845_v42 = vmul.f32 %v829_v23, %v4778_v25  ;;  %v776_v56 = vsel %vm775_vm9, %v3877_v53, %v772_v12  ;;  %v4789_v60 = vsel %vm4739_vm8, %v795_v20, %v791_v38  ;;  %v757_v59 = vadd.f32 %v3879_v43, %v756_v52  ;;  %vm760_vm5 = vmor %vm758_vm6, %vm759_vm11  ;;  %v3881_v53 = vpop.eup %3880 }
 0x3c7   :  { %v833_v18 = vrot.slane %v4691_v8, 5  ;;  %v4794_v61 = vsel %vm778_vm0, %v780_v57, %v776_v56  ;;  %3882 = vrcp.f32 %v706_v17  ;;  %v832_v23 = vrot.slane %v4691_v8, 4 }
 0x3c8   :  { %862 = vrot.lane.b32.xlu2 %v845_v42, %s4208_s14  ;;  %v761_v62 = vsel %vm760_vm5, %v3879_v43, %v757_v59  ;;  %v765_v1 = vor.u32 1.1754944e-38, %v764_v49  ;;  %vm763_vm8 = vcmp.eq.f32.partialorder %v762_v58, 8.507059e+37  ;;  %v814_v44 = vmul.f32 %v3881_v53, %v4750_v63 }
 0x3c9   :  { %v849_v20 = vmul.f32 %v833_v18, %v4789_v60  ;;  %v848_v51 = vmul.f32 %v832_v23, %v4794_v61  ;;  %v831_v37 = vrot.slane %v4691_v8, 3  ;;  %v822_v3 = vand.u32 2147483647, %v4750_v63 }
 0x3ca   :  { %v4799_v6 = vsel %vm763_vm8, %v765_v1, %v761_v62  ;;  %v815_v2 = vsub.f32 1.0, %v814_v44  ;;  %v824_v9 = vand.u32 2147483648, %v4750_v63  ;;  %vm819_vm10 = vweird.f32 %v3881_v53 }
 0x3cb   :  { %v847_v32 = vmul.f32 %v831_v37, %v4799_v6  ;;  %vm818_vm12 = vweird.f32 %v4750_v63  ;;  %vm823_vm14 = vcmp.eq.f32.partialorder %v822_v3, 8.507059e+37  ;;  %v835_v7 = vrot.slane %v4691_v8, 7 }
 0x3cc   :  { %870 = vrot.lane.b32.xlu1 %v849_v20, %s4208_s14  ;;  %v816_v39 = vmul.f32 %v3881_v53, %v815_v2  ;;  %vm820_vm13 = vmor %vm818_vm12, %vm819_vm10  ;;  %v825_v36 = vor.u32 1.1754944e-38, %v824_v9  ;;  %v809_v54 = vand.u32 2147483648, %v706_v17  ;;  %v807_v48 = vand.u32 2147483647, %v706_v17 }
 0x3cd   :  { %868 = vrot.lane.b32.xlu0 %v848_v51, %s4208_s14  ;;  %v3883_v30 = vpop.eup %3882  ;;  %vm803_vm1 = vweird.f32 %v706_v17  ;;  %v834_v27 = vrot.slane %v4691_v8, 6  ;;  %vm6963_vm4 = vcmask 1041409   ;;  %vm6964_vm7 = vcmask 1042434  }
 0x3ce   :  { %v799_v21 = vmul.f32 %v3883_v30, %v706_v17  ;;  %v817_v43 = vadd.f32 %v3881_v53, %v816_v39  ;;  %vm804_vm15 = vweird.f32 %v3883_v30  ;;  %v810_v45 = vor.u32 1.1754944e-38, %v809_v54 }
 0x3cf   :  { %vm805_vm2 = vmor %vm803_vm1, %vm804_vm15  ;;  %vm808_vm3 = vcmp.eq.f32.partialorder %v807_v48, 8.507059e+37  ;;  %vm6965_vm9 = vcmask 1043459   ;;  %vm6967_vm11 = vcmask 1044484   ;;  %vm6968_vm0 = vcmask 1045509  }
 0x3d0   :  { %866 = vrot.lane.b32.xlu2 %v847_v32, %s4208_s14  ;;  %v800_v31 = vsub.f32 1.0, %v799_v21  ;;  %v821_v41 = vsel %vm820_vm13, %v3881_v53, %v817_v43  ;;  %vm6969_vm6 = vcmask 1046534   ;;  %vm6970_vm5 = vcmask 1047559  }
 0x3d1   :  { %v4811_v34 = vsel %vm823_vm14, %v825_v36, %v821_v41  ;;  %vm6971_vm8 = vcmask 261120  }
 0x3d2   :  { %v801_v11 = vmul.f32 %v3883_v30, %v800_v31  ;;  %v851_v15 = vmul.f32 %v835_v7, %v4811_v34  ;;  %vm6972_vm10 = vmmov %vm6971_vm8 }
 0x3d4   :  { %v802_v5 = vadd.f32 %v3883_v30, %v801_v11 }
 0x3d5   :  { %874 = vrot.lane.b32.xlu0 %v851_v15, %s4208_s14 }
 0x3d6   :  { %v806_v63 = vsel %vm805_vm2, %v3883_v30, %v802_v5 }
 0x3d7   :  { %v4816_v49 = vsel %vm808_vm3, %v810_v45, %v806_v63 }
 0x3d8   :  { %v850_v14 = vmul.f32 %v834_v27, %v4816_v49 }
 0x3da   :  { %872 = vrot.lane.b32.xlu2 %v850_v14, %s4208_s14 }
 0x422   :  { %v863_v12 = vpop.permute.xlu2 %862 }
 0x423   :  { %v885_v38 = vadd.f32 %v863_v12, %v4663_v47 }
 0x425   :  { %3884 = vtanh.f32 %v885_v38 }
 0x42a   :  { %v867_v52 = vpop.permute.xlu2 %866 }
 0x42b   :  { %v4821_v17 = vpop.eup %3884  ;;  %v887_v42 = vadd.f32 %v867_v52, %v4667_v13 }
 0x42c   :  { %v901_v56 = vsub.f32 %v4612_v55, %v4821_v17 }
 0x42d   :  { %3886 = vtanh.f32 %v887_v42 }
 0x42e   :  { %918 = vrot.lane.b32.xlu1 %v901_v56, %s4210_s15 }
 0x433   :  { %v4827_v8 = vpop.eup %3886 }
 0x434   :  { %v903_v57 = vsub.f32 %v4623_v19, %v4827_v8  ;;  %v873_v58 = vpop.permute.xlu2 %872 }
 0x435   :  { %v890_v47 = vadd.f32 %v873_v58, %v4681_v0 }
 0x436   :  { %922 = vrot.lane.b32.xlu1 %v903_v57, %s4210_s15  ;;  %v861_v59 = vpop.permute.xlu1 %860 }
 0x437   :  { %v884_v13 = vadd.f32 %v861_v59, %v4661_v46  ;;  %v865_v18 = vpop.permute.xlu0 %864  ;;  %3888 = vtanh.f32 %v890_v47 }
 0x438   :  { %v886_v23 = vadd.f32 %v865_v18, %v4665_v4 }
 0x439   :  { %3890 = vtanh.f32 %v884_v13 }
 0x43a   :  { %3892 = vtanh.f32 %v886_v23 }
 0x43d   :  { %v4835_v62 = vpop.eup %3888 }
 0x43e   :  { %v871_v1 = vpop.permute.xlu1 %870  ;;  %v906_v20 = vsub.f32 %v4638_v33, %v4835_v62 }
 0x43f   :  { %v3891_v53 = vpop.eup %3890  ;;  %v889_v0 = vadd.f32 %v871_v1, %v4672_v50  ;;  %v869_v51 = vpop.permute.xlu0 %868 }
 0x440   :  { %v3893_v44 = vpop.eup %3892  ;;  %v888_v37 = vadd.f32 %v869_v51, %v4669_v10  ;;  %v900_v46 = vsub.f32 %v4620_v28, %v3891_v53  ;;  %928 = vrot.lane.b32.xlu1 %v906_v20, %s4210_s15 }
 0x441   :  { %3894 = vtanh.f32 %v889_v0  ;;  %v902_v4 = vsub.f32 %v4615_v16, %v3893_v44 }
 0x442   :  { %3896 = vtanh.f32 %v888_v37  ;;  %916 = vrot.lane.b32.xlu0 %v900_v46, %s4210_s15 }
 0x443   :  { %920 = vrot.lane.b32.xlu2 %v902_v4, %s4210_s15 }
 0x447   :  { %v3895_v2 = vpop.eup %3894  ;;  %v875_v32 = vpop.permute.xlu0 %874 }
 0x448   :  { %v3897_v30 = vpop.eup %3896  ;;  %v905_v50 = vsub.f32 %v4632_v26, %v3895_v2  ;;  %v891_v10 = vadd.f32 %v875_v32, %v4679_v35  ;;  %v4933_v32 = vld [vmem:[%s6898_s2 + $0x8] sm:$0xff] }
 0x449   :  { %v904_v3 = vsub.f32 %v4628_v24, %v3897_v30 }
 0x44a   :  { %926 = vrot.lane.b32.xlu0 %v905_v50, %s4210_s15  ;;  %3898 = vtanh.f32 %v891_v10  ;;  %v4927_v50 = vld [vmem:[%s6900_s3 + $0x10] sm:$0xff]  ;;  %v4945_v10 = vld [vmem:[%s6898_s2] sm:$0xff] }
 0x44b   :  { %924 = vrot.lane.b32.xlu2 %v904_v3, %s4210_s15  ;;  %v4939_v3 = vld [vmem:[%s6900_s3 + $0x8] sm:$0xff] }
 0x450   :  { %v3899_v9 = vpop.eup %3898 }
 0x451   :  { %v907_v39 = vsub.f32 %v4643_v40, %v3899_v9 }
 0x453   :  { %930 = vrot.lane.b32.xlu2 %v907_v39, %s4210_s15 }
 0x49d   :  { %v921_v21 = vpop.permute.xlu2 %920 }
 0x49e   :  { %v942_v43 = vmul.f32 %v921_v21, %v4761_v29  ;;  %v4954_v21 = vld [vmem:[#allocation3 + $0x2] sm:$0x1] }
 0x4a0   :  { %v919_v31 = vpop.permute.xlu1 %918  ;;  %960 = vrot.lane.b32.xlu1 %v942_v43, %s4209_s1  ;;  %v4956_v43 = vld [vmem:[#allocation3 + $0xa] sm:$0x1] }
 0x4a1   :  { %v941_v36 = vmul.f32 %v919_v31, %v4778_v25  ;;  %v4958_v31 = vld [vmem:[#allocation3 + $0x12] sm:$0x1] }
 0x4a3   :  { %958 = vrot.lane.b32.xlu0 %v941_v36, %s4209_s1 }
 0x4a5   :  { %v925_v35 = vpop.permute.xlu2 %924 }
 0x4a6   :  { %v944_v7 = vmul.f32 %v925_v35, %v4794_v61 }
 0x4a8   :  { %v923_v54 = vpop.permute.xlu1 %922  ;;  %964 = vrot.lane.b32.xlu1 %v944_v7, %s4209_s1 }
 0x4a9   :  { %v943_v41 = vmul.f32 %v923_v54, %v4799_v6 }
 0x4ab   :  { %962 = vrot.lane.b32.xlu0 %v943_v41, %s4209_s1  ;;  %v4960_v41 = vld [vmem:[#allocation3 + $0x1a] sm:$0x1] }
 0x4ad   :  { %v931_v11 = vpop.permute.xlu2 %930 }
 0x4ae   :  { %v947_v29 = vmul.f32 %v931_v11, %v4811_v34  ;;  %v4962_v11 = vld [vmem:[#allocation3 + $0x22] sm:$0x1] }
 0x4b0   :  { %970 = vrot.lane.b32.xlu1 %v947_v29, %s4209_s1 }
 0x4b2   :  { %v929_v48 = vpop.permute.xlu1 %928 }
 0x4b3   :  { %v946_v25 = vmul.f32 %v929_v48, %v4816_v49 }
 0x4b4   :  { %v917_v15 = vpop.permute.xlu0 %916 }
 0x4b5   :  { %v940_v5 = vmul.f32 %v917_v15, %v4754_v22  ;;  %968 = vrot.lane.b32.xlu0 %v946_v25, %s4209_s1  ;;  %v4965_v25 = vld [vmem:[#allocation3 + $0x2a] sm:$0x1] }
 0x4b7   :  { %956 = vrot.lane.b32.xlu2 %v940_v5, %s4209_s1 }
 0x4bc   :  { %v927_v61 = vpop.permute.xlu0 %926 }
 0x4bd   :  { %v945_v6 = vmul.f32 %v927_v61, %v4789_v60 }
 0x4bf   :  { %966 = vrot.lane.b32.xlu2 %v945_v6, %s4209_s1 }
 0x511   :  { %v957_v34 = vpop.permute.xlu2 %956 }
 0x512   :  { %v961_v45 = vpop.permute.xlu1 %960  ;;  %v4878_v52 = vadd.f32 %v3891_v53, %v957_v34 }
 0x513   :  { %v4872_v49 = vadd.f32 %v3893_v44, %v961_v45 }
 0x514   :  { %6962 = vst [vmem:[#allocation12_spill] sm:$0xff] %v4878_v52 }
 0x515   :  { %v959_v63 = vpop.permute.xlu0 %958  ;;  %v1030_v60 = vrot.slane %v4872_v49, 6 }
 0x516   :  { %v4870_v27 = vadd.f32 %v4821_v17, %v959_v63 }
 0x518   :  { %v1028_v22 = vrot.slane %v4870_v27, 7 }
 0x519   :  { %v967_v57 = vpop.permute.xlu2 %966 }
 0x51a   :  { %v965_v14 = vpop.permute.xlu1 %964  ;;  %v1029_v56 = vsel %vm6963_vm4, %v1028_v22, %v4878_v52  ;;  %v4888_v13 = vadd.f32 %v3895_v2, %v967_v57  ;;  %v4915_v2 = vld [vmem:[%s6900_s3 + $0x18] sm:$0xff]  ;;  %v4972_v57 = vld [vmem:[#allocation3 + $0x3a] sm:$0x1] }
 0x51b   :  { %v4881_v42 = vadd.f32 %v3897_v30, %v965_v14  ;;  %v1031_v47 = vsel %vm6964_vm7, %v1030_v60, %v1029_v56  ;;  %v4921_v30 = vld [vmem:[%s6898_s2 + $0x10] sm:$0xff] }
 0x51c   :  { %v1036_v20 = vrot.slane %v4888_v13, 3 }
 0x51d   :  { %v963_v12 = vpop.permute.xlu0 %962  ;;  %v1034_v59 = vrot.slane %v4881_v42, 4 }
 0x51e   :  { %v4876_v38 = vadd.f32 %v4827_v8, %v963_v12 }
 0x520   :  { %6961 = vst [vmem:[#allocation11_spill] sm:$0xff] %v4876_v38  ;;  %v1032_v17 = vrot.slane %v4876_v38, 5 }
 0x522   :  { %v971_v58 = vpop.permute.xlu1 %970  ;;  %v1033_v18 = vsel %vm6965_vm9, %v1032_v17, %v1031_v47 }
 0x523   :  { %v4890_v8 = vadd.f32 %v3899_v9, %v971_v58  ;;  %v1035_v53 = vsel %vm6967_vm11, %v1034_v59, %v1033_v18  ;;  %v4951_v9 = vld [vmem:[%s6900_s3] sm:$0xff]  ;;  %v4974_v58 = vld [vmem:[#allocation3 + $0x32] sm:$0x1] }
 0x524   :  { %v1037_v44 = vsel %vm6968_vm0, %v1036_v20, %v1035_v53 }
 0x525   :  { %v1040_v0 = vrot.slane %v4890_v8, 1 }
 0x527   :  { %v969_v23 = vpop.permute.xlu0 %968 }
 0x528   :  { %v4894_v1 = vadd.f32 %v4835_v62, %v969_v23  ;;  %v4909_v62 = vld [vmem:[%s6898_s2 + $0x18] sm:$0xff] }
 0x52a   :  { %6966 = vst [vmem:[#allocation13_spill] sm:$0xff] %v4894_v1  ;;  %v1038_v51 = vrot.slane %v4894_v1, 2 }
 0x52c   :  { %v1039_v37 = vsel %vm6969_vm6, %v1038_v51, %v1037_v44 }
 0x52d   :  { %v1041_v46 = vsel %vm6970_vm5, %v1040_v0, %v1039_v37 }
 0x52e   :  { %1042 = vrot.lane.b32.xlu2 %v1041_v46, %s4208_s14 }
 0x588   :  { %v1043_v4 = vpop.permute.xlu2 %1042 }
 0x589   :  { %3730 = vmatmul.msk.f32.vlgmr.msra.gmra.mxu2 %vm6971_vm8, %v1043_v4  ;;  %3731 = vmatmul.msk.f32.vlgmr.msra.gmra.mxu3 %vm6972_vm10, %v1043_v4 }
 0x58a   :  { %2384 = vmatpush.msra.mxu2 %v4909_v62  ;;  %2404 = vmatpush.msra.mxu3 %v4915_v2 }
 0x58c   :  { %2385 = vmatpush.msra.mxu2 %v4921_v30  ;;  %2405 = vmatpush.msra.mxu3 %v4927_v50 }
 0x58e   :  { %2386 = vmatpush.msra.mxu2 %v4933_v32  ;;  %2406 = vmatpush.msra.mxu3 %v4939_v3 }
 0x590   :  { %2387 = vmatpush.msra.mxu2 %v4945_v10  ;;  %2407 = vmatpush.msra.mxu3 %v4951_v9 }
 0x60c   :  { %v1063_v39 = vpop.f32.mrf.mxu2  ;;  %v1083_v20 = vpop.f32.mrf.mxu3 }
 0x60d   :  { %v1095_v36 = vrot.slane %v1063_v39, 1  ;;  %v1096_v35 = vrot.slane %v1063_v39, 2  ;;  %v1097_v7 = vrot.slane %v1063_v39, 3  ;;  %v1098_v54 = vrot.slane %v1063_v39, 4 }
 0x60e   :  { %v1099_v29 = vrot.slane %v1063_v39, 5  ;;  %v1110_v48 = vadd.f32 %v4954_v21, %v1063_v39  ;;  %v1101_v34 = vrot.slane %v1063_v39, 7  ;;  %v1100_v22 = vrot.slane %v1063_v39, 6  ;;  %v4986_v39 = vld [vmem:[%s6902_s5] ss:$0 sm:$0xff] }
 0x60f   :  { %v1111_v15 = vadd.f32 %v1095_v36, %v4956_v43  ;;  %v1112_v5 = vadd.f32 %v1096_v35, %v4958_v31  ;;  %v1113_v61 = vadd.f32 %v1097_v7, %v4960_v41  ;;  %v1114_v6 = vadd.f32 %v1098_v54, %v4962_v11 }
 0x610   :  { %v1115_v45 = vadd.f32 %v1099_v29, %v4965_v25  ;;  %v3732_v63 = vmul.f32 -1.442695, %v1110_v48  ;;  %v1117_v47 = vadd.f32 %v1101_v34, %v4972_v57  ;;  %v1116_v59 = vadd.f32 %v1100_v22, %v4974_v58 }
 0x611   :  { %v3733_v14 = vmul.f32 -1.442695, %v1111_v15  ;;  %v3734_v12 = vmul.f32 -1.442695, %v1112_v5  ;;  %v3736_v60 = vmul.f32 -1.442695, %v1114_v6  ;;  %v4989_v36 = vadd.f32 %v4986_v39, %v1083_v20 }
 0x612   :  { %3900 = vpow2.f32 %v3732_v63  ;;  %v3737_v56 = vmul.f32 -1.442695, %v1115_v45  ;;  %v3735_v17 = vmul.f32 -1.442695, %v1113_v61  ;;  %v3739_v53 = vmul.f32 -1.442695, %v1117_v47 }
 0x613   :  { %3902 = vpow2.f32 %v3734_v12  ;;  %v3738_v44 = vmul.f32 -1.442695, %v1116_v59 }
 0x614   :  { %3904 = vpow2.f32 %v3733_v14 }
 0x615   :  { %3906 = vpow2.f32 %v3737_v56 }
 0x616   :  { %3908 = vpow2.f32 %v3736_v60 }
 0x617   :  { %3910 = vpow2.f32 %v3735_v17 }
 0x618   :  { %v3901_v18 = vpop.eup %3900 }
 0x619   :  { %v3903_v23 = vpop.eup %3902  ;;  %v4978_v0 = vadd.f32 1.0, %v3901_v18 }
 0x61a   :  { %v3905_v51 = vpop.eup %3904  ;;  %v4980_v37 = vadd.f32 1.0, %v3903_v23 }
 0x61b   :  { %v3907_v46 = vpop.eup %3906  ;;  %3912 = vrcp.f32 %v4978_v0  ;;  %v4992_v7 = vadd.f32 1.0, %v3905_v51  ;;  %v1159_v29 = vand.u32 2147483647, %v4978_v0  ;;  %v1161_v15 = vand.u32 2147483648, %v4978_v0 }
 0x61c   :  { %v3909_v4 = vpop.eup %3908  ;;  %3914 = vrcp.f32 %v4980_v37  ;;  %v4994_v54 = vadd.f32 1.0, %v3907_v46  ;;  %v1189_v5 = vand.u32 2147483647, %v4980_v37  ;;  %v1191_v61 = vand.u32 2147483648, %v4980_v37 }
 0x61d   :  { %v3911_v35 = vpop.eup %3910  ;;  %3916 = vpow2.f32 %v3739_v53  ;;  %v4997_v48 = vadd.f32 1.0, %v3909_v4  ;;  %vm1155_vm12 = vweird.f32 %v4978_v0  ;;  %vm1185_vm13 = vweird.f32 %v4980_v37 }
 0x61e   :  { %3918 = vpow2.f32 %v3738_v44  ;;  %v5006_v63 = vadd.f32 1.0, %v3911_v35  ;;  %v1176_v14 = vand.u32 2147483648, %v4992_v7  ;;  %vm5013_vm14 = vcmp.eq.f32.partialorder %v1159_v29, 8.507059e+37 }
 0x61f   :  { %3920 = vrcp.f32 %v4992_v7  ;;  %v1174_v56 = vand.u32 2147483647, %v4992_v7  ;;  %v1236_v17 = vand.u32 2147483648, %v4994_v54  ;;  %v1162_v59 = vor.u32 1.1754944e-38, %v1161_v15 }
 0x620   :  { %3922 = vrcp.f32 %v4994_v54  ;;  %vm5020_vm15 = vcmp.eq.f32.partialorder %v1189_v5, 8.507059e+37  ;;  %v1192_v53 = vor.u32 1.1754944e-38, %v1191_v61  ;;  %vm1170_vm1 = vweird.f32 %v4992_v7 }
 0x621   :  { %v3913_v34 = vpop.eup %3912  ;;  %3924 = vrcp.f32 %v4997_v48  ;;  %v1234_v44 = vand.u32 2147483647, %v4994_v54  ;;  %v1177_v35 = vor.u32 1.1754944e-38, %v1176_v14  ;;  %vm1230_vm3 = vweird.f32 %v4994_v54 }
 0x622   :  { %v3915_v12 = vpop.eup %3914  ;;  %v1151_v22 = vmul.f32 %v3913_v34, %v4978_v0  ;;  %3926 = vrcp.f32 %v5006_v63  ;;  %vm1156_vm2 = vweird.f32 %v3913_v34  ;;  %vm5029_vm7 = vcmp.eq.f32.partialorder %v1174_v56, 8.507059e+37 }
 0x623   :  { %v3917_v47 = vpop.eup %3916  ;;  %v1181_v18 = vmul.f32 %v3915_v12, %v4980_v37  ;;  %vm1186_vm4 = vweird.f32 %v3915_v12  ;;  %vm1215_vm9 = vweird.f32 %v4997_v48  ;;  %v1219_v14 = vand.u32 2147483647, %v4997_v48  ;;  %vm1157_vm6 = vmor %vm1155_vm12, %vm1156_vm2 }
 0x624   :  { %v3919_v20 = vpop.eup %3918  ;;  %v1152_v51 = vsub.f32 1.0, %v1151_v22  ;;  %v1237_v22 = vor.u32 1.1754944e-38, %v1236_v17  ;;  %vm5037_vm0 = vcmp.eq.f32.partialorder %v1234_v44, 8.507059e+37  ;;  %vm1187_vm10 = vmor %vm1185_vm13, %vm1186_vm4  ;;  %v1206_v60 = vand.u32 2147483648, %v5006_v63 }
 0x625   :  { %v3921_v46 = vpop.eup %3920  ;;  %v1182_v4 = vsub.f32 1.0, %v1181_v18  ;;  %v1221_v18 = vand.u32 2147483648, %v4997_v48  ;;  %vm1200_vm2 = vweird.f32 %v5006_v63 }
 0x626   :  { %v3923_v29 = vpop.eup %3922  ;;  %v1153_v15 = vmul.f32 %v3913_v34, %v1152_v51  ;;  %v1166_v5 = vmul.f32 %v3921_v46, %v4992_v7  ;;  %vm1171_vm11 = vweird.f32 %v3921_v46 }
 0x627   :  { %v3925_v45 = vpop.eup %3924  ;;  %v1183_v6 = vmul.f32 %v3915_v12, %v1182_v4  ;;  %v1226_v26 = vmul.f32 %v3923_v29, %v4994_v54  ;;  %vm1231_vm5 = vweird.f32 %v3923_v29  ;;  %vm1172_vm12 = vmor %vm1170_vm1, %vm1171_vm11  ;;  %v6982_v54 = vrot.slane %v4989_v36, 1 }
 0x628   :  { %v1154_v16 = vadd.f32 %v3913_v34, %v1153_v15  ;;  %v1167_v51 = vsub.f32 1.0, %v1166_v5  ;;  %v1211_v56 = vmul.f32 %v3925_v45, %v4997_v48  ;;  %vm1216_vm8 = vweird.f32 %v3925_v45  ;;  %v3927_v19 = vpop.eup %3926  ;;  %vm1232_vm13 = vmor %vm1230_vm3, %vm1231_vm5 }
 0x629   :  { %v1184_v17 = vadd.f32 %v3915_v12, %v1183_v6  ;;  %v1227_v4 = vsub.f32 1.0, %v1226_v26  ;;  %v5048_v5 = vadd.f32 1.0, %v3917_v47  ;;  %v1196_v26 = vmul.f32 %v3927_v19, %v5006_v63 }
 0x62a   :  { %v1158_v28 = vsel %vm1157_vm6, %v3913_v34, %v1154_v16  ;;  %v1168_v44 = vmul.f32 %v3921_v46, %v1167_v51  ;;  %v1212_v15 = vsub.f32 1.0, %v1211_v56  ;;  %v6981_v47 = vrot.slane %v4989_v36, 2 }
 0x62b   :  { %v5052_v40 = vsel %vm5013_vm14, %v1162_v59, %v1158_v28  ;;  %v1188_v0 = vsel %vm1187_vm10, %v3915_v12, %v1184_v17  ;;  %v1228_v24 = vmul.f32 %v3923_v29, %v1227_v4  ;;  %v1197_v12 = vsub.f32 1.0, %v1196_v26  ;;  %vm1217_vm14 = vmor %vm1215_vm9, %vm1216_vm8 }
 0x62c   :  { %v1286_v6 = vmul.f32 %v5052_v40, %v4989_v36  ;;  %v5059_v16 = vsel %vm5020_vm15, %v1192_v53, %v1188_v0  ;;  %v1169_v37 = vadd.f32 %v3921_v46, %v1168_v44  ;;  %v1213_v34 = vmul.f32 %v3925_v45, %v1212_v15 }
 0x62d   :  { %v1288_v51 = vmul.f32 %v6981_v47, %v5059_v16  ;;  %v1229_v28 = vadd.f32 %v3923_v29, %v1228_v24  ;;  %3928 = vrcp.f32 %v5048_v5  ;;  %v1148_v53 = vadd.f32 1.0, %v3919_v20 }
 0x62e   :  { %1302 = vrot.lane.b32.xlu2 %v1286_v6, %s4208_s14  ;;  %v1173_v59 = vsel %vm1172_vm12, %v3921_v46, %v1169_v37  ;;  %v1214_v23 = vadd.f32 %v3925_v45, %v1213_v34  ;;  %v1198_v46 = vmul.f32 %v3927_v19, %v1197_v12  ;;  %vm1201_vm15 = vweird.f32 %v3927_v19 }
 0x62f   :  { %1306 = vrot.lane.b32.xlu1 %v1288_v51, %s4208_s14  ;;  %v5076_v7 = vsel %vm5029_vm7, %v1177_v35, %v1173_v59  ;;  %v1233_v24 = vsel %vm1232_vm13, %v3923_v29, %v1229_v28  ;;  %v1222_v4 = vor.u32 1.1754944e-38, %v1221_v18  ;;  %v1204_v20 = vand.u32 2147483647, %v5006_v63  ;;  %vm1202_vm3 = vmor %vm1200_vm2, %vm1201_vm15 }
 0x630   :  { %v1287_v56 = vmul.f32 %v6982_v54, %v5076_v7  ;;  %v1218_v17 = vsel %vm1217_vm14, %v3925_v45, %v1214_v23  ;;  %v5087_v61 = vsel %vm5037_vm0, %v1237_v22, %v1233_v24  ;;  %vm1220_vm1 = vcmp.eq.f32.partialorder %v1219_v14, 8.507059e+37 }
 0x631   :  { %v1199_v35 = vadd.f32 %v3927_v19, %v1198_v46  ;;  %v1275_v48 = vrot.slane %v4989_v36, 5  ;;  %v5092_v29 = vsel %vm1220_vm1, %v1222_v4, %v1218_v17  ;;  %3930 = vrcp.f32 %v1148_v53 }
 0x632   :  { %1304 = vrot.lane.b32.xlu0 %v1287_v56, %s4208_s14  ;;  %v1274_v45 = vrot.slane %v4989_v36, 4  ;;  %v1207_v44 = vor.u32 1.1754944e-38, %v1206_v60  ;;  %vm1205_vm4 = vcmp.eq.f32.partialorder %v1204_v20, 8.507059e+37  ;;  %v1273_v0 = vrot.slane %v4989_v36, 3 }
 0x633   :  { %v1203_v18 = vsel %vm1202_vm3, %v3927_v19, %v1199_v35  ;;  %v3929_v15 = vpop.eup %3928  ;;  %v1291_v33 = vmul.f32 %v1275_v48, %v5087_v61  ;;  %v1264_v37 = vand.u32 2147483647, %v5048_v5  ;;  %v1266_v34 = vand.u32 2147483648, %v5048_v5 }
 0x634   :  { %v1290_v22 = vmul.f32 %v1274_v45, %v5092_v29  ;;  %v5097_v14 = vsel %vm1205_vm4, %v1207_v44, %v1203_v18  ;;  %v1256_v63 = vmul.f32 %v3929_v15, %v5048_v5  ;;  %vm1261_vm7 = vweird.f32 %v3929_v15 }
 0x635   :  { %v1289_v19 = vmul.f32 %v1273_v0, %v5097_v14  ;;  %vm1260_vm9 = vweird.f32 %v5048_v5  ;;  %vm1265_vm0 = vcmp.eq.f32.partialorder %v1264_v37, 8.507059e+37  ;;  %v1267_v60 = vor.u32 1.1754944e-38, %v1266_v34 }
 0x636   :  { %1312 = vrot.lane.b32.xlu2 %v1291_v33, %s4208_s14  ;;  %v1257_v26 = vsub.f32 1.0, %v1256_v63  ;;  %vm1262_vm11 = vmor %vm1260_vm9, %vm1261_vm7  ;;  %v1277_v59 = vrot.slane %v4989_v36, 7  ;;  %v1251_v23 = vand.u32 2147483648, %v1148_v53  ;;  %v1249_v54 = vand.u32 2147483647, %v1148_v53 }
 0x637   :  { %1310 = vrot.lane.b32.xlu1 %v1290_v22, %s4208_s14  ;;  %v3931_v6 = vpop.eup %3930  ;;  %vm1245_vm5 = vweird.f32 %v1148_v53  ;;  %v1276_v35 = vrot.slane %v4989_v36, 6  ;;  %vm6986_vm12 = vcmask 1041409   ;;  %vm6987_vm13 = vcmask 1042434  }
 0x638   :  { %v1258_v47 = vmul.f32 %v3929_v15, %v1257_v26  ;;  %v1241_v51 = vmul.f32 %v3931_v6, %v1148_v53  ;;  %vm1246_vm6 = vweird.f32 %v3931_v6  ;;  %v1252_v20 = vor.u32 1.1754944e-38, %v1251_v23 }
 0x639   :  { %vm1247_vm8 = vmor %vm1245_vm5, %vm1246_vm6  ;;  %vm1250_vm10 = vcmp.eq.f32.partialorder %v1249_v54, 8.507059e+37  ;;  %vm6990_vm14 = vcmask 1043459   ;;  %vm6991_vm15 = vcmask 1044484   ;;  %vm6992_vm1 = vcmask 1045509  }
 0x63a   :  { %1308 = vrot.lane.b32.xlu0 %v1289_v19, %s4208_s14  ;;  %v1259_v28 = vadd.f32 %v3929_v15, %v1258_v47  ;;  %v1242_v12 = vsub.f32 1.0, %v1241_v51  ;;  %vm6993_vm2 = vcmask 1046534   ;;  %vm6994_vm3 = vcmask 1047559  }
 0x63b   :  { %vm6995_vm4 = vcmask 261120  }
 0x63c   :  { %v1263_v24 = vsel %vm1262_vm11, %v3929_v15, %v1259_v28  ;;  %v1243_v46 = vmul.f32 %v3931_v6, %v1242_v12  ;;  %vm6996_vm7 = vmmov %vm6995_vm4 }
 0x63d   :  { %v5109_v56 = vsel %vm1265_vm0, %v1267_v60, %v1263_v24 }
 0x63e   :  { %v1293_v17 = vmul.f32 %v1277_v59, %v5109_v56  ;;  %v1244_v4 = vadd.f32 %v3931_v6, %v1243_v46 }
 0x640   :  { %1316 = vrot.lane.b32.xlu1 %v1293_v17, %s4208_s14  ;;  %v1248_v5 = vsel %vm1247_vm8, %v3931_v6, %v1244_v4 }
 0x641   :  { %v5114_v48 = vsel %vm1250_vm10, %v1252_v20, %v1248_v5 }
 0x642   :  { %v1292_v45 = vmul.f32 %v1276_v35, %v5114_v48 }
 0x644   :  { %1314 = vrot.lane.b32.xlu0 %v1292_v45, %s4208_s14 }
 0x688   :  { %v1303_v18 = vpop.permute.xlu2 %1302 }
 0x689   :  { %v1326_v44 = vadd.f32 %v1303_v18, %v4954_v21 }
 0x68b   :  { %3932 = vtanh.f32 %v1326_v44 }
 0x690   :  { %v1313_v15 = vpop.permute.xlu2 %1312 }
 0x691   :  { %v5119_v53 = vpop.eup %3932  ;;  %v1331_v33 = vadd.f32 %v1313_v15, %v4965_v25 }
 0x692   :  { %v1342_v22 = vsub.f32 %v4878_v52, %v5119_v53 }
 0x693   :  { %3934 = vtanh.f32 %v1331_v33 }
 0x694   :  { %1358 = vrot.lane.b32.xlu1 %v1342_v22, %s4210_s15 }
 0x699   :  { %v5125_v36 = vpop.eup %3934 }
 0x69a   :  { %v1347_v63 = vsub.f32 %v4888_v13, %v5125_v36 }
 0x69c   :  { %1368 = vrot.lane.b32.xlu1 %v1347_v63, %s4210_s15 }
 0x6a1   :  { %v1307_v21 = vpop.permute.xlu1 %1306 }
 0x6a2   :  { %v1328_v0 = vadd.f32 %v1307_v21, %v4958_v31 }
 0x6a4   :  { %3936 = vtanh.f32 %v1328_v0  ;;  %v1305_v26 = vpop.permute.xlu0 %1304 }
 0x6a5   :  { %v1327_v25 = vadd.f32 %v1305_v26, %v4956_v43 }
 0x6a7   :  { %3938 = vtanh.f32 %v1327_v25 }
 0x6a9   :  { %v1311_v6 = vpop.permute.xlu1 %1310 }
 0x6aa   :  { %v3937_v19 = vpop.eup %3936  ;;  %v1330_v37 = vadd.f32 %v1311_v6, %v4962_v11 }
 0x6ab   :  { %v1344_v34 = vsub.f32 %v4872_v49, %v3937_v19 }
 0x6ac   :  { %3940 = vtanh.f32 %v1330_v37  ;;  %v1309_v47 = vpop.permute.xlu0 %1308 }
 0x6ad   :  { %v3939_v51 = vpop.eup %3938  ;;  %v1329_v28 = vadd.f32 %v1309_v47, %v4960_v41  ;;  %1362 = vrot.lane.b32.xlu0 %v1344_v34, %s4210_s15 }
 0x6ae   :  { %v1343_v31 = vsub.f32 %v4870_v27, %v3939_v51 }
 0x6af   :  { %3942 = vtanh.f32 %v1329_v28 }
 0x6b0   :  { %1360 = vrot.lane.b32.xlu2 %v1343_v31, %s4210_s15 }
 0x6b2   :  { %v3941_v43 = vpop.eup %3940  ;;  %v1317_v12 = vpop.permute.xlu1 %1316 }
 0x6b3   :  { %v1346_v60 = vsub.f32 %v4881_v42, %v3941_v43  ;;  %v1333_v11 = vadd.f32 %v1317_v12, %v4972_v57 }
 0x6b5   :  { %v3943_v59 = vpop.eup %3942  ;;  %1366 = vrot.lane.b32.xlu0 %v1346_v60, %s4210_s15  ;;  %3944 = vtanh.f32 %v1333_v11 }
 0x6b6   :  { %v1345_v23 = vsub.f32 %v4876_v38, %v3943_v59  ;;  %v1315_v41 = vpop.permute.xlu0 %1314 }
 0x6b7   :  { %v1332_v24 = vadd.f32 %v1315_v41, %v4974_v58 }
 0x6b8   :  { %1364 = vrot.lane.b32.xlu2 %v1345_v23, %s4210_s15 }
 0x6b9   :  { %3946 = vtanh.f32 %v1332_v24 }
 0x6bb   :  { %v3945_v46 = vpop.eup %3944 }
 0x6bc   :  { %v1349_v54 = vsub.f32 %v4890_v8, %v3945_v46 }
 0x6be   :  { %1372 = vrot.lane.b32.xlu0 %v1349_v54, %s4210_s15 }
 0x6bf   :  { %v3947_v17 = vpop.eup %3946 }
 0x6c0   :  { %v1348_v57 = vsub.f32 %v4894_v1, %v3947_v17 }
 0x6c2   :  { %1370 = vrot.lane.b32.xlu2 %v1348_v57, %s4210_s15 }
 0x706   :  { %v1359_v4 = vpop.permute.xlu1 %1358 }
 0x707   :  { %v1382_v20 = vmul.f32 %v1359_v4, %v5052_v40 }
 0x709   :  { %1398 = vrot.lane.b32.xlu0 %v1382_v20, %s4209_s1 }
 0x70a   :  { %v1361_v5 = vpop.permute.xlu2 %1360 }
 0x70b   :  { %v1383_v58 = vmul.f32 %v1361_v5, %v5076_v7  ;;  %v5208_v5 = vld [vmem:[#allocation3 + $0x3] sm:$0x1] }
 0x70d   :  { %1400 = vrot.lane.b32.xlu1 %v1383_v58, %s4209_s1  ;;  %v5210_v58 = vld [vmem:[#allocation3 + $0xb] sm:$0x1] }
 0x70e   :  { %v1369_v35 = vpop.permute.xlu1 %1368 }
 0x70f   :  { %v1387_v45 = vmul.f32 %v1369_v35, %v5087_v61 }
 0x711   :  { %1408 = vrot.lane.b32.xlu0 %v1387_v45, %s4209_s1 }
 0x712   :  { %v1365_v18 = vpop.permute.xlu2 %1364 }
 0x713   :  { %v1385_v44 = vmul.f32 %v1365_v18, %v5097_v14  ;;  %v5219_v18 = vld [vmem:[#allocation3 + $0x2b] sm:$0x1] }
 0x715   :  { %1404 = vrot.lane.b32.xlu1 %v1385_v44, %s4209_s1 }
 0x71c   :  { %v1371_v15 = vpop.permute.xlu2 %1370 }
 0x71d   :  { %v1388_v40 = vmul.f32 %v1371_v15, %v5114_v48 }
 0x71f   :  { %v1363_v33 = vpop.permute.xlu0 %1362  ;;  %1410 = vrot.lane.b32.xlu1 %v1388_v40, %s4209_s1 }
 0x720   :  { %v1384_v7 = vmul.f32 %v1363_v33, %v5059_v16 }
 0x722   :  { %1402 = vrot.lane.b32.xlu2 %v1384_v7, %s4209_s1 }
 0x727   :  { %v1367_v22 = vpop.permute.xlu0 %1366 }
 0x728   :  { %v1386_v61 = vmul.f32 %v1367_v22, %v5092_v29 }
 0x72a   :  { %1406 = vrot.lane.b32.xlu2 %v1386_v61, %s4209_s1 }
 0x730   :  { %v1373_v63 = vpop.permute.xlu0 %1372 }
 0x731   :  { %v1389_v14 = vmul.f32 %v1373_v63, %v5109_v56 }
 0x733   :  { %1412 = vrot.lane.b32.xlu2 %v1389_v14, %s4209_s1 }
 0x77b   :  { %v1399_v48 = vpop.permute.xlu0 %1398 }
 0x77c   :  { %v1403_v21 = vpop.permute.xlu2 %1402  ;;  %v5172_v29 = vadd.f32 %v5119_v53, %v1399_v48 }
 0x77d   :  { %v5166_v6 = vadd.f32 %v3937_v19, %v1403_v21 }
 0x77f   :  { %v1401_v0 = vpop.permute.xlu1 %1400  ;;  %6984 = vst [vmem:[#allocation15_spill] sm:$0xff] %v5166_v6  ;;  %v1472_v56 = vrot.slane %v5166_v6, 6 }
 0x780   :  { %v5164_v26 = vadd.f32 %v3939_v51, %v1401_v0 }
 0x782   :  { %6983 = vst [vmem:[#allocation14_spill] sm:$0xff] %v5164_v26  ;;  %v1470_v37 = vrot.slane %v5164_v26, 7 }
 0x783   :  { %v1409_v31 = vpop.permute.xlu0 %1408 }
 0x784   :  { %v1407_v25 = vpop.permute.xlu2 %1406  ;;  %v1471_v28 = vsel %vm6986_vm12, %v1470_v37, %v5172_v29  ;;  %v5183_v11 = vadd.f32 %v5125_v36, %v1409_v31 }
 0x785   :  { %v5175_v47 = vadd.f32 %v3941_v43, %v1407_v25  ;;  %v1473_v12 = vsel %vm6987_vm13, %v1472_v56, %v1471_v28  ;;  %v5226_v25 = vld [vmem:[#allocation3 + $0x3b] sm:$0x1] }
 0x786   :  { %6988 = vst [vmem:[#allocation17_spill] sm:$0xff] %v5183_v11  ;;  %v1478_v24 = vrot.slane %v5183_v11, 3 }
 0x787   :  { %v1405_v16 = vpop.permute.xlu1 %1404  ;;  %6985 = vst [vmem:[#allocation16_spill] sm:$0xff] %v5175_v47  ;;  %v1476_v60 = vrot.slane %v5175_v47, 4 }
 0x788   :  { %v5169_v34 = vadd.f32 %v3943_v59, %v1405_v16  ;;  %v5228_v16 = vld [vmem:[#allocation3 + $0x33] sm:$0x1] }
 0x78a   :  { %v1474_v51 = vrot.slane %v5169_v34, 5 }
 0x78c   :  { %v1475_v59 = vsel %vm6990_vm14, %v1474_v51, %v1473_v12 }
 0x78d   :  { %v1413_v19 = vpop.permute.xlu2 %1412  ;;  %v1477_v41 = vsel %vm6991_vm15, %v1476_v60, %v1475_v59 }
 0x78e   :  { %v5185_v53 = vadd.f32 %v3945_v46, %v1413_v19  ;;  %v1479_v4 = vsel %vm6992_vm1, %v1478_v24, %v1477_v41 }
 0x790   :  { %6989 = vst [vmem:[#allocation18_spill] sm:$0xff] %v5185_v53  ;;  %v1482_v54 = vrot.slane %v5185_v53, 1 }
 0x791   :  { %v1411_v43 = vpop.permute.xlu1 %1410 }
 0x792   :  { %v5188_v23 = vadd.f32 %v3947_v17, %v1411_v43 }
 0x794   :  { %v1480_v57 = vrot.slane %v5188_v23, 2 }
 0x796   :  { %v1481_v36 = vsel %vm6993_vm2, %v1480_v57, %v1479_v4 }
 0x797   :  { %v1483_v46 = vsel %vm6994_vm3, %v1482_v54, %v1481_v36 }
 0x798   :  { %1484 = vrot.lane.b32.xlu0 %v1483_v46, %s4208_s14 }
 0x80a   :  { %v1485_v20 = vpop.permute.xlu0 %1484 }
 0x80b   :  { %3740 = vmatmul.msk.f32.vlgmr.msra.gmra.mxu1 %vm6995_vm4, %v1485_v20  ;;  %3741 = vmatmul.msk.f32.vlgmr.msrb.gmra.mxu2 %vm6996_vm7, %v1485_v20 }
 0x80c   :  { %2826 = vmatpush.msra.mxu1 %v4909_v62  ;;  %2846 = vmatpush.msrb.mxu2 %v4915_v2  ;;  %v5212_v62 = vld [vmem:[#allocation3 + $0x13] sm:$0x1] }
 0x80e   :  { %2827 = vmatpush.msra.mxu1 %v4921_v30  ;;  %2847 = vmatpush.msrb.mxu2 %v4927_v50  ;;  %v5214_v50 = vld [vmem:[#allocation3 + $0x1b] sm:$0x1] }
 0x810   :  { %2828 = vmatpush.msra.mxu1 %v4933_v32  ;;  %2848 = vmatpush.msrb.mxu2 %v4939_v3  ;;  %v5216_v32 = vld [vmem:[#allocation3 + $0x23] sm:$0x1] }
 0x812   :  { %2829 = vmatpush.msra.mxu1 %v4945_v10  ;;  %2849 = vmatpush.msrb.mxu2 %v4951_v9 }
 0x888   :  { %v1505_v17 = vpop.f32.mrf.mxu1 }
 0x889   :  { %v1537_v2 = vrot.slane %v1505_v17, 1  ;;  %v1538_v35 = vrot.slane %v1505_v17, 2  ;;  %v1539_v30 = vrot.slane %v1505_v17, 3  ;;  %v1540_v45 = vrot.slane %v1505_v17, 4 }
 0x88a   :  { %v1541_v3 = vrot.slane %v1505_v17, 5  ;;  %v1552_v10 = vadd.f32 %v5208_v5, %v1505_v17  ;;  %v1543_v22 = vrot.slane %v1505_v17, 7  ;;  %v1542_v14 = vrot.slane %v1505_v17, 6 }
 0x88b   :  { %v1553_v9 = vadd.f32 %v1537_v2, %v5210_v58  ;;  %v1554_v44 = vadd.f32 %v1538_v35, %v5212_v62  ;;  %v1555_v15 = vadd.f32 %v1539_v30, %v5214_v50  ;;  %v1556_v40 = vadd.f32 %v1540_v45, %v5216_v32 }
 0x88c   :  { %v1557_v33 = vadd.f32 %v1541_v3, %v5219_v18  ;;  %v3742_v7 = vmul.f32 -1.442695, %v1552_v10  ;;  %v1559_v37 = vadd.f32 %v1543_v22, %v5226_v25  ;;  %v1558_v56 = vadd.f32 %v1542_v14, %v5228_v16 }
 0x88d   :  { %v3743_v61 = vmul.f32 -1.442695, %v1553_v9  ;;  %v3744_v63 = vmul.f32 -1.442695, %v1554_v44  ;;  %v3746_v21 = vmul.f32 -1.442695, %v1556_v40 }
 0x88e   :  { %3948 = vpow2.f32 %v3742_v7  ;;  %v3747_v0 = vmul.f32 -1.442695, %v1557_v33  ;;  %v3745_v48 = vmul.f32 -1.442695, %v1555_v15  ;;  %v3749_v31 = vmul.f32 -1.442695, %v1559_v37  ;;  %v1525_v19 = vpop.f32.mrf.mxu2 }
 0x88f   :  { %3950 = vpow2.f32 %v3744_v63  ;;  %v3748_v59 = vmul.f32 -1.442695, %v1558_v56  ;;  %v5238_v54 = vadd.f32 %v4986_v39, %v1525_v19 }
 0x890   :  { %3952 = vpow2.f32 %v3743_v61 }
 0x891   :  { %3954 = vpow2.f32 %v3747_v0  ;;  %v1714_v35 = vrot.slane %v5238_v54, 2 }
 0x892   :  { %3956 = vpow2.f32 %v3746_v21 }
 0x893   :  { %3958 = vpow2.f32 %v3745_v48 }
 0x894   :  { %v3949_v28 = vpop.eup %3948 }
 0x895   :  { %v3951_v51 = vpop.eup %3950  ;;  %v5232_v12 = vadd.f32 1.0, %v3949_v28 }
 0x896   :  { %v3953_v60 = vpop.eup %3952  ;;  %v5234_v43 = vadd.f32 1.0, %v3951_v51 }
 0x897   :  { %v3955_v41 = vpop.eup %3954  ;;  %3960 = vrcp.f32 %v5232_v12  ;;  %v5241_v4 = vadd.f32 1.0, %v3953_v60  ;;  %v1601_v46 = vand.u32 2147483647, %v5232_v12  ;;  %v1603_v17 = vand.u32 2147483648, %v5232_v12 }
 0x898   :  { %v3957_v24 = vpop.eup %3956  ;;  %3962 = vrcp.f32 %v5234_v43  ;;  %v5243_v36 = vadd.f32 1.0, %v3955_v41  ;;  %v1631_v2 = vand.u32 2147483647, %v5234_v43  ;;  %v1633_v39 = vand.u32 2147483648, %v5234_v43 }
 0x899   :  { %v3959_v57 = vpop.eup %3958  ;;  %3964 = vpow2.f32 %v3749_v31  ;;  %v5246_v20 = vadd.f32 1.0, %v3957_v24  ;;  %vm1597_vm9 = vweird.f32 %v5232_v12  ;;  %vm1627_vm11 = vweird.f32 %v5234_v43 }
 0x89a   :  { %3966 = vpow2.f32 %v3748_v59  ;;  %v5255_v45 = vadd.f32 1.0, %v3959_v57  ;;  %v1618_v10 = vand.u32 2147483648, %v5241_v4  ;;  %vm5262_vm0 = vcmp.eq.f32.partialorder %v1601_v46, 8.507059e+37 }
 0x89b   :  { %3968 = vrcp.f32 %v5241_v4  ;;  %v1616_v40 = vand.u32 2147483647, %v5241_v4  ;;  %v1678_v33 = vand.u32 2147483648, %v5243_v36  ;;  %v1604_v22 = vor.u32 1.1754944e-38, %v1603_v17 }
 0x89c   :  { %3970 = vrcp.f32 %v5243_v36  ;;  %vm5269_vm6 = vcmp.eq.f32.partialorder %v1631_v2, 8.507059e+37  ;;  %v1634_v14 = vor.u32 1.1754944e-38, %v1633_v39  ;;  %vm1612_vm5 = vweird.f32 %v5241_v4 }
 0x89d   :  { %v3961_v3 = vpop.eup %3960  ;;  %3972 = vrcp.f32 %v5246_v20  ;;  %v1676_v48 = vand.u32 2147483647, %v5243_v36  ;;  %v1619_v28 = vor.u32 1.1754944e-38, %v1618_v10  ;;  %vm1672_vm10 = vweird.f32 %v5243_v36 }
 0x89e   :  { %v3963_v9 = vpop.eup %3962  ;;  %v1593_v44 = vmul.f32 %v3961_v3, %v5232_v12  ;;  %3974 = vrcp.f32 %v5255_v45  ;;  %vm1598_vm8 = vweird.f32 %v3961_v3  ;;  %vm5278_vm13 = vcmp.eq.f32.partialorder %v1616_v40, 8.507059e+37 }
 0x89f   :  { %v3965_v7 = vpop.eup %3964  ;;  %v1623_v61 = vmul.f32 %v3963_v9, %v5234_v43  ;;  %vm1628_vm12 = vweird.f32 %v3963_v9  ;;  %v1679_v59 = vor.u32 1.1754944e-38, %v1678_v33  ;;  %vm1657_vm14 = vweird.f32 %v5246_v20  ;;  %vm1599_vm2 = vmor %vm1597_vm9, %vm1598_vm8 }
 0x8a0   :  { %v3967_v21 = vpop.eup %3966  ;;  %v1594_v0 = vsub.f32 1.0, %v1593_v44  ;;  %v1661_v46 = vand.u32 2147483647, %v5246_v20  ;;  %v1663_v17 = vand.u32 2147483648, %v5246_v20  ;;  %vm5286_vm1 = vcmp.eq.f32.partialorder %v1676_v48, 8.507059e+37  ;;  %vm1629_vm7 = vmor %vm1627_vm11, %vm1628_vm12 }
 0x8a1   :  { %v3969_v37 = vpop.eup %3968  ;;  %v1624_v56 = vsub.f32 1.0, %v1623_v61  ;;  %vm1642_vm8 = vweird.f32 %v5255_v45 }
 0x8a2   :  { %v3971_v51 = vpop.eup %3970  ;;  %v1595_v31 = vmul.f32 %v3961_v3, %v1594_v0  ;;  %v1608_v19 = vmul.f32 %v3969_v37, %v5241_v4  ;;  %vm1613_vm15 = vweird.f32 %v3969_v37 }
 0x8a3   :  { %v3973_v41 = vpop.eup %3972  ;;  %v1625_v24 = vmul.f32 %v3963_v9, %v1624_v56  ;;  %v1668_v57 = vmul.f32 %v3971_v51, %v5243_v36  ;;  %vm1673_vm3 = vweird.f32 %v3971_v51  ;;  %vm1614_vm9 = vmor %vm1612_vm5, %vm1613_vm15  ;;  %v7005_v36 = vrot.slane %v5238_v54, 1 }
 0x8a4   :  { %v1596_v2 = vadd.f32 %v3961_v3, %v1595_v31  ;;  %v1609_v39 = vsub.f32 1.0, %v1608_v19  ;;  %v1653_v44 = vmul.f32 %v3973_v41, %v5246_v20  ;;  %vm1658_vm4 = vweird.f32 %v3973_v41  ;;  %v3975_v61 = vpop.eup %3974  ;;  %vm1674_vm11 = vmor %vm1672_vm10, %vm1673_vm3 }
 0x8a5   :  { %v1626_v40 = vadd.f32 %v3963_v9, %v1625_v24  ;;  %v1669_v33 = vsub.f32 1.0, %v1668_v57  ;;  %v5297_v31 = vadd.f32 1.0, %v3965_v7  ;;  %v1638_v24 = vmul.f32 %v3975_v61, %v5255_v45 }
 0x8a6   :  { %v1600_v0 = vsel %vm1599_vm2, %v3961_v3, %v1596_v2  ;;  %v1610_v48 = vmul.f32 %v3969_v37, %v1609_v39  ;;  %v1654_v56 = vsub.f32 1.0, %v1653_v44  ;;  %vm1662_vm5 = vcmp.eq.f32.partialorder %v1661_v46, 8.507059e+37 }
 0x8a7   :  { %v5301_v19 = vsel %vm5262_vm0, %v1604_v22, %v1600_v0  ;;  %v1630_v12 = vsel %vm1629_vm7, %v3963_v9, %v1626_v40  ;;  %v1670_v30 = vmul.f32 %v3971_v51, %v1669_v33  ;;  %v1639_v15 = vsub.f32 1.0, %v1638_v24  ;;  %vm1659_vm0 = vmor %vm1657_vm14, %vm1658_vm4 }
 0x8a8   :  { %v1728_v57 = vmul.f32 %v5301_v19, %v5238_v54  ;;  %v5308_v3 = vsel %vm5269_vm6, %v1634_v14, %v1630_v12  ;;  %v1611_v43 = vadd.f32 %v3969_v37, %v1610_v48  ;;  %v1655_v2 = vmul.f32 %v3973_v41, %v1654_v56 }
 0x8a9   :  { %v1730_v7 = vmul.f32 %v1714_v35, %v5308_v3  ;;  %v1671_v9 = vadd.f32 %v3971_v51, %v1670_v30  ;;  %v1648_v22 = vand.u32 2147483648, %v5255_v45  ;;  %3976 = vrcp.f32 %v5297_v31 }
 0x8aa   :  { %1744 = vrot.lane.b32.xlu0 %v1728_v57, %s4208_s14  ;;  %v1615_v39 = vsel %vm1614_vm9, %v3969_v37, %v1611_v43  ;;  %v1656_v63 = vadd.f32 %v3973_v41, %v1655_v2  ;;  %v1590_v14 = vadd.f32 1.0, %v3967_v21  ;;  %v1640_v30 = vmul.f32 %v3975_v61, %v1639_v15 }
 0x8ab   :  { %1748 = vrot.lane.b32.xlu2 %v1730_v7, %s4208_s14  ;;  %v5325_v4 = vsel %vm5278_vm13, %v1619_v28, %v1615_v39  ;;  %v1675_v35 = vsel %vm1674_vm11, %v3971_v51, %v1671_v9  ;;  %vm1643_vm6 = vweird.f32 %v3975_v61  ;;  %v1664_v40 = vor.u32 1.1754944e-38, %v1663_v17 }
 0x8ac   :  { %v1729_v37 = vmul.f32 %v7005_v36, %v5325_v4  ;;  %v1660_v44 = vsel %vm1659_vm0, %v3973_v41, %v1656_v63  ;;  %v1646_v21 = vand.u32 2147483647, %v5255_v45  ;;  %v5336_v60 = vsel %vm5286_vm1, %v1679_v59, %v1675_v35  ;;  %vm1644_vm10 = vmor %vm1642_vm8, %vm1643_vm6 }
 0x8ad   :  { %v1641_v28 = vadd.f32 %v3975_v61, %v1640_v30  ;;  %v1717_v20 = vrot.slane %v5238_v54, 5  ;;  %v5341_v51 = vsel %vm1662_vm5, %v1664_v40, %v1660_v44  ;;  %3978 = vrcp.f32 %v1590_v14 }
 0x8ae   :  { %1746 = vrot.lane.b32.xlu1 %v1729_v37, %s4208_s14  ;;  %v1716_v41 = vrot.slane %v5238_v54, 4  ;;  %v1649_v33 = vor.u32 1.1754944e-38, %v1648_v22  ;;  %vm1647_vm12 = vcmp.eq.f32.partialorder %v1646_v21, 8.507059e+37  ;;  %v1715_v48 = vrot.slane %v5238_v54, 3 }
 0x8af   :  { %v1645_v17 = vsel %vm1644_vm10, %v3975_v61, %v1641_v28  ;;  %v3977_v0 = vpop.eup %3976  ;;  %v1733_v59 = vmul.f32 %v1717_v20, %v5336_v60  ;;  %v1706_v24 = vand.u32 2147483647, %v5297_v31  ;;  %v1708_v57 = vand.u32 2147483648, %v5297_v31 }
 0x8b0   :  { %v1732_v46 = vmul.f32 %v1716_v41, %v5341_v51  ;;  %v5346_v10 = vsel %vm1647_vm12, %v1649_v33, %v1645_v17  ;;  %v1698_v45 = vmul.f32 %v3977_v0, %v5297_v31  ;;  %vm1703_vm13 = vweird.f32 %v3977_v0 }
 0x8b1   :  { %v1731_v61 = vmul.f32 %v1715_v48, %v5346_v10  ;;  %vm1702_vm14 = vweird.f32 %v5297_v31  ;;  %vm1707_vm1 = vcmp.eq.f32.partialorder %v1706_v24, 8.507059e+37  ;;  %v1709_v15 = vor.u32 1.1754944e-38, %v1708_v57 }
 0x8b2   :  { %1754 = vrot.lane.b32.xlu0 %v1733_v59, %s4208_s14  ;;  %v1699_v56 = vsub.f32 1.0, %v1698_v45  ;;  %vm1704_vm15 = vmor %vm1702_vm14, %vm1703_vm13  ;;  %v1719_v22 = vrot.slane %v5238_v54, 7  ;;  %v1693_v39 = vand.u32 2147483648, %v1590_v14  ;;  %v1691_v30 = vand.u32 2147483647, %v1590_v14 }
 0x8b3   :  { %1752 = vrot.lane.b32.xlu2 %v1732_v46, %s4208_s14  ;;  %v3979_v12 = vpop.eup %3978  ;;  %vm1687_vm3 = vweird.f32 %v1590_v14  ;;  %v1718_v21 = vrot.slane %v5238_v54, 6  ;;  %vm7010_vm9 = vcmask 1041409   ;;  %vm7011_vm11 = vcmask 1042434  }
 0x8b4   :  { %v1700_v43 = vmul.f32 %v3977_v0, %v1699_v56  ;;  %v1683_v2 = vmul.f32 %v3979_v12, %v1590_v14  ;;  %vm1688_vm2 = vweird.f32 %v3979_v12  ;;  %v1694_v40 = vor.u32 1.1754944e-38, %v1693_v39 }
 0x8b5   :  { %vm1689_vm4 = vmor %vm1687_vm3, %vm1688_vm2  ;;  %vm1692_vm7 = vcmp.eq.f32.partialorder %v1691_v30, 8.507059e+37  ;;  %vm7014_vm0 = vcmask 1043459   ;;  %vm7016_vm6 = vcmask 1044484   ;;  %vm7017_vm5 = vcmask 1045509  }
 0x8b6   :  { %1750 = vrot.lane.b32.xlu1 %v1731_v61, %s4208_s14  ;;  %v1701_v7 = vadd.f32 %v3977_v0, %v1700_v43  ;;  %v1684_v9 = vsub.f32 1.0, %v1683_v2  ;;  %vm7018_vm8 = vcmask 1046534   ;;  %vm7019_vm10 = vcmask 1047559  }
 0x8b7   :  { %vm7020_vm12 = vcmask 261120  }
 0x8b8   :  { %v1705_v63 = vsel %vm1704_vm15, %v3977_v0, %v1701_v7  ;;  %v1685_v35 = vmul.f32 %v3979_v12, %v1684_v9  ;;  %vm7021_vm13 = vmmov %vm7020_vm12 }
 0x8b9   :  { %v5358_v36 = vsel %vm1707_vm1, %v1709_v15, %v1705_v63 }
 0x8ba   :  { %v1735_v37 = vmul.f32 %v1719_v22, %v5358_v36  ;;  %v1686_v44 = vadd.f32 %v3979_v12, %v1685_v35 }
 0x8bc   :  { %1758 = vrot.lane.b32.xlu2 %v1735_v37, %s4208_s14  ;;  %v1690_v31 = vsel %vm1689_vm4, %v3979_v12, %v1686_v44 }
 0x8bd   :  { %v5363_v28 = vsel %vm1692_vm7, %v1694_v40, %v1690_v31 }
 0x8be   :  { %v1734_v20 = vmul.f32 %v1718_v21, %v5363_v28 }
 0x8c0   :  { %1756 = vrot.lane.b32.xlu1 %v1734_v20, %s4208_s14 }
 0x905   :  { %v1749_v41 = vpop.permute.xlu2 %1748 }
 0x906   :  { %v1770_v17 = vadd.f32 %v1749_v41, %v5212_v62 }
 0x908   :  { %3980 = vtanh.f32 %v1770_v17 }
 0x90d   :  { %v1753_v33 = vpop.permute.xlu2 %1752 }
 0x90e   :  { %v5368_v14 = vpop.eup %3980  ;;  %v1772_v0 = vadd.f32 %v1753_v33, %v5216_v32 }
 0x90f   :  { %v1786_v59 = vsub.f32 %v5166_v6, %v5368_v14 }
 0x910   :  { %3982 = vtanh.f32 %v1772_v0 }
 0x911   :  { %1804 = vrot.lane.b32.xlu1 %v1786_v59, %s4210_s15 }
 0x916   :  { %v5374_v54 = vpop.eup %3982  ;;  %v1759_v46 = vpop.permute.xlu2 %1758 }
 0x917   :  { %v1788_v45 = vsub.f32 %v5175_v47, %v5374_v54  ;;  %v1775_v62 = vadd.f32 %v1759_v46, %v5226_v25 }
 0x919   :  { %1808 = vrot.lane.b32.xlu1 %v1788_v45, %s4210_s15  ;;  %3984 = vtanh.f32 %v1775_v62 }
 0x91c   :  { %v1745_v48 = vpop.permute.xlu0 %1744 }
 0x91d   :  { %v1768_v32 = vadd.f32 %v1745_v48, %v5208_v5 }
 0x91f   :  { %3986 = vtanh.f32 %v1768_v32  ;;  %v5381_v56 = vpop.eup %3984 }
 0x920   :  { %v1747_v12 = vpop.permute.xlu1 %1746  ;;  %v1791_v24 = vsub.f32 %v5185_v53, %v5381_v56 }
 0x921   :  { %v1769_v61 = vadd.f32 %v1747_v12, %v5210_v58 }
 0x922   :  { %1814 = vrot.lane.b32.xlu1 %v1791_v24, %s4210_s15 }
 0x923   :  { %3988 = vtanh.f32 %v1769_v61 }
 0x924   :  { %v1755_v57 = vpop.permute.xlu0 %1754 }
 0x925   :  { %v3987_v25 = vpop.eup %3986  ;;  %v1773_v43 = vadd.f32 %v1755_v57, %v5219_v18 }
 0x926   :  { %v1784_v2 = vsub.f32 %v5172_v29, %v3987_v25 }
 0x927   :  { %3990 = vtanh.f32 %v1773_v43 }
 0x928   :  { %v1751_v5 = vpop.permute.xlu1 %1750  ;;  %1800 = vrot.lane.b32.xlu2 %v1784_v2, %s4210_s15 }
 0x929   :  { %v3989_v7 = vpop.eup %3988  ;;  %v1771_v9 = vadd.f32 %v1751_v5, %v5214_v50 }
 0x92a   :  { %v1785_v58 = vsub.f32 %v5164_v26, %v3989_v7 }
 0x92b   :  { %3992 = vtanh.f32 %v1771_v9 }
 0x92c   :  { %1802 = vrot.lane.b32.xlu0 %v1785_v58, %s4210_s15 }
 0x92d   :  { %v3991_v15 = vpop.eup %3990 }
 0x92e   :  { %v1789_v22 = vsub.f32 %v5183_v11, %v3991_v15 }
 0x930   :  { %1810 = vrot.lane.b32.xlu2 %v1789_v22, %s4210_s15 }
 0x931   :  { %v3993_v18 = vpop.eup %3992 }
 0x932   :  { %v1787_v39 = vsub.f32 %v5169_v34, %v3993_v18  ;;  %v1757_v63 = vpop.permute.xlu1 %1756 }
 0x933   :  { %v1774_v35 = vadd.f32 %v1757_v63, %v5228_v16 }
 0x934   :  { %1806 = vrot.lane.b32.xlu0 %v1787_v39, %s4210_s15 }
 0x935   :  { %3994 = vtanh.f32 %v1774_v35 }
 0x93b   :  { %v3995_v50 = vpop.eup %3994 }
 0x93c   :  { %v1790_v30 = vsub.f32 %v5188_v23, %v3995_v50 }
 0x93e   :  { %1812 = vrot.lane.b32.xlu0 %v1790_v30, %s4210_s15 }
 0x982   :  { %v1801_v37 = vpop.permute.xlu2 %1800 }
 0x983   :  { %v1824_v44 = vmul.f32 %v1801_v37, %v5301_v19  ;;  %v1805_v40 = vpop.permute.xlu1 %1804 }
 0x984   :  { %v1826_v31 = vmul.f32 %v1805_v40, %v5308_v3  ;;  %v4199_v40 = vld [vmem:[%s6898_s2 + $0x10] sm:$0xff] }
 0x985   :  { %1840 = vrot.lane.b32.xlu1 %v1824_v44, %s4209_s1  ;;  %v4198_v44 = vld [vmem:[%s6900_s3 + $0x18] sm:$0xff] }
 0x986   :  { %1844 = vrot.lane.b32.xlu0 %v1826_v31, %s4209_s1  ;;  %v4200_v31 = vld [vmem:[%s6900_s3 + $0x10] sm:$0xff] }
 0x98a   :  { %v1811_v21 = vpop.permute.xlu2 %1810 }
 0x98b   :  { %v1829_v16 = vmul.f32 %v1811_v21, %v5336_v60  ;;  %v1809_v20 = vpop.permute.xlu1 %1808  ;;  %v4201_v21 = vld [vmem:[%s6898_s2 + $0x8] sm:$0xff] }
 0x98c   :  { %v1828_v41 = vmul.f32 %v1809_v20, %v5341_v51  ;;  %v4203_v20 = vld [vmem:[%s6898_s2] sm:$0xff] }
 0x98d   :  { %1850 = vrot.lane.b32.xlu1 %v1829_v16, %s4209_s1  ;;  %v4202_v16 = vld [vmem:[%s6900_s3 + $0x8] sm:$0xff] }
 0x98e   :  { %1848 = vrot.lane.b32.xlu0 %v1828_v41, %s4209_s1  ;;  %v4204_v41 = vld [vmem:[%s6900_s3] sm:$0xff] }
 0x994   :  { %v1815_v17 = vpop.permute.xlu1 %1814 }
 0x995   :  { %v1831_v19 = vmul.f32 %v1815_v17, %v5358_v36 }
 0x997   :  { %1854 = vrot.lane.b32.xlu0 %v1831_v19, %s4209_s1  ;;  %v5477_v19 = vld [vmem:[#allocation3 + $0x4] sm:$0x1] }
 0x99e   :  { %v1803_v3 = vpop.permute.xlu0 %1802 }
 0x99f   :  { %v1825_v33 = vmul.f32 %v1803_v3, %v5325_v4  ;;  %v5479_v3 = vld [vmem:[#allocation3 + $0xc] sm:$0x1] }
 0x9a1   :  { %1842 = vrot.lane.b32.xlu2 %v1825_v33, %s4209_s1  ;;  %v5481_v33 = vld [vmem:[#allocation3 + $0x14] sm:$0x1] }
 0x9a6   :  { %v1807_v0 = vpop.permute.xlu0 %1806 }
 0x9a7   :  { %v1827_v60 = vmul.f32 %v1807_v0, %v5346_v10 }
 0x9a9   :  { %1846 = vrot.lane.b32.xlu2 %v1827_v60, %s4209_s1 }
 0x9b0   :  { %v1813_v51 = vpop.permute.xlu0 %1812 }
 0x9b1   :  { %v1830_v59 = vmul.f32 %v1813_v51, %v5363_v28 }
 0x9b3   :  { %1852 = vrot.lane.b32.xlu2 %v1830_v59, %s4209_s1 }
 0x9f7   :  { %v1841_v36 = vpop.permute.xlu1 %1840 }
 0x9f8   :  { %v1845_v46 = vpop.permute.xlu0 %1844  ;;  %v5424_v61 = vadd.f32 %v3987_v25, %v1841_v36 }
 0x9f9   :  { %v5419_v4 = vadd.f32 %v5368_v14, %v1845_v46  ;;  %v5483_v46 = vld [vmem:[#allocation3 + $0x1c] sm:$0x1] }
 0x9fa   :  { %7008 = vst [vmem:[#allocation21_spill] sm:$0xff] %v5424_v61 }
 0x9fb   :  { %v1843_v45 = vpop.permute.xlu2 %1842  ;;  %7006 = vst [vmem:[#allocation19_spill] sm:$0xff] %v5419_v4  ;;  %v1914_v28 = vrot.slane %v5419_v4, 6 }
 0x9fc   :  { %v5416_v62 = vadd.f32 %v3989_v7, %v1843_v45  ;;  %v5485_v45 = vld [vmem:[#allocation3 + $0x24] sm:$0x1] }
 0x9fe   :  { %v1912_v12 = vrot.slane %v5416_v62, 7 }
 0x9ff   :  { %v1851_v2 = vpop.permute.xlu1 %1850 }
 0xa00   :  { %v1849_v48 = vpop.permute.xlu0 %1848  ;;  %v1913_v57 = vsel %vm7010_vm9, %v1912_v12, %v5424_v61  ;;  %v5435_v9 = vadd.f32 %v3991_v15, %v1851_v2 }
 0xa01   :  { %v5428_v24 = vadd.f32 %v5374_v54, %v1849_v48  ;;  %v1915_v5 = vsel %vm7011_vm11, %v1914_v28, %v1913_v57 }
 0xa02   :  { %7012 = vst [vmem:[#allocation23_spill] sm:$0xff] %v5435_v9  ;;  %v1920_v39 = vrot.slane %v5435_v9, 3 }
 0xa03   :  { %v1847_v32 = vpop.permute.xlu2 %1846  ;;  %7009 = vst [vmem:[#allocation22_spill] sm:$0xff] %v5428_v24  ;;  %v1918_v7 = vrot.slane %v5428_v24, 4 }
 0xa04   :  { %v5422_v10 = vadd.f32 %v3993_v18, %v1847_v32  ;;  %v5488_v32 = vld [vmem:[#allocation3 + $0x2c] sm:$0x1] }
 0xa06   :  { %7007 = vst [vmem:[#allocation20_spill] sm:$0xff] %v5422_v10  ;;  %v1916_v43 = vrot.slane %v5422_v10, 5 }
 0xa08   :  { %v1917_v58 = vsel %vm7014_vm0, %v1916_v43, %v1915_v5 }
 0xa09   :  { %v1855_v14 = vpop.permute.xlu0 %1854  ;;  %v1919_v18 = vsel %vm7016_vm6, %v1918_v7, %v1917_v58 }
 0xa0a   :  { %v5438_v25 = vadd.f32 %v5381_v56, %v1855_v14  ;;  %v1921_v30 = vsel %vm7017_vm5, %v1920_v39, %v1919_v18 }
 0xa0c   :  { %7013 = vst [vmem:[#allocation24_spill] sm:$0xff] %v5438_v25  ;;  %v1924_v63 = vrot.slane %v5438_v25, 1 }
 0xa0d   :  { %v1853_v54 = vpop.permute.xlu2 %1852 }
 0xa0e   :  { %v5441_v22 = vadd.f32 %v3995_v50, %v1853_v54  ;;  %v4197_v50 = vld [vmem:[%s6898_s2 + $0x18] sm:$0xff] }
 0xa10   :  { %7015 = vst [vmem:[#allocation25_spill] sm:$0xff] %v5441_v22  ;;  %v1922_v35 = vrot.slane %v5441_v22, 2 }
 0xa12   :  { %v1923_v15 = vsel %vm7018_vm8, %v1922_v35, %v1921_v30  ;;  %v5495_v35 = vld [vmem:[#allocation3 + $0x3c] sm:$0x1]  ;;  %v5497_v30 = vld [vmem:[#allocation3 + $0x34] sm:$0x1] }
 0xa13   :  { %v1925_v56 = vsel %vm7019_vm10, %v1924_v63, %v1923_v15 }
 0xa14   :  { %1926 = vrot.lane.b32.xlu1 %v1925_v56, %s4208_s14 }
 0xa86   :  { %v1927_v37 = vpop.permute.xlu1 %1926 }
 0xa87   :  { %3750 = vmatmul.msk.f32.vlgmr.msrb.gmra.mxu3 %vm7020_vm12, %v1927_v37  ;;  %3751 = vmatmul.msk.f32.vlgmr.msrb.gmra.mxu1 %vm7021_vm13, %v1927_v37 }
 0xa88   :  { %3268 = vmatpush.msrb.mxu3 %v4197_v50  ;;  %3288 = vmatpush.msrb.mxu1 %v4198_v44 }
 0xa8a   :  { %3269 = vmatpush.msrb.mxu3 %v4199_v40  ;;  %3289 = vmatpush.msrb.mxu1 %v4200_v31 }
 0xa8c   :  { %3270 = vmatpush.msrb.mxu3 %v4201_v21  ;;  %3290 = vmatpush.msrb.mxu1 %v4202_v16 }
 0xa8e   :  { %3271 = vmatpush.msrb.mxu3 %v4203_v20  ;;  %3291 = vmatpush.msrb.mxu1 %v4204_v41 }
 0xb04   :  { %v1967_v44 = vpop.f32.mrf.mxu1 }
 0xb0a   :  { %v1947_v17 = vpop.f32.mrf.mxu3 }
 0xb0b   :  { %v1979_v0 = vrot.slane %v1947_v17, 1  ;;  %v1980_v60 = vrot.slane %v1947_v17, 2  ;;  %v1981_v51 = vrot.slane %v1947_v17, 3  ;;  %v1982_v59 = vrot.slane %v1947_v17, 4 }
 0xb0c   :  { %v1983_v36 = vrot.slane %v1947_v17, 5  ;;  %v1994_v48 = vadd.f32 %v5477_v19, %v1947_v17  ;;  %v1985_v5 = vrot.slane %v1947_v17, 7  ;;  %v1984_v54 = vrot.slane %v1947_v17, 6 }
 0xb0d   :  { %v1995_v12 = vadd.f32 %v1979_v0, %v5479_v3  ;;  %v1996_v28 = vadd.f32 %v1980_v60, %v5481_v33  ;;  %v1997_v57 = vadd.f32 %v1981_v51, %v5483_v46  ;;  %v1998_v43 = vadd.f32 %v1982_v59, %v5485_v45  ;;  %v5509_v0 = vld [vmem:[%s6902_s5] ss:$0 sm:$0xff] }
 0xb0e   :  { %v1999_v2 = vadd.f32 %v1983_v36, %v5488_v32  ;;  %v3752_v14 = vmul.f32 -1.442695, %v1994_v48  ;;  %v2001_v15 = vadd.f32 %v1985_v5, %v5495_v35  ;;  %v2000_v56 = vadd.f32 %v1984_v54, %v5497_v30 }
 0xb0f   :  { %v3753_v7 = vmul.f32 -1.442695, %v1995_v12  ;;  %v3754_v58 = vmul.f32 -1.442695, %v1996_v28  ;;  %v3756_v18 = vmul.f32 -1.442695, %v1998_v43  ;;  %v5512_v60 = vadd.f32 %v5509_v0, %v1967_v44 }
 0xb10   :  { %3996 = vpow2.f32 %v3752_v14  ;;  %v3757_v39 = vmul.f32 -1.442695, %v1999_v2  ;;  %v3755_v63 = vmul.f32 -1.442695, %v1997_v57  ;;  %v3759_v40 = vmul.f32 -1.442695, %v2001_v15 }
 0xb11   :  { %3998 = vpow2.f32 %v3754_v58  ;;  %v3758_v16 = vmul.f32 -1.442695, %v2000_v56 }
 0xb12   :  { %4000 = vpow2.f32 %v3753_v7 }
 0xb13   :  { %4002 = vpow2.f32 %v3757_v39 }
 0xb14   :  { %4004 = vpow2.f32 %v3756_v18 }
 0xb15   :  { %4006 = vpow2.f32 %v3755_v63 }
 0xb16   :  { %v3997_v37 = vpop.eup %3996 }
 0xb17   :  { %v3999_v50 = vpop.eup %3998  ;;  %v5501_v31 = vadd.f32 1.0, %v3997_v37 }
 0xb18   :  { %v4001_v21 = vpop.eup %4000  ;;  %v5503_v20 = vadd.f32 1.0, %v3999_v50 }
 0xb19   :  { %v4003_v41 = vpop.eup %4002  ;;  %4008 = vrcp.f32 %v5501_v31  ;;  %v5515_v59 = vadd.f32 1.0, %v4001_v21  ;;  %v2043_v48 = vand.u32 2147483647, %v5501_v31  ;;  %v2045_v28 = vand.u32 2147483648, %v5501_v31 }
 0xb1a   :  { %v4005_v17 = vpop.eup %4004  ;;  %4010 = vrcp.f32 %v5503_v20  ;;  %v5517_v36 = vadd.f32 1.0, %v4003_v41  ;;  %v2073_v57 = vand.u32 2147483647, %v5503_v20  ;;  %v2075_v43 = vand.u32 2147483648, %v5503_v20 }
 0xb1b   :  { %v4007_v51 = vpop.eup %4006  ;;  %4012 = vpow2.f32 %v3759_v40  ;;  %v5520_v12 = vadd.f32 1.0, %v4005_v17  ;;  %vm2039_vm14 = vweird.f32 %v5501_v31  ;;  %vm2069_vm15 = vweird.f32 %v5503_v20 }
 0xb1c   :  { %4014 = vpow2.f32 %v3758_v16  ;;  %v5529_v5 = vadd.f32 1.0, %v4007_v51  ;;  %v2060_v58 = vand.u32 2147483648, %v5515_v59  ;;  %vm5536_vm1 = vcmp.eq.f32.partialorder %v2043_v48, 8.507059e+37 }
 0xb1d   :  { %4016 = vrcp.f32 %v5515_v59  ;;  %v2058_v63 = vand.u32 2147483647, %v5515_v59  ;;  %v2120_v15 = vand.u32 2147483648, %v5517_v36  ;;  %v2046_v37 = vor.u32 1.1754944e-38, %v2045_v28 }
 0xb1e   :  { %4018 = vrcp.f32 %v5517_v36  ;;  %vm5543_vm2 = vcmp.eq.f32.partialorder %v2073_v57, 8.507059e+37  ;;  %v2076_v40 = vor.u32 1.1754944e-38, %v2075_v43  ;;  %vm2054_vm3 = vweird.f32 %v5515_v59 }
 0xb1f   :  { %v4009_v7 = vpop.eup %4008  ;;  %4020 = vrcp.f32 %v5520_v12  ;;  %v2118_v41 = vand.u32 2147483647, %v5517_v36  ;;  %v2061_v48 = vor.u32 1.1754944e-38, %v2060_v58  ;;  %vm2114_vm7 = vweird.f32 %v5517_v36 }
 0xb20   :  { %v4011_v54 = vpop.eup %4010  ;;  %v2035_v18 = vmul.f32 %v4009_v7, %v5501_v31  ;;  %4022 = vrcp.f32 %v5529_v5  ;;  %vm2040_vm4 = vweird.f32 %v4009_v7  ;;  %vm5552_vm11 = vcmp.eq.f32.partialorder %v2058_v63, 8.507059e+37 }
 0xb21   :  { %v4013_v56 = vpop.eup %4012  ;;  %v2065_v50 = vmul.f32 %v4011_v54, %v5503_v20  ;;  %vm2070_vm9 = vweird.f32 %v4011_v54  ;;  %vm2099_vm0 = vweird.f32 %v5520_v12  ;;  %v2103_v58 = vand.u32 2147483647, %v5520_v12  ;;  %vm2041_vm8 = vmor %vm2039_vm14, %vm2040_vm4 }
 0xb22   :  { %v4015_v21 = vpop.eup %4014  ;;  %v2036_v16 = vsub.f32 1.0, %v2035_v18  ;;  %v2121_v18 = vor.u32 1.1754944e-38, %v2120_v15  ;;  %vm5560_vm5 = vcmp.eq.f32.partialorder %v2118_v41, 8.507059e+37  ;;  %vm2071_vm13 = vmor %vm2069_vm15, %vm2070_vm9  ;;  %v2090_v39 = vand.u32 2147483648, %v5529_v5 }
 0xb23   :  { %v4017_v17 = vpop.eup %4016  ;;  %v2066_v51 = vsub.f32 1.0, %v2065_v50  ;;  %v2105_v50 = vand.u32 2147483648, %v5520_v12  ;;  %vm2084_vm4 = vweird.f32 %v5529_v5 }
 0xb24   :  { %v4019_v28 = vpop.eup %4018  ;;  %v2037_v57 = vmul.f32 %v4009_v7, %v2036_v16  ;;  %v2050_v14 = vmul.f32 %v4017_v17, %v5515_v59  ;;  %vm2055_vm6 = vweird.f32 %v4017_v17 }
 0xb25   :  { %v4021_v2 = vpop.eup %4020  ;;  %v2067_v53 = vmul.f32 %v4011_v54, %v2066_v51  ;;  %v2110_v47 = vmul.f32 %v4019_v28, %v5517_v36  ;;  %vm2115_vm10 = vweird.f32 %v4019_v28  ;;  %vm2056_vm14 = vmor %vm2054_vm3, %vm2055_vm6  ;;  %v7031_v36 = vrot.slane %v5512_v60, 1 }
 0xb26   :  { %v2038_v26 = vadd.f32 %v4009_v7, %v2037_v57  ;;  %v2051_v16 = vsub.f32 1.0, %v2050_v14  ;;  %v2095_v63 = vmul.f32 %v4021_v2, %v5520_v12  ;;  %vm2100_vm12 = vweird.f32 %v4021_v2  ;;  %v4023_v38 = vpop.eup %4022  ;;  %vm2116_vm15 = vmor %vm2114_vm7, %vm2115_vm10 }
 0xb27   :  { %v2068_v15 = vadd.f32 %v4011_v54, %v2067_v53  ;;  %v2111_v51 = vsub.f32 1.0, %v2110_v47  ;;  %v5571_v57 = vadd.f32 1.0, %v4013_v56  ;;  %v2080_v47 = vmul.f32 %v4023_v38, %v5529_v5 }
 0xb28   :  { %v2042_v52 = vsel %vm2041_vm8, %v4009_v7, %v2038_v26  ;;  %v2052_v14 = vmul.f32 %v4017_v17, %v2051_v16  ;;  %v2096_v41 = vsub.f32 1.0, %v2095_v63  ;;  %v7030_v56 = vrot.slane %v5512_v60, 2 }
 0xb29   :  { %v5575_v11 = vsel %vm5536_vm1, %v2046_v37, %v2042_v52  ;;  %v2072_v31 = vsel %vm2071_vm13, %v4011_v54, %v2068_v15  ;;  %v2112_v6 = vmul.f32 %v4019_v28, %v2111_v51  ;;  %v2081_v54 = vsub.f32 1.0, %v2080_v47  ;;  %vm2101_vm1 = vmor %vm2099_vm0, %vm2100_vm12 }
 0xb2a   :  { %v2170_v53 = vmul.f32 %v5575_v11, %v5512_v60  ;;  %v5582_v26 = vsel %vm5543_vm2, %v2076_v40, %v2072_v31  ;;  %v2053_v20 = vadd.f32 %v4017_v17, %v2052_v14  ;;  %v2097_v7 = vmul.f32 %v4021_v2, %v2096_v41 }
 0xb2b   :  { %v2172_v16 = vmul.f32 %v7030_v56, %v5582_v26  ;;  %v2113_v52 = vadd.f32 %v4019_v28, %v2112_v6  ;;  %4024 = vrcp.f32 %v5571_v57  ;;  %v2032_v40 = vadd.f32 1.0, %v4015_v21 }
 0xb2c   :  { %2186 = vrot.lane.b32.xlu1 %v2170_v53, %s4208_s14  ;;  %v2057_v37 = vsel %vm2056_vm14, %v4017_v17, %v2053_v20  ;;  %v2098_v44 = vadd.f32 %v4021_v2, %v2097_v7  ;;  %v2082_v17 = vmul.f32 %v4023_v38, %v2081_v54  ;;  %vm2085_vm2 = vweird.f32 %v4023_v38 }
 0xb2d   :  { %2190 = vrot.lane.b32.xlu0 %v2172_v16, %s4208_s14  ;;  %v5599_v59 = vsel %vm5552_vm11, %v2061_v48, %v2057_v37  ;;  %v2117_v6 = vsel %vm2116_vm15, %v4019_v28, %v2113_v52  ;;  %v2106_v51 = vor.u32 1.1754944e-38, %v2105_v50  ;;  %v2088_v21 = vand.u32 2147483647, %v5529_v5  ;;  %vm2086_vm7 = vmor %vm2084_vm4, %vm2085_vm2 }
 0xb2e   :  { %v2171_v63 = vmul.f32 %v7031_v36, %v5599_v59  ;;  %v2102_v15 = vsel %vm2101_vm1, %v4021_v2, %v2098_v44  ;;  %v5610_v43 = vsel %vm5560_vm5, %v2121_v18, %v2117_v6  ;;  %vm2104_vm3 = vcmp.eq.f32.partialorder %v2103_v58, 8.507059e+37 }
 0xb2f   :  { %v2083_v48 = vadd.f32 %v4023_v38, %v2082_v17  ;;  %v2159_v12 = vrot.slane %v5512_v60, 5  ;;  %v5615_v28 = vsel %vm2104_vm3, %v2106_v51, %v2102_v15  ;;  %4026 = vrcp.f32 %v2032_v40 }
 0xb30   :  { %2188 = vrot.lane.b32.xlu2 %v2171_v63, %s4208_s14  ;;  %v2158_v2 = vrot.slane %v5512_v60, 4  ;;  %v2091_v14 = vor.u32 1.1754944e-38, %v2090_v39  ;;  %vm2089_vm9 = vcmp.eq.f32.partialorder %v2088_v21, 8.507059e+37  ;;  %v2157_v31 = vrot.slane %v5512_v60, 3 }
 0xb31   :  { %v2087_v50 = vsel %vm2086_vm7, %v4023_v38, %v2083_v48  ;;  %v4025_v41 = vpop.eup %4024  ;;  %v2175_v1 = vmul.f32 %v2159_v12, %v5610_v43  ;;  %v2148_v20 = vand.u32 2147483647, %v5571_v57  ;;  %v2150_v7 = vand.u32 2147483648, %v5571_v57 }
 0xb32   :  { %v2174_v18 = vmul.f32 %v2158_v2, %v5615_v28  ;;  %v5620_v58 = vsel %vm2089_vm9, %v2091_v14, %v2087_v50  ;;  %v2140_v5 = vmul.f32 %v4025_v41, %v5571_v57  ;;  %vm2145_vm11 = vweird.f32 %v4025_v41 }
 0xb33   :  { %v2173_v38 = vmul.f32 %v2157_v31, %v5620_v58  ;;  %vm2144_vm0 = vweird.f32 %v5571_v57  ;;  %vm2149_vm5 = vcmp.eq.f32.partialorder %v2148_v20, 8.507059e+37  ;;  %v2151_v39 = vor.u32 1.1754944e-38, %v2150_v7 }
 0xb34   :  { %2196 = vrot.lane.b32.xlu1 %v2175_v1, %s4208_s14  ;;  %v2141_v47 = vsub.f32 1.0, %v2140_v5  ;;  %vm2146_vm6 = vmor %vm2144_vm0, %vm2145_vm11  ;;  %v2161_v37 = vrot.slane %v5512_v60, 7  ;;  %v2135_v44 = vand.u32 2147483648, %v2032_v40  ;;  %v2133_v36 = vand.u32 2147483647, %v2032_v40 }
 0xb35   :  { %2194 = vrot.lane.b32.xlu0 %v2174_v18, %s4208_s14  ;;  %v4027_v53 = vpop.eup %4026  ;;  %vm2129_vm10 = vweird.f32 %v2032_v40  ;;  %v2160_v48 = vrot.slane %v5512_v60, 6  ;;  %vm7036_vm14 = vcmask 1041409   ;;  %vm7037_vm15 = vcmask 1042434  }
 0xb36   :  { %v2142_v56 = vmul.f32 %v4025_v41, %v2141_v47  ;;  %v2125_v16 = vmul.f32 %v4027_v53, %v2032_v40  ;;  %vm2130_vm8 = vweird.f32 %v4027_v53  ;;  %v2136_v21 = vor.u32 1.1754944e-38, %v2135_v44 }
 0xb37   :  { %vm2131_vm12 = vmor %vm2129_vm10, %vm2130_vm8  ;;  %vm2134_vm13 = vcmp.eq.f32.partialorder %v2133_v36, 8.507059e+37  ;;  %vm7039_vm1 = vcmask 1043459   ;;  %vm7042_vm2 = vcmask 1044484   ;;  %vm7043_vm3 = vcmask 1045509  }
 0xb38   :  { %2192 = vrot.lane.b32.xlu2 %v2173_v38, %s4208_s14  ;;  %v2143_v52 = vadd.f32 %v4025_v41, %v2142_v56  ;;  %v2126_v54 = vsub.f32 1.0, %v2125_v16  ;;  %vm7044_vm4 = vcmask 1046534   ;;  %vm7045_vm7 = vcmask 1047559  }
 0xb39   :  { %vm7046_vm9 = vcmask 261120  }
 0xb3a   :  { %v2147_v6 = vsel %vm2146_vm6, %v4025_v41, %v2143_v52  ;;  %v2127_v17 = vmul.f32 %v4027_v53, %v2126_v54  ;;  %vm7047_vm11 = vmmov %vm7046_vm9 }
 0xb3b   :  { %v5632_v63 = vsel %vm2149_vm5, %v2151_v39, %v2147_v6 }
 0xb3c   :  { %v2177_v15 = vmul.f32 %v2161_v37, %v5632_v63  ;;  %v2128_v51 = vadd.f32 %v4027_v53, %v2127_v17 }
 0xb3e   :  { %2200 = vrot.lane.b32.xlu0 %v2177_v15, %s4208_s14  ;;  %v2132_v57 = vsel %vm2131_vm12, %v4027_v53, %v2128_v51 }
 0xb3f   :  { %v5637_v12 = vsel %vm2134_vm13, %v2136_v21, %v2132_v57 }
 0xb40   :  { %v2176_v2 = vmul.f32 %v2160_v48, %v5637_v12 }
 0xb42   :  { %2198 = vrot.lane.b32.xlu2 %v2176_v2, %s4208_s14 }
 0xb8a   :  { %v2189_v50 = vpop.permute.xlu2 %2188 }
 0xb8b   :  { %v2211_v14 = vadd.f32 %v2189_v50, %v5479_v3 }
 0xb8d   :  { %4028 = vtanh.f32 %v2211_v14 }
 0xb92   :  { %v2193_v41 = vpop.permute.xlu2 %2192 }
 0xb93   :  { %v5642_v40 = vpop.eup %4028  ;;  %v2213_v1 = vadd.f32 %v2193_v41, %v5483_v46 }
 0xb94   :  { %v2227_v18 = vsub.f32 %v5416_v62, %v5642_v40 }
 0xb95   :  { %4030 = vtanh.f32 %v2213_v1 }
 0xb96   :  { %2244 = vrot.lane.b32.xlu1 %v2227_v18, %s4210_s15 }
 0xb9b   :  { %v5648_v60 = vpop.eup %4030 }
 0xb9c   :  { %v2229_v5 = vsub.f32 %v5422_v10, %v5648_v60  ;;  %v2199_v31 = vpop.permute.xlu2 %2198 }
 0xb9d   :  { %v2216_v3 = vadd.f32 %v2199_v31, %v5497_v30 }
 0xb9e   :  { %2248 = vrot.lane.b32.xlu1 %v2229_v5, %s4210_s15  ;;  %v2187_v47 = vpop.permute.xlu1 %2186 }
 0xb9f   :  { %v2210_v53 = vadd.f32 %v2187_v47, %v5477_v19  ;;  %v2191_v46 = vpop.permute.xlu0 %2190  ;;  %4032 = vtanh.f32 %v2216_v3 }
 0xba0   :  { %v2212_v38 = vadd.f32 %v2191_v46, %v5481_v33 }
 0xba1   :  { %4034 = vtanh.f32 %v2210_v53 }
 0xba2   :  { %4036 = vtanh.f32 %v2212_v38 }
 0xba5   :  { %v5656_v20 = vpop.eup %4032 }
 0xba6   :  { %v2197_v7 = vpop.permute.xlu1 %2196  ;;  %v2232_v16 = vsub.f32 %v5441_v22, %v5656_v20 }
 0xba7   :  { %v4035_v56 = vpop.eup %4034  ;;  %v2215_v30 = vadd.f32 %v2197_v7, %v5488_v32  ;;  %v2195_v52 = vpop.permute.xlu0 %2194 }
 0xba8   :  { %v4037_v54 = vpop.eup %4036  ;;  %v2214_v39 = vadd.f32 %v2195_v52, %v5485_v45  ;;  %v2226_v19 = vsub.f32 %v5424_v61, %v4035_v56  ;;  %2254 = vrot.lane.b32.xlu1 %v2232_v16, %s4210_s15 }
 0xba9   :  { %4038 = vtanh.f32 %v2215_v30  ;;  %v2228_v33 = vsub.f32 %v5419_v4, %v4037_v54 }
 0xbaa   :  { %4040 = vtanh.f32 %v2214_v39  ;;  %2242 = vrot.lane.b32.xlu0 %v2226_v19, %s4210_s15 }
 0xbab   :  { %2246 = vrot.lane.b32.xlu2 %v2228_v33, %s4210_s15 }
 0xbaf   :  { %v4039_v37 = vpop.eup %4038 }
 0xbb0   :  { %v4041_v44 = vpop.eup %4040  ;;  %v2231_v32 = vsub.f32 %v5435_v9, %v4039_v37  ;;  %v2201_v6 = vpop.permute.xlu0 %2200 }
 0xbb1   :  { %v2230_v17 = vsub.f32 %v5428_v24, %v4041_v44  ;;  %v2217_v45 = vadd.f32 %v2201_v6, %v5495_v35 }
 0xbb2   :  { %2252 = vrot.lane.b32.xlu0 %v2231_v32, %s4210_s15 }
 0xbb3   :  { %2250 = vrot.lane.b32.xlu2 %v2230_v17, %s4210_s15  ;;  %4042 = vtanh.f32 %v2217_v45 }
 0xbb9   :  { %v4043_v36 = vpop.eup %4042 }
 0xbba   :  { %v2233_v15 = vsub.f32 %v5438_v25, %v4043_v36 }
 0xbbc   :  { %2256 = vrot.lane.b32.xlu2 %v2233_v15, %s4210_s15 }
 0xc05   :  { %v2247_v51 = vpop.permute.xlu2 %2246 }
 0xc06   :  { %v2268_v21 = vmul.f32 %v2247_v51, %v5582_v26 }
 0xc08   :  { %v2245_v57 = vpop.permute.xlu1 %2244  ;;  %2286 = vrot.lane.b32.xlu1 %v2268_v21, %s4209_s1 }
 0xc09   :  { %v2267_v48 = vmul.f32 %v2245_v57, %v5599_v59  ;;  %v5727_v57 = vld [vmem:[#allocation3 + $0x5] sm:$0x1] }
 0xc0b   :  { %2284 = vrot.lane.b32.xlu0 %v2267_v48, %s4209_s1  ;;  %v5729_v48 = vld [vmem:[#allocation3 + $0xd] sm:$0x1] }
 0xc0d   :  { %v2251_v35 = vpop.permute.xlu2 %2250 }
 0xc0e   :  { %v2270_v2 = vmul.f32 %v2251_v35, %v5615_v28  ;;  %v5731_v35 = vld [vmem:[#allocation3 + $0x15] sm:$0x1] }
 0xc10   :  { %v2249_v50 = vpop.permute.xlu1 %2248  ;;  %2290 = vrot.lane.b32.xlu1 %v2270_v2, %s4209_s1 }
 0xc11   :  { %v2269_v14 = vmul.f32 %v2249_v50, %v5620_v58 }
 0xc13   :  { %2288 = vrot.lane.b32.xlu0 %v2269_v14, %s4209_s1 }
 0xc16   :  { %v2257_v41 = vpop.permute.xlu2 %2256 }
 0xc17   :  { %v2273_v26 = vmul.f32 %v2257_v41, %v5632_v63 }
 0xc19   :  { %2296 = vrot.lane.b32.xlu1 %v2273_v26, %s4209_s1  ;;  %v5733_v26 = vld [vmem:[#allocation3 + $0x1d] sm:$0x1] }
 0xc1a   :  { %v2255_v1 = vpop.permute.xlu1 %2254 }
 0xc1b   :  { %v2272_v59 = vmul.f32 %v2255_v1, %v5637_v12  ;;  %v5735_v1 = vld [vmem:[#allocation3 + $0x25] sm:$0x1] }
 0xc1c   :  { %v2243_v18 = vpop.permute.xlu0 %2242 }
 0xc1d   :  { %v2266_v5 = vmul.f32 %v2243_v18, %v5575_v11  ;;  %2294 = vrot.lane.b32.xlu0 %v2272_v59, %s4209_s1 }
 0xc1f   :  { %2282 = vrot.lane.b32.xlu2 %v2266_v5, %s4209_s1  ;;  %v5738_v5 = vld [vmem:[#allocation3 + $0x2d] sm:$0x1] }
 0xc24   :  { %v2253_v28 = vpop.permute.xlu0 %2252 }
 0xc25   :  { %v2271_v58 = vmul.f32 %v2253_v28, %v5610_v43 }
 0xc27   :  { %2292 = vrot.lane.b32.xlu2 %v2271_v58, %s4209_s1 }
 0xc79   :  { %v2283_v63 = vpop.permute.xlu2 %2282 }
 0xc7a   :  { %v2287_v31 = vpop.permute.xlu1 %2286  ;;  %v5699_v7 = vadd.f32 %v4035_v56, %v2283_v63 }
 0xc7b   :  { %v5693_v12 = vadd.f32 %v4037_v54, %v2287_v31 }
 0xc7d   :  { %v2285_v3 = vpop.permute.xlu0 %2284  ;;  %7033 = vst [vmem:[#allocation27_spill] sm:$0xff] %v5693_v12  ;;  %v2356_v43 = vrot.slane %v5693_v12, 6 }
 0xc7e   :  { %v5691_v47 = vadd.f32 %v5642_v40, %v2285_v3 }
 0xc80   :  { %7032 = vst [vmem:[#allocation26_spill] sm:$0xff] %v5691_v47  ;;  %v2354_v11 = vrot.slane %v5691_v47, 7 }
 0xc81   :  { %v2293_v52 = vpop.permute.xlu2 %2292 }
 0xc82   :  { %v2291_v53 = vpop.permute.xlu1 %2290  ;;  %v2355_v30 = vsel %vm7036_vm14, %v2354_v11, %v5699_v7  ;;  %v5709_v33 = vadd.f32 %v4039_v37, %v2293_v52 }
 0xc83   :  { %v5702_v16 = vadd.f32 %v4041_v44, %v2291_v53  ;;  %v2357_v39 = vsel %vm7037_vm15, %v2356_v43, %v2355_v30 }
 0xc84   :  { %7038 = vst [vmem:[#allocation30_spill] sm:$0xff] %v5709_v33  ;;  %v2362_v17 = vrot.slane %v5709_v33, 3 }
 0xc85   :  { %v2289_v46 = vpop.permute.xlu0 %2288  ;;  %7035 = vst [vmem:[#allocation29_spill] sm:$0xff] %v5702_v16  ;;  %v2360_v19 = vrot.slane %v5702_v16, 4 }
 0xc86   :  { %v5697_v38 = vadd.f32 %v5648_v60, %v2289_v46 }
 0xc88   :  { %7034 = vst [vmem:[#allocation28_spill] sm:$0xff] %v5697_v38  ;;  %v2358_v40 = vrot.slane %v5697_v38, 5 }
 0xc8a   :  { %v2359_v60 = vsel %vm7039_vm1, %v2358_v40, %v2357_v39  ;;  %v5745_v39 = vld [vmem:[#allocation3 + $0x3d] sm:$0x1] }
 0xc8b   :  { %v2297_v54 = vpop.permute.xlu1 %2296  ;;  %v2361_v6 = vsel %vm7042_vm2, %v2360_v19, %v2359_v60  ;;  %v5747_v19 = vld [vmem:[#allocation3 + $0x35] sm:$0x1] }
 0xc8c   :  { %v5712_v56 = vadd.f32 %v4043_v36, %v2297_v54  ;;  %v2363_v51 = vsel %vm7043_vm3, %v2362_v17, %v2361_v6 }
 0xc8e   :  { %7040 = vst [vmem:[#allocation31_spill] sm:$0xff] %v5712_v56  ;;  %v2366_v45 = vrot.slane %v5712_v56, 1 }
 0xc8f   :  { %v2295_v32 = vpop.permute.xlu0 %2294 }
 0xc90   :  { %v5715_v44 = vadd.f32 %v5656_v20, %v2295_v32 }
 0xc92   :  { %7041 = vst [vmem:[#allocation32_spill] sm:$0xff] %v5715_v44  ;;  %v2364_v15 = vrot.slane %v5715_v44, 2 }
 0xc94   :  { %v2365_v37 = vsel %vm7044_vm4, %v2364_v15, %v2363_v51 }
 0xc95   :  { %v2367_v21 = vsel %vm7045_vm7, %v2366_v45, %v2365_v37 }
 0xc96   :  { %2368 = vrot.lane.b32.xlu2 %v2367_v21, %s4208_s14 }
 0xcf0   :  { %v2369_v36 = vpop.permute.xlu2 %2368 }
 0xcf1   :  { %3760 = vmatmul.msk.f32.vlgmr.msra.gmra.mxu2 %vm7046_vm9, %v2369_v36  ;;  %3761 = vmatmul.msk.f32.vlgmr.msra.gmra.mxu3 %vm7047_vm11, %v2369_v36 }
 0xd74   :  { %v2389_v20 = vpop.f32.mrf.mxu2  ;;  %v2409_v15 = vpop.f32.mrf.mxu3 }
 0xd75   :  { %v2421_v2 = vrot.slane %v2389_v20, 1  ;;  %v2422_v50 = vrot.slane %v2389_v20, 2  ;;  %v2423_v14 = vrot.slane %v2389_v20, 3  ;;  %v2424_v41 = vrot.slane %v2389_v20, 4 }
 0xd76   :  { %v2425_v59 = vrot.slane %v2389_v20, 5  ;;  %v2436_v18 = vadd.f32 %v5727_v57, %v2389_v20  ;;  %v2427_v46 = vrot.slane %v2389_v20, 7  ;;  %v2426_v30 = vrot.slane %v2389_v20, 6 }
 0xd77   :  { %v2437_v28 = vadd.f32 %v2421_v2, %v5729_v48  ;;  %v2438_v58 = vadd.f32 %v2422_v50, %v5731_v35  ;;  %v2439_v31 = vadd.f32 %v2423_v14, %v5733_v26  ;;  %v2440_v3 = vadd.f32 %v2424_v41, %v5735_v1 }
 0xd78   :  { %v2441_v63 = vadd.f32 %v2425_v59, %v5738_v5  ;;  %v3762_v53 = vmul.f32 -1.442695, %v2436_v18  ;;  %v2443_v60 = vadd.f32 %v2427_v46, %v5745_v39  ;;  %v2442_v32 = vadd.f32 %v2426_v30, %v5747_v19 }
 0xd79   :  { %v3763_v11 = vmul.f32 -1.442695, %v2437_v28  ;;  %v3764_v43 = vmul.f32 -1.442695, %v2438_v58  ;;  %v3766_v40 = vmul.f32 -1.442695, %v2440_v3  ;;  %v5757_v50 = vadd.f32 %v5509_v0, %v2409_v15 }
 0xd7a   :  { %4044 = vpow2.f32 %v3762_v53  ;;  %v3767_v52 = vmul.f32 -1.442695, %v2441_v63  ;;  %v3765_v54 = vmul.f32 -1.442695, %v2439_v31  ;;  %v3769_v45 = vmul.f32 -1.442695, %v2443_v60 }
 0xd7b   :  { %4046 = vpow2.f32 %v3764_v43  ;;  %v3768_v21 = vmul.f32 -1.442695, %v2442_v32 }
 0xd7c   :  { %4048 = vpow2.f32 %v3763_v11 }
 0xd7d   :  { %4050 = vpow2.f32 %v3767_v52 }
 0xd7e   :  { %4052 = vpow2.f32 %v3766_v40 }
 0xd7f   :  { %4054 = vpow2.f32 %v3765_v54 }
 0xd80   :  { %v4045_v6 = vpop.eup %4044 }
 0xd81   :  { %v4047_v17 = vpop.eup %4046  ;;  %v5751_v51 = vadd.f32 1.0, %v4045_v6 }
 0xd82   :  { %v4049_v37 = vpop.eup %4048  ;;  %v5753_v36 = vadd.f32 1.0, %v4047_v17 }
 0xd83   :  { %v4051_v20 = vpop.eup %4050  ;;  %4056 = vrcp.f32 %v5751_v51  ;;  %v5760_v41 = vadd.f32 1.0, %v4049_v37  ;;  %v2485_v18 = vand.u32 2147483647, %v5751_v51  ;;  %v2487_v58 = vand.u32 2147483648, %v5751_v51 }
 0xd84   :  { %v4053_v2 = vpop.eup %4052  ;;  %4058 = vrcp.f32 %v5753_v36  ;;  %v5762_v59 = vadd.f32 1.0, %v4051_v20  ;;  %v2515_v31 = vand.u32 2147483647, %v5753_v36  ;;  %v2517_v0 = vand.u32 2147483648, %v5753_v36 }
 0xd85   :  { %v4055_v14 = vpop.eup %4054  ;;  %4060 = vpow2.f32 %v3769_v45  ;;  %v5765_v28 = vadd.f32 1.0, %v4053_v2  ;;  %vm2481_vm0 = vweird.f32 %v5751_v51  ;;  %vm2511_vm6 = vweird.f32 %v5753_v36 }
 0xd86   :  { %4062 = vpow2.f32 %v3768_v21  ;;  %v5774_v53 = vadd.f32 1.0, %v4055_v14  ;;  %v2502_v11 = vand.u32 2147483648, %v5760_v41  ;;  %vm5781_vm5 = vcmp.eq.f32.partialorder %v2485_v18, 8.507059e+37 }
 0xd87   :  { %4064 = vrcp.f32 %v5760_v41  ;;  %v2500_v52 = vand.u32 2147483647, %v5760_v41  ;;  %v2562_v54 = vand.u32 2147483648, %v5762_v59  ;;  %v2488_v32 = vor.u32 1.1754944e-38, %v2487_v58 }
 0xd88   :  { %4066 = vrcp.f32 %v5762_v59  ;;  %vm5788_vm8 = vcmp.eq.f32.partialorder %v2515_v31, 8.507059e+37  ;;  %v2518_v45 = vor.u32 1.1754944e-38, %v2517_v0  ;;  %vm2496_vm10 = vweird.f32 %v5760_v41 }
 0xd89   :  { %v4057_v46 = vpop.eup %4056  ;;  %4068 = vrcp.f32 %v5765_v28  ;;  %v2560_v21 = vand.u32 2147483647, %v5762_v59  ;;  %v2503_v14 = vor.u32 1.1754944e-38, %v2502_v11  ;;  %vm2556_vm13 = vweird.f32 %v5762_v59 }
 0xd8a   :  { %v4059_v43 = vpop.eup %4058  ;;  %v2477_v30 = vmul.f32 %v4057_v46, %v5751_v51  ;;  %4070 = vrcp.f32 %v5774_v53  ;;  %vm2482_vm12 = vweird.f32 %v4057_v46  ;;  %vm5797_vm15 = vcmp.eq.f32.partialorder %v2500_v52, 8.507059e+37 }
 0xd8b   :  { %v4061_v60 = vpop.eup %4060  ;;  %v2507_v6 = vmul.f32 %v4059_v43, %v5753_v36  ;;  %vm2512_vm14 = vweird.f32 %v4059_v43  ;;  %vm2541_vm1 = vweird.f32 %v5765_v28  ;;  %v2545_v11 = vand.u32 2147483647, %v5765_v28  ;;  %vm2483_vm4 = vmor %vm2481_vm0, %vm2482_vm12 }
 0xd8c   :  { %v4063_v15 = vpop.eup %4062  ;;  %v2478_v37 = vsub.f32 1.0, %v2477_v30  ;;  %v2563_v30 = vor.u32 1.1754944e-38, %v2562_v54  ;;  %vm5805_vm3 = vcmp.eq.f32.partialorder %v2560_v21, 8.507059e+37  ;;  %vm2513_vm11 = vmor %vm2511_vm6, %vm2512_vm14  ;;  %v2532_v40 = vand.u32 2147483648, %v5774_v53 }
 0xd8d   :  { %v4065_v20 = vpop.eup %4064  ;;  %v2508_v2 = vsub.f32 1.0, %v2507_v6  ;;  %v2547_v6 = vand.u32 2147483648, %v5765_v28  ;;  %vm2526_vm12 = vweird.f32 %v5774_v53 }
 0xd8e   :  { %v4067_v18 = vpop.eup %4066  ;;  %v2479_v58 = vmul.f32 %v4057_v46, %v2478_v37  ;;  %v2492_v31 = vmul.f32 %v4065_v20, %v5760_v41  ;;  %vm2497_vm2 = vweird.f32 %v4065_v20 }
 0xd8f   :  { %v4069_v63 = vpop.eup %4068  ;;  %v2509_v3 = vmul.f32 %v4059_v43, %v2508_v2  ;;  %v2552_v25 = vmul.f32 %v4067_v18, %v5762_v59  ;;  %vm2557_vm7 = vweird.f32 %v4067_v18  ;;  %vm2498_vm0 = vmor %vm2496_vm10, %vm2497_vm2  ;;  %v7057_v59 = vrot.slane %v5757_v50, 1 }
 0xd90   :  { %v2480_v22 = vadd.f32 %v4057_v46, %v2479_v58  ;;  %v2493_v37 = vsub.f32 1.0, %v2492_v31  ;;  %v2537_v52 = vmul.f32 %v4069_v63, %v5765_v28  ;;  %vm2542_vm9 = vweird.f32 %v4069_v63  ;;  %v4071_v4 = vpop.eup %4070  ;;  %vm2558_vm6 = vmor %vm2556_vm13, %vm2557_vm7 }
 0xd91   :  { %v2510_v54 = vadd.f32 %v4059_v43, %v2509_v3  ;;  %v2553_v2 = vsub.f32 1.0, %v2552_v25  ;;  %v5816_v31 = vadd.f32 1.0, %v4061_v60  ;;  %v2522_v25 = vmul.f32 %v4071_v4, %v5774_v53 }
 0xd92   :  { %v2484_v10 = vsel %vm2483_vm4, %v4057_v46, %v2480_v22  ;;  %v2494_v21 = vmul.f32 %v4065_v20, %v2493_v37  ;;  %v2538_v58 = vsub.f32 1.0, %v2537_v52  ;;  %v7056_v60 = vrot.slane %v5757_v50, 2 }
 0xd93   :  { %v5820_v61 = vsel %vm5781_vm5, %v2488_v32, %v2484_v10  ;;  %v2514_v51 = vsel %vm2513_vm11, %v4059_v43, %v2510_v54  ;;  %v2554_v24 = vmul.f32 %v4067_v18, %v2553_v2  ;;  %v2523_v43 = vsub.f32 1.0, %v2522_v25  ;;  %vm2543_vm5 = vmor %vm2541_vm1, %vm2542_vm9 }
 0xd94   :  { %v2612_v3 = vmul.f32 %v5820_v61, %v5757_v50  ;;  %v5827_v22 = vsel %vm5788_vm8, %v2518_v45, %v2514_v51  ;;  %v2495_v36 = vadd.f32 %v4065_v20, %v2494_v21  ;;  %v2539_v46 = vmul.f32 %v4069_v63, %v2538_v58 }
 0xd95   :  { %v2614_v37 = vmul.f32 %v7056_v60, %v5827_v22  ;;  %v2555_v10 = vadd.f32 %v4067_v18, %v2554_v24  ;;  %4072 = vrcp.f32 %v5816_v31  ;;  %v2474_v45 = vadd.f32 1.0, %v4063_v15 }
 0xd96   :  { %2628 = vrot.lane.b32.xlu2 %v2612_v3, %s4208_s14  ;;  %v2499_v32 = vsel %vm2498_vm0, %v4065_v20, %v2495_v36  ;;  %v2540_v17 = vadd.f32 %v4069_v63, %v2539_v46  ;;  %v2524_v20 = vmul.f32 %v4071_v4, %v2523_v43  ;;  %vm2527_vm8 = vweird.f32 %v4071_v4 }
 0xd97   :  { %2632 = vrot.lane.b32.xlu1 %v2614_v37, %s4208_s14  ;;  %v5844_v41 = vsel %vm5797_vm15, %v2503_v14, %v2499_v32  ;;  %v2559_v24 = vsel %vm2558_vm6, %v4067_v18, %v2555_v10  ;;  %v2548_v2 = vor.u32 1.1754944e-38, %v2547_v6  ;;  %v2530_v15 = vand.u32 2147483647, %v5774_v53  ;;  %vm2528_vm13 = vmor %vm2526_vm12, %vm2527_vm8 }
 0xd98   :  { %v2613_v52 = vmul.f32 %v7057_v59, %v5844_v41  ;;  %v2544_v54 = vsel %vm2543_vm5, %v4069_v63, %v2540_v17  ;;  %v5855_v0 = vsel %vm5805_vm3, %v2563_v30, %v2559_v24  ;;  %vm2546_vm10 = vcmp.eq.f32.partialorder %v2545_v11, 8.507059e+37 }
 0xd99   :  { %v2525_v14 = vadd.f32 %v4071_v4, %v2524_v20  ;;  %v2601_v28 = vrot.slane %v5757_v50, 5  ;;  %v5860_v18 = vsel %vm2546_vm10, %v2548_v2, %v2544_v54  ;;  %4074 = vrcp.f32 %v2474_v45 }
 0xd9a   :  { %2630 = vrot.lane.b32.xlu0 %v2613_v52, %s4208_s14  ;;  %v2600_v63 = vrot.slane %v5757_v50, 4  ;;  %v2533_v21 = vor.u32 1.1754944e-38, %v2532_v40  ;;  %vm2531_vm14 = vcmp.eq.f32.partialorder %v2530_v15, 8.507059e+37  ;;  %v2599_v51 = vrot.slane %v5757_v50, 3 }
 0xd9b   :  { %v2529_v6 = vsel %vm2528_vm13, %v4071_v4, %v2525_v14  ;;  %v4073_v58 = vpop.eup %4072  ;;  %v2617_v9 = vmul.f32 %v2601_v28, %v5855_v0  ;;  %v2590_v36 = vand.u32 2147483647, %v5816_v31  ;;  %v2592_v46 = vand.u32 2147483648, %v5816_v31 }
 0xd9c   :  { %v2616_v30 = vmul.f32 %v2600_v63, %v5860_v18  ;;  %v5865_v11 = vsel %vm2531_vm14, %v2533_v21, %v2529_v6  ;;  %v2582_v53 = vmul.f32 %v4073_v58, %v5816_v31  ;;  %vm2587_vm15 = vweird.f32 %v4073_v58 }
 0xd9d   :  { %v2615_v4 = vmul.f32 %v2599_v51, %v5865_v11  ;;  %vm2586_vm1 = vweird.f32 %v5816_v31  ;;  %vm2591_vm3 = vcmp.eq.f32.partialorder %v2590_v36, 8.507059e+37  ;;  %v2593_v40 = vor.u32 1.1754944e-38, %v2592_v46 }
 0xd9e   :  { %2638 = vrot.lane.b32.xlu2 %v2617_v9, %s4208_s14  ;;  %v2583_v25 = vsub.f32 1.0, %v2582_v53  ;;  %vm2588_vm2 = vmor %vm2586_vm1, %vm2587_vm15  ;;  %v2603_v32 = vrot.slane %v5757_v50, 7  ;;  %v2577_v17 = vand.u32 2147483648, %v2474_v45  ;;  %v2575_v59 = vand.u32 2147483647, %v2474_v45 }
 0xd9f   :  { %2636 = vrot.lane.b32.xlu1 %v2616_v30, %s4208_s14  ;;  %v4075_v3 = vpop.eup %4074  ;;  %vm2571_vm7 = vweird.f32 %v2474_v45  ;;  %v2602_v14 = vrot.slane %v5757_v50, 6  ;;  %vm7058_vm0 = vcmask 1041409   ;;  %vm7059_vm6 = vcmask 1042434  }
 0xda0   :  { %v2584_v60 = vmul.f32 %v4073_v58, %v2583_v25  ;;  %v2567_v37 = vmul.f32 %v4075_v3, %v2474_v45  ;;  %vm2572_vm4 = vweird.f32 %v4075_v3  ;;  %v2578_v15 = vor.u32 1.1754944e-38, %v2577_v17 }
 0xda1   :  { %vm2573_vm9 = vmor %vm2571_vm7, %vm2572_vm4  ;;  %vm2576_vm11 = vcmp.eq.f32.partialorder %v2575_v59, 8.507059e+37  ;;  %vm7060_vm5 = vcmask 1043459   ;;  %vm7062_vm8 = vcmask 1044484   ;;  %vm7063_vm10 = vcmask 1045509  }
 0xda2   :  { %2634 = vrot.lane.b32.xlu0 %v2615_v4, %s4208_s14  ;;  %v2585_v10 = vadd.f32 %v4073_v58, %v2584_v60  ;;  %v2568_v43 = vsub.f32 1.0, %v2567_v37  ;;  %vm7064_vm12 = vcmask 1046534   ;;  %vm7065_vm13 = vcmask 1047559  }
 0xda3   :  { %vm7066_vm14 = vcmask 261120  }
 0xda4   :  { %v2589_v24 = vsel %vm2588_vm2, %v4073_v58, %v2585_v10  ;;  %v2569_v20 = vmul.f32 %v4075_v3, %v2568_v43  ;;  %vm7067_vm15 = vmmov %vm7066_vm14 }
 0xda5   :  { %v5877_v52 = vsel %vm2591_vm3, %v2593_v40, %v2589_v24 }
 0xda6   :  { %v2619_v54 = vmul.f32 %v2603_v32, %v5877_v52  ;;  %v2570_v2 = vadd.f32 %v4075_v3, %v2569_v20 }
 0xda8   :  { %2642 = vrot.lane.b32.xlu1 %v2619_v54, %s4208_s14  ;;  %v2574_v31 = vsel %vm2573_vm9, %v4075_v3, %v2570_v2 }
 0xda9   :  { %v5882_v28 = vsel %vm2576_vm11, %v2578_v15, %v2574_v31 }
 0xdaa   :  { %v2618_v63 = vmul.f32 %v2602_v14, %v5882_v28 }
 0xdac   :  { %2640 = vrot.lane.b32.xlu0 %v2618_v63, %s4208_s14 }
 0xdf0   :  { %v2629_v6 = vpop.permute.xlu2 %2628 }
 0xdf1   :  { %v2652_v21 = vadd.f32 %v2629_v6, %v5727_v57 }
 0xdf3   :  { %4076 = vtanh.f32 %v2652_v21 }
 0xdf8   :  { %v2639_v58 = vpop.permute.xlu2 %2638 }
 0xdf9   :  { %v5887_v45 = vpop.eup %4076  ;;  %v2657_v9 = vadd.f32 %v2639_v58, %v5738_v5 }
 0xdfa   :  { %v2668_v30 = vsub.f32 %v5699_v7, %v5887_v45 }
 0xdfb   :  { %4078 = vtanh.f32 %v2657_v9 }
 0xdfc   :  { %2684 = vrot.lane.b32.xlu1 %v2668_v30, %s4210_s15 }
 0xe01   :  { %v5893_v50 = vpop.eup %4078 }
 0xe02   :  { %v2673_v53 = vsub.f32 %v5709_v33, %v5893_v50 }
 0xe04   :  { %2694 = vrot.lane.b32.xlu1 %v2673_v53, %s4210_s15 }
 0xe09   :  { %v2633_v57 = vpop.permute.xlu1 %2632 }
 0xe0a   :  { %v2654_v51 = vadd.f32 %v2633_v57, %v5731_v35 }
 0xe0c   :  { %4080 = vtanh.f32 %v2654_v51  ;;  %v2631_v25 = vpop.permute.xlu0 %2630 }
 0xe0d   :  { %v2653_v5 = vadd.f32 %v2631_v25, %v5729_v48 }
 0xe0f   :  { %4082 = vtanh.f32 %v2653_v5 }
 0xe11   :  { %v2637_v3 = vpop.permute.xlu1 %2636 }
 0xe12   :  { %v4081_v4 = vpop.eup %4080  ;;  %v2656_v36 = vadd.f32 %v2637_v3, %v5735_v1 }
 0xe13   :  { %v2670_v46 = vsub.f32 %v5693_v12, %v4081_v4 }
 0xe14   :  { %4084 = vtanh.f32 %v2656_v36  ;;  %v2635_v60 = vpop.permute.xlu0 %2634 }
 0xe15   :  { %v4083_v37 = vpop.eup %4082  ;;  %v2655_v10 = vadd.f32 %v2635_v60, %v5733_v26  ;;  %2688 = vrot.lane.b32.xlu0 %v2670_v46, %s4210_s15 }
 0xe16   :  { %v2669_v35 = vsub.f32 %v5691_v47, %v4083_v37 }
 0xe17   :  { %4086 = vtanh.f32 %v2655_v10 }
 0xe18   :  { %2686 = vrot.lane.b32.xlu2 %v2669_v35, %s4210_s15 }
 0xe1a   :  { %v4085_v48 = vpop.eup %4084  ;;  %v2643_v43 = vpop.permute.xlu1 %2642 }
 0xe1b   :  { %v2672_v40 = vsub.f32 %v5702_v16, %v4085_v48  ;;  %v2659_v1 = vadd.f32 %v2643_v43, %v5745_v39 }
 0xe1d   :  { %v4087_v32 = vpop.eup %4086  ;;  %2692 = vrot.lane.b32.xlu0 %v2672_v40, %s4210_s15  ;;  %4088 = vtanh.f32 %v2659_v1 }
 0xe1e   :  { %v2671_v17 = vsub.f32 %v5697_v38, %v4087_v32  ;;  %v2641_v26 = vpop.permute.xlu0 %2640 }
 0xe1f   :  { %v2658_v24 = vadd.f32 %v2641_v26, %v5747_v19 }
 0xe20   :  { %2690 = vrot.lane.b32.xlu2 %v2671_v17, %s4210_s15 }
 0xe21   :  { %4090 = vtanh.f32 %v2658_v24 }
 0xe23   :  { %v4089_v20 = vpop.eup %4088 }
 0xe24   :  { %v2675_v59 = vsub.f32 %v5712_v56, %v4089_v20 }
 0xe26   :  { %2698 = vrot.lane.b32.xlu0 %v2675_v59, %s4210_s15 }
 0xe27   :  { %v4091_v54 = vpop.eup %4090 }
 0xe28   :  { %v2674_v39 = vsub.f32 %v5715_v44, %v4091_v54 }
 0xe2a   :  { %2696 = vrot.lane.b32.xlu2 %v2674_v39, %s4210_s15 }
 0xe6e   :  { %v2685_v2 = vpop.permute.xlu1 %2684 }
 0xe6f   :  { %v2708_v15 = vmul.f32 %v2685_v2, %v5820_v61 }
 0xe71   :  { %2724 = vrot.lane.b32.xlu0 %v2708_v15, %s4209_s1 }
 0xe72   :  { %v2687_v31 = vpop.permute.xlu2 %2686 }
 0xe73   :  { %v2709_v19 = vmul.f32 %v2687_v31, %v5844_v41  ;;  %v5968_v31 = vld [vmem:[#allocation3 + $0x6] sm:$0x1] }
 0xe75   :  { %2726 = vrot.lane.b32.xlu1 %v2709_v19, %s4209_s1  ;;  %v5970_v19 = vld [vmem:[#allocation3 + $0xe] sm:$0x1] }
 0xe76   :  { %v2695_v14 = vpop.permute.xlu1 %2694 }
 0xe77   :  { %v2713_v63 = vmul.f32 %v2695_v14, %v5855_v0 }
 0xe79   :  { %2734 = vrot.lane.b32.xlu0 %v2713_v63, %s4209_s1 }
 0xe7a   :  { %v2691_v6 = vpop.permute.xlu2 %2690 }
 0xe7b   :  { %v2711_v21 = vmul.f32 %v2691_v6, %v5865_v11 }
 0xe7d   :  { %2730 = vrot.lane.b32.xlu1 %v2711_v21, %s4209_s1  ;;  %v5972_v21 = vld [vmem:[#allocation3 + $0x16] sm:$0x1] }
 0xe84   :  { %v2697_v58 = vpop.permute.xlu2 %2696 }
 0xe85   :  { %v2714_v61 = vmul.f32 %v2697_v58, %v5882_v28  ;;  %v5974_v58 = vld [vmem:[#allocation3 + $0x26] sm:$0x1] }
 0xe87   :  { %v2689_v9 = vpop.permute.xlu0 %2688  ;;  %2736 = vrot.lane.b32.xlu1 %v2714_v61, %s4209_s1 }
 0xe88   :  { %v2710_v41 = vmul.f32 %v2689_v9, %v5827_v22 }
 0xe8a   :  { %2728 = vrot.lane.b32.xlu2 %v2710_v41, %s4209_s1 }
 0xe8f   :  { %v2693_v30 = vpop.permute.xlu0 %2692 }
 0xe90   :  { %v2712_v0 = vmul.f32 %v2693_v30, %v5860_v18  ;;  %v5977_v30 = vld [vmem:[#allocation3 + $0x2e] sm:$0x1] }
 0xe92   :  { %2732 = vrot.lane.b32.xlu2 %v2712_v0, %s4209_s1 }
 0xe98   :  { %v2699_v53 = vpop.permute.xlu0 %2698 }
 0xe99   :  { %v2715_v11 = vmul.f32 %v2699_v53, %v5877_v52 }
 0xe9b   :  { %2738 = vrot.lane.b32.xlu2 %v2715_v11, %s4209_s1 }
 0xee3   :  { %v2725_v28 = vpop.permute.xlu0 %2724 }
 0xee4   :  { %v2729_v57 = vpop.permute.xlu2 %2728  ;;  %v5940_v18 = vadd.f32 %v5887_v45, %v2725_v28 }
 0xee5   :  { %v5934_v3 = vadd.f32 %v4081_v4, %v2729_v57  ;;  %v5982_v57 = vld [vmem:[#allocation3 + $0x1e] sm:$0x1] }
 0xee7   :  { %v2727_v51 = vpop.permute.xlu1 %2726  ;;  %v2798_v52 = vrot.slane %v5934_v3, 6 }
 0xee8   :  { %v5932_v25 = vadd.f32 %v4083_v37, %v2727_v51 }
 0xeea   :  { %v2796_v36 = vrot.slane %v5932_v25, 7 }
 0xeeb   :  { %v2735_v35 = vpop.permute.xlu0 %2734 }
 0xeec   :  { %v2733_v5 = vpop.permute.xlu2 %2732  ;;  %v2797_v10 = vsel %vm7058_vm0, %v2796_v36, %v5940_v18  ;;  %v5951_v1 = vadd.f32 %v5893_v50, %v2735_v35  ;;  %v5986_v35 = vld [vmem:[#allocation3 + $0x3e] sm:$0x1] }
 0xeed   :  { %v5943_v60 = vadd.f32 %v4085_v48, %v2733_v5  ;;  %v2799_v43 = vsel %vm7059_vm6, %v2798_v52, %v2797_v10 }
 0xeee   :  { %v2804_v24 = vrot.slane %v5951_v1, 3 }
 0xeef   :  { %v2731_v22 = vpop.permute.xlu1 %2730  ;;  %v2802_v40 = vrot.slane %v5943_v60, 4 }
 0xef0   :  { %v5937_v46 = vadd.f32 %v4087_v32, %v2731_v22 }
 0xef2   :  { %v2800_v37 = vrot.slane %v5937_v46, 5 }
 0xef4   :  { %v2801_v45 = vsel %vm7060_vm5, %v2800_v37, %v2799_v43 }
 0xef5   :  { %v2739_v4 = vpop.permute.xlu2 %2738  ;;  %v2803_v17 = vsel %vm7062_vm8, %v2802_v40, %v2801_v45  ;;  %v5989_v45 = vld [vmem:[#allocation3 + $0x36] sm:$0x1] }
 0xef6   :  { %v5954_v32 = vadd.f32 %v4089_v20, %v2739_v4  ;;  %v2805_v2 = vsel %vm7063_vm10, %v2804_v24, %v2803_v17 }
 0xef8   :  { %7061 = vst [vmem:[#allocation33_spill] sm:$0xff] %v5954_v32  ;;  %v2808_v59 = vrot.slane %v5954_v32, 1 }
 0xef9   :  { %v2737_v48 = vpop.permute.xlu1 %2736 }
 0xefa   :  { %v5957_v26 = vadd.f32 %v4091_v54, %v2737_v48 }
 0xefc   :  { %v2806_v39 = vrot.slane %v5957_v26, 2 }
 0xefe   :  { %v2807_v50 = vsel %vm7064_vm12, %v2806_v39, %v2805_v2 }
 0xeff   :  { %v2809_v15 = vsel %vm7065_vm13, %v2808_v59, %v2807_v50 }
 0xf00   :  { %2810 = vrot.lane.b32.xlu0 %v2809_v15, %s4208_s14 }
 0xf72   :  { %v2811_v20 = vpop.permute.xlu0 %2810 }
 0xf73   :  { %3770 = vmatmul.msk.f32.vlgmr.msra.gmra.mxu1 %vm7066_vm14, %v2811_v20  ;;  %3771 = vmatmul.msk.f32.vlgmr.msrb.gmra.mxu2 %vm7067_vm15, %v2811_v20 }
 0xff0   :  { %v2831_v54 = vpop.f32.mrf.mxu1 }
 0xff1   :  { %v2863_v14 = vrot.slane %v2831_v54, 1  ;;  %v2864_v63 = vrot.slane %v2831_v54, 2  ;;  %v2866_v6 = vrot.slane %v2831_v54, 4  ;;  %v2865_v61 = vrot.slane %v2831_v54, 3 }
 0xff2   :  { %v2867_v9 = vrot.slane %v2831_v54, 5  ;;  %v2878_v41 = vadd.f32 %v5968_v31, %v2831_v54  ;;  %v2869_v5 = vrot.slane %v2831_v54, 7  ;;  %v2868_v4 = vrot.slane %v2831_v54, 6 }
 0xff3   :  { %v2879_v0 = vadd.f32 %v2863_v14, %v5970_v19  ;;  %v2880_v53 = vadd.f32 %v2864_v63, %v5972_v21  ;;  %v2882_v11 = vadd.f32 %v2866_v6, %v5974_v58  ;;  %v2881_v52 = vadd.f32 %v2865_v61, %v5982_v57  ;;  %v6003_v6 = vld [vmem:[%s6902_s5] ss:$0 sm:$0xff] }
 0xff4   :  { %v2883_v51 = vadd.f32 %v2867_v9, %v5977_v30  ;;  %v3772_v28 = vmul.f32 -1.442695, %v2878_v41  ;;  %v2885_v43 = vadd.f32 %v2869_v5, %v5986_v35  ;;  %v2884_v17 = vadd.f32 %v2868_v4, %v5989_v45 }
 0xff5   :  { %v3773_v22 = vmul.f32 -1.442695, %v2879_v0  ;;  %v3774_v36 = vmul.f32 -1.442695, %v2880_v53  ;;  %v3776_v10 = vmul.f32 -1.442695, %v2882_v11 }
 0xff6   :  { %4092 = vpow2.f32 %v3772_v28  ;;  %v3777_v37 = vmul.f32 -1.442695, %v2883_v51  ;;  %v3775_v40 = vmul.f32 -1.442695, %v2881_v52  ;;  %v3779_v59 = vmul.f32 -1.442695, %v2885_v43  ;;  %v2851_v50 = vpop.f32.mrf.mxu2 }
 0xff7   :  { %4094 = vpow2.f32 %v3773_v22  ;;  %v3778_v54 = vmul.f32 -1.442695, %v2884_v17  ;;  %v6006_v61 = vadd.f32 %v6003_v6, %v2851_v50 }
 0xff8   :  { %4096 = vpow2.f32 %v3774_v36 }
 0xff9   :  { %4098 = vpow2.f32 %v3776_v10  ;;  %v3039_v10 = vrot.slane %v6006_v61, 1 }
 0xffa   :  { %4100 = vpow2.f32 %v3777_v37 }
 0xffb   :  { %4102 = vpow2.f32 %v3775_v40 }
 0xffc   :  { %v4093_v48 = vpop.eup %4092 }
 0xffd   :  { %v4095_v24 = vpop.eup %4094  ;;  %v5992_v39 = vadd.f32 1.0, %v4093_v48 }
 0xffe   :  { %v4097_v2 = vpop.eup %4096  ;;  %v5994_v15 = vadd.f32 1.0, %v4095_v24 }
 0xfff   :  { %4104 = vrcp.f32 %v5992_v39  ;;  %v4099_v20 = vpop.eup %4098  ;;  %v5997_v14 = vadd.f32 1.0, %v4097_v2  ;;  %v2927_v41 = vand.u32 2147483647, %v5992_v39  ;;  %v2929_v0 = vand.u32 2147483648, %v5992_v39 }
0x1000   :  { %4106 = vrcp.f32 %v5994_v15  ;;  %v4101_v63 = vpop.eup %4100  ;;  %v6008_v9 = vadd.f32 1.0, %v4099_v20  ;;  %v2942_v53 = vand.u32 2147483647, %v5994_v15  ;;  %v2944_v5 = vand.u32 2147483648, %v5994_v15 }
0x1001   :  { %4108 = vpow2.f32 %v3779_v59  ;;  %v6014_v11 = vadd.f32 1.0, %v4101_v63  ;;  %v4103_v51 = vpop.eup %4102  ;;  %v2959_v28 = vand.u32 2147483648, %v5997_v14  ;;  %v2957_v36 = vand.u32 2147483647, %v5997_v14 }
0x1002   :  { %4110 = vrcp.f32 %v5997_v14  ;;  %vm2923_vm1 = vweird.f32 %v5992_v39  ;;  %vm6025_vm2 = vcmp.eq.f32.partialorder %v2927_v41, 8.507059e+37  ;;  %vm2938_vm3 = vweird.f32 %v5994_v15 }
0x1003   :  { %4112 = vrcp.f32 %v6008_v9  ;;  %v2930_v48 = vor.u32 1.1754944e-38, %v2929_v0  ;;  %vm2953_vm4 = vweird.f32 %v5997_v14  ;;  %vm6032_vm7 = vcmp.eq.f32.partialorder %v2942_v53, 8.507059e+37 }
0x1004   :  { %4114 = vpow2.f32 %v3778_v54  ;;  %v2960_v50 = vor.u32 1.1754944e-38, %v2959_v28  ;;  %v2945_v20 = vor.u32 1.1754944e-38, %v2944_v5  ;;  %v6036_v54 = vadd.f32 1.0, %v4103_v51 }
0x1005   :  { %v4105_v22 = vpop.eup %4104  ;;  %4116 = vrcp.f32 %v6014_v11  ;;  %vm6041_vm11 = vcmp.eq.f32.partialorder %v2957_v36, 8.507059e+37  ;;  %vm2998_vm0 = vweird.f32 %v6014_v11  ;;  %v3002_v16 = vand.u32 2147483647, %v6014_v11 }
0x1006   :  { %v4107_v37 = vpop.eup %4106  ;;  %v2919_v4 = vmul.f32 %v4105_v22, %v5992_v39  ;;  %vm2924_vm9 = vweird.f32 %v4105_v22  ;;  %4118 = vrcp.f32 %v6036_v54  ;;  %vm2983_vm5 = vweird.f32 %v6008_v9 }
0x1007   :  { %v4109_v40 = vpop.eup %4108  ;;  %v2934_v17 = vmul.f32 %v4107_v37, %v5994_v15  ;;  %vm2939_vm6 = vweird.f32 %v4107_v37  ;;  %v3004_v53 = vand.u32 2147483648, %v6014_v11  ;;  %vm2925_vm8 = vmor %vm2923_vm1, %vm2924_vm9  ;;  %vm3003_vm1 = vcmp.eq.f32.partialorder %v3002_v16, 8.507059e+37 }
0x1008   :  { %v4111_v59 = vpop.eup %4110  ;;  %v2920_v2 = vsub.f32 1.0, %v2919_v4  ;;  %v6050_v28 = vadd.f32 1.0, %v4109_v40  ;;  %vm2940_vm12 = vmor %vm2938_vm3, %vm2939_vm6  ;;  %vm2968_vm9 = vweird.f32 %v6036_v54 }
0x1009   :  { %v6038_v63 = vpop.eup %4112  ;;  %v2949_v41 = vmul.f32 %v4111_v59, %v5997_v14  ;;  %v2935_v52 = vsub.f32 1.0, %v2934_v17  ;;  %vm2954_vm10 = vweird.f32 %v4111_v59 }
0x100a   :  { %v4115_v44 = vpop.eup %4114  ;;  %v2921_v33 = vmul.f32 %v4105_v22, %v2920_v2  ;;  %v2979_v51 = vmul.f32 %v6038_v63, %v6008_v9  ;;  %4120 = vrcp.f32 %v6050_v28  ;;  %vm2984_vm13 = vweird.f32 %v6038_v63  ;;  %vm2955_vm14 = vmor %vm2953_vm4, %vm2954_vm10 }
0x100b   :  { %v4117_v5 = vpop.eup %4116  ;;  %v2950_v4 = vsub.f32 1.0, %v2949_v41  ;;  %v2936_v36 = vmul.f32 %v4107_v37, %v2935_v52  ;;  %v6059_v41 = vadd.f32 1.0, %v4115_v44  ;;  %vm6098_vm3 = vmor %vm2983_vm5, %vm2984_vm13  ;;  %vm3028_vm5 = vweird.f32 %v6050_v28 }
0x100c   :  { %v2922_v17 = vadd.f32 %v4105_v22, %v2921_v33  ;;  %v2994_v2 = vmul.f32 %v4117_v5, %v6014_v11  ;;  %v2980_v56 = vsub.f32 1.0, %v2979_v51  ;;  %vm2999_vm15 = vweird.f32 %v4117_v5 }
0x100d   :  { %v2951_v40 = vmul.f32 %v4111_v59, %v2950_v4  ;;  %v2937_v12 = vadd.f32 %v4107_v37, %v2936_v36  ;;  %v4119_v4 = vpop.eup %4118  ;;  %v2974_v36 = vand.u32 2147483648, %v6036_v54  ;;  %4122 = vrcp.f32 %v6059_v41 }
0x100e   :  { %v2926_v52 = vsel %vm2925_vm8, %v4105_v22, %v2922_v17  ;;  %v2995_v47 = vsub.f32 1.0, %v2994_v2  ;;  %v2981_v33 = vmul.f32 %v6038_v63, %v2980_v56  ;;  %vm2969_vm4 = vweird.f32 %v4119_v4 }
0x100f   :  { %v6067_v51 = vsel %vm6025_vm2, %v2930_v48, %v2926_v52  ;;  %v2952_v39 = vadd.f32 %v4111_v59, %v2951_v40  ;;  %v2941_v38 = vsel %vm2940_vm12, %v4107_v37, %v2937_v12  ;;  %v2964_v37 = vmul.f32 %v4119_v4, %v6036_v54  ;;  %vm3000_vm2 = vmor %vm2998_vm0, %vm2999_vm15 }
0x1010   :  { %v3054_v44 = vmul.f32 %v6067_v51, %v6006_v61  ;;  %v6076_v56 = vsel %vm6032_vm7, %v2945_v20, %v2941_v38  ;;  %v2996_v15 = vmul.f32 %v4117_v5, %v2995_v47  ;;  %v2982_v12 = vadd.f32 %v6038_v63, %v2981_v33  ;;  %v4121_v0 = vpop.eup %4120 }
0x1011   :  { %v2956_v22 = vsel %vm2955_vm14, %v4111_v59, %v2952_v39  ;;  %v3055_v43 = vmul.f32 %v3039_v10, %v6076_v56  ;;  %v2989_v38 = vand.u32 2147483648, %v6008_v9  ;;  %v7074_v47 = vrot.slane %v6006_v61, 2 }
0x1012   :  { %3070 = vrot.lane.b32.xlu0 %v3054_v44, %s4208_s14  ;;  %v6084_v48 = vsel %vm6041_vm11, %v2960_v50, %v2956_v22  ;;  %v2997_v14 = vadd.f32 %v4117_v5, %v2996_v15  ;;  %v3005_v10 = vor.u32 1.1754944e-38, %v3004_v53  ;;  %v2965_v59 = vsub.f32 1.0, %v2964_v37  ;;  %vm2970_vm11 = vmor %vm2968_vm9, %vm2969_vm4 }
0x1013   :  { %v3056_v24 = vmul.f32 %v7074_v47, %v6084_v48  ;;  %3072 = vrot.lane.b32.xlu1 %v3055_v43, %s4208_s14  ;;  %v2972_v20 = vand.u32 2147483647, %v6036_v54  ;;  %v2986_v53 = vsel %vm6098_vm3, %v6038_v63, %v2982_v12  ;;  %v3024_v17 = vmul.f32 %v4121_v0, %v6050_v28 }
0x1014   :  { %v3001_v50 = vsel %vm3000_vm2, %v4117_v5, %v2997_v14  ;;  %v2966_v5 = vmul.f32 %v4119_v4, %v2965_v59  ;;  %v3043_v2 = vrot.slane %v6006_v61, 5  ;;  %v2990_v40 = vor.u32 1.1754944e-38, %v2989_v38  ;;  %v4123_v14 = vpop.eup %4122 }
0x1015   :  { %3074 = vrot.lane.b32.xlu2 %v3056_v24, %s4208_s14  ;;  %v6105_v11 = vsel %vm3003_vm1, %v3005_v10, %v3001_v50  ;;  %v3042_v52 = vrot.slane %v6006_v61, 4  ;;  %v7077_v33 = vand.u32 2147483647, %v6008_v9  ;;  %v3025_v44 = vsub.f32 1.0, %v3024_v17 }
0x1016   :  { %v2967_v39 = vadd.f32 %v4119_v4, %v2966_v5  ;;  %v3059_v15 = vmul.f32 %v3043_v2, %v6105_v11  ;;  %v2975_v63 = vor.u32 1.1754944e-38, %v2974_v36  ;;  %v3041_v43 = vrot.slane %v6006_v61, 3 }
0x1017   :  { %vm2988_vm7 = vcmp.eq.f32.partialorder %v7077_v33, 8.507059e+37  ;;  %vm2973_vm0 = vcmp.eq.f32.partialorder %v2972_v20, 8.507059e+37  ;;  %v3026_v37 = vmul.f32 %v4121_v0, %v3025_v44  ;;  %vm3029_vm6 = vweird.f32 %v4121_v0 }
0x1018   :  { %v6117_v22 = vsel %vm2988_vm7, %v2990_v40, %v2986_v53  ;;  %v2971_v12 = vsel %vm2970_vm11, %v4119_v4, %v2967_v39  ;;  %v3032_v54 = vand.u32 2147483647, %v6050_v28  ;;  %v3034_v38 = vand.u32 2147483648, %v6050_v28  ;;  %vm3030_vm8 = vmor %vm3028_vm5, %vm3029_vm6 }
0x1019   :  { %v6122_v9 = vsel %vm2973_vm0, %v2975_v63, %v2971_v12  ;;  %v3058_v47 = vmul.f32 %v3042_v52, %v6117_v22  ;;  %v3027_v10 = vadd.f32 %v4121_v0, %v3026_v37  ;;  %v3009_v4 = vmul.f32 %v4123_v14, %v6059_v41 }
0x101a   :  { %3080 = vrot.lane.b32.xlu0 %v3059_v15, %s4208_s14  ;;  %v3057_v24 = vmul.f32 %v3041_v43, %v6122_v9  ;;  %v3035_v50 = vor.u32 1.1754944e-38, %v3034_v38  ;;  %v3019_v16 = vand.u32 2147483648, %v6059_v41  ;;  %vm3033_vm10 = vcmp.eq.f32.partialorder %v3032_v54, 8.507059e+37 }
0x101b   :  { %v3031_v59 = vsel %vm3030_vm8, %v4121_v0, %v3027_v10  ;;  %v3010_v20 = vsub.f32 1.0, %v3009_v4  ;;  %vm3014_vm12 = vweird.f32 %v4123_v14  ;;  %v3017_v28 = vand.u32 2147483647, %v6059_v41 }
0x101c   :  { %3076 = vrot.lane.b32.xlu1 %v3057_v24, %s4208_s14  ;;  %v6134_v53 = vsel %vm3033_vm10, %v3035_v50, %v3031_v59  ;;  %v3045_v5 = vrot.slane %v6006_v61, 7  ;;  %vm3013_vm13 = vweird.f32 %v6059_v41  ;;  %v3020_v2 = vor.u32 1.1754944e-38, %v3019_v16 }
0x101d   :  { %3078 = vrot.lane.b32.xlu2 %v3058_v47, %s4208_s14  ;;  %v3011_v36 = vmul.f32 %v4123_v14, %v3010_v20  ;;  %vm3015_vm14 = vmor %vm3013_vm13, %vm3014_vm12  ;;  %vm3018_vm15 = vcmp.eq.f32.partialorder %v3017_v28, 8.507059e+37  ;;  %v3044_v52 = vrot.slane %v6006_v61, 6  ;;  %vm7088_vm1 = vcmask 1041409  }
0x101e   :  { %v3061_v0 = vmul.f32 %v3045_v5, %v6134_v53  ;;  %vm7089_vm2 = vcmask 1042434   ;;  %vm7090_vm3 = vcmask 1043459   ;;  %vm7091_vm4 = vcmask 1044484  }
0x101f   :  { %v3012_v17 = vadd.f32 %v4123_v14, %v3011_v36  ;;  %vm7092_vm7 = vcmask 1045509   ;;  %vm577_vm9 = vcmask 253952   ;;  %vm7093_vm11 = vcmask 1046534  }
0x1020   :  { %vm7094_vm0 = vcmask 1047559   ;;  %vm7104_vm6 = vcmask 261120  }
0x1021   :  { %v3016_v40 = vsel %vm3015_vm14, %v4123_v14, %v3012_v17  ;;  %vm7105_vm5 = vmmov %vm7104_vm6 }
0x1022   :  { %v6140_v33 = vsel %vm3018_vm15, %v3020_v2, %v3016_v40 }
0x1023   :  { %v3060_v39 = vmul.f32 %v3044_v52, %v6140_v33 }
0x1025   :  { %3084 = vrot.lane.b32.xlu2 %v3061_v0, %s4208_s14  ;;  %3082 = vrot.lane.b32.xlu1 %v3060_v39, %s4208_s14 }
0x106f   :  { %v3075_v44 = vpop.permute.xlu2 %3074 }
0x1070   :  { %v3096_v15 = vadd.f32 %v3075_v44, %v5972_v21 }
0x1072   :  { %4124 = vtanh.f32 %v3096_v15 }
0x1077   :  { %v3079_v41 = vpop.permute.xlu2 %3078 }
0x1078   :  { %v6146_v63 = vpop.eup %4124  ;;  %v3098_v43 = vadd.f32 %v3079_v41, %v5974_v58 }
0x1079   :  { %v3112_v61 = vsub.f32 %v5934_v3, %v6146_v63 }
0x107a   :  { %4126 = vtanh.f32 %v3098_v43 }
0x107b   :  { %3130 = vrot.lane.b32.xlu1 %v3112_v61, %s4210_s15 }
0x107f   :  { %v3085_v12 = vpop.permute.xlu2 %3084 }
0x1080   :  { %v6152_v37 = vpop.eup %4126  ;;  %v3101_v14 = vadd.f32 %v3085_v12, %v5986_v35 }
0x1081   :  { %v3114_v21 = vsub.f32 %v5943_v60, %v6152_v37 }
0x1082   :  { %4128 = vtanh.f32 %v3101_v14 }
0x1083   :  { %3134 = vrot.lane.b32.xlu1 %v3114_v21, %s4210_s15 }
0x1084   :  { %v3071_v54 = vpop.permute.xlu0 %3070 }
0x1085   :  { %v3094_v58 = vadd.f32 %v3071_v54, %v5968_v31  ;;  %v3073_v38 = vpop.permute.xlu1 %3072  ;;  %v7079_v54 = vld [vmem:[#allocation10_spill] sm:$0xff] }
0x1086   :  { %v3095_v47 = vadd.f32 %v3073_v38, %v5970_v19 }
0x1087   :  { %4130 = vtanh.f32 %v3094_v58  ;;  %v7087_v58 = vld [vmem:[#allocation20_spill] sm:$0xff] }
0x1088   :  { %v6160_v24 = vpop.eup %4128  ;;  %4132 = vtanh.f32 %v3095_v47 }
0x1089   :  { %v3117_v10 = vsub.f32 %v5954_v32, %v6160_v24 }
0x108b   :  { %3140 = vrot.lane.b32.xlu1 %v3117_v10, %s4210_s15 }
0x108c   :  { %v3081_v35 = vpop.permute.xlu0 %3080 }
0x108d   :  { %v6165_v4 = vpop.eup %4130  ;;  %v3099_v59 = vadd.f32 %v3081_v35, %v5977_v30 }
0x108e   :  { %v6168_v20 = vpop.eup %4132  ;;  %v3110_v31 = vsub.f32 %v5940_v18, %v6165_v4  ;;  %v3077_v19 = vpop.permute.xlu1 %3076 }
0x108f   :  { %4134 = vtanh.f32 %v3099_v59  ;;  %v3111_v50 = vsub.f32 %v5932_v25, %v6168_v20  ;;  %v3097_v16 = vadd.f32 %v3077_v19, %v5982_v57 }
0x1090   :  { %3126 = vrot.lane.b32.xlu2 %v3110_v31, %s4210_s15 }
0x1091   :  { %3128 = vrot.lane.b32.xlu0 %v3111_v50, %s4210_s15  ;;  %4136 = vtanh.f32 %v3097_v16 }
0x1095   :  { %v6177_v36 = vpop.eup %4134 }
0x1096   :  { %v3115_v30 = vsub.f32 %v5951_v1, %v6177_v36 }
0x1097   :  { %v4137_v28 = vpop.eup %4136  ;;  %v3083_v5 = vpop.permute.xlu1 %3082 }
0x1098   :  { %3136 = vrot.lane.b32.xlu2 %v3115_v30, %s4210_s15  ;;  %v3113_v17 = vsub.f32 %v5937_v46, %v4137_v28  ;;  %v3100_v2 = vadd.f32 %v3083_v5, %v5989_v45 }
0x109a   :  { %3132 = vrot.lane.b32.xlu0 %v3113_v17, %s4210_s15  ;;  %4138 = vtanh.f32 %v3100_v2 }
0x10a0   :  { %v6185_v57 = vpop.eup %4138 }
0x10a1   :  { %v3116_v0 = vsub.f32 %v5957_v26, %v6185_v57 }
0x10a3   :  { %3138 = vrot.lane.b32.xlu0 %v3116_v0, %s4210_s15 }
0x10ea   :  { %v3127_v40 = vpop.permute.xlu2 %3126 }
0x10eb   :  { %v3150_v52 = vmul.f32 %v3127_v40, %v6067_v51 }
0x10ed   :  { %v3131_v39 = vpop.permute.xlu1 %3130  ;;  %3166 = vrot.lane.b32.xlu1 %v3150_v52, %s4209_s1 }
0x10ee   :  { %v3152_v44 = vmul.f32 %v3131_v39, %v6084_v48 }
0x10f0   :  { %3170 = vrot.lane.b32.xlu0 %v3152_v44, %s4209_s1 }
0x10f2   :  { %v3137_v45 = vpop.permute.xlu2 %3136 }
0x10f3   :  { %v3155_v15 = vmul.f32 %v3137_v45, %v6105_v11 }
0x10f5   :  { %v3135_v41 = vpop.permute.xlu1 %3134  ;;  %3176 = vrot.lane.b32.xlu1 %v3155_v15, %s4209_s1  ;;  %v7095_v15 = vld [vmem:[#allocation4_spill] sm:$0xff] }
0x10f6   :  { %v3154_v43 = vmul.f32 %v3135_v41, %v6117_v22  ;;  %v7078_v22 = vld [vmem:[#allocation7_spill] sm:$0xff] }
0x10f8   :  { %3174 = vrot.lane.b32.xlu0 %v3154_v43, %s4209_s1 }
0x10fd   :  { %v3141_v61 = vpop.permute.xlu1 %3140 }
0x10fe   :  { %v3157_v51 = vmul.f32 %v3141_v61, %v6134_v53  ;;  %v7096_v61 = vld [vmem:[#allocation8_spill] sm:$0xff] }
0x1100   :  { %3180 = vrot.lane.b32.xlu0 %v3157_v51, %s4209_s1 }
0x1103   :  { %v3129_v12 = vpop.permute.xlu0 %3128 }
0x1104   :  { %v3151_v48 = vmul.f32 %v3129_v12, %v6076_v56  ;;  %v7081_v56 = vld [vmem:[#allocation6_spill] sm:$0xff] }
0x1106   :  { %3168 = vrot.lane.b32.xlu2 %v3151_v48, %s4209_s1  ;;  %v7097_v48 = vld [vmem:[#allocation12_spill] sm:$0xff] }
0x1108   :  { %555 = vrot.lane.b32.xlu0 %v4612_v55, %s4208_s14  ;;  %v7080_v55 = vld [vmem:[#allocation5_spill] sm:$0xff] }
0x110c   :  { %v3133_v11 = vpop.permute.xlu0 %3132 }
0x110d   :  { %v3153_v14 = vmul.f32 %v3133_v11, %v6122_v9  ;;  %v7082_v9 = vld [vmem:[#allocation9_spill] sm:$0xff] }
0x110f   :  { %3172 = vrot.lane.b32.xlu2 %v3153_v14, %s4209_s1 }
0x1110   :  { %561 = vrot.lane.b32.xlu0 %v7078_v22, %s4208_s14  ;;  %v7098_v22 = vld [vmem:[#allocation11_spill] sm:$0xff] }
0x1115   :  { %v3139_v21 = vpop.permute.xlu0 %3138 }
0x1116   :  { %v3156_v53 = vmul.f32 %v3139_v21, %v6140_v33 }
0x1118   :  { %567 = vrot.lane.b32.xlu0 %v7079_v54, %s4208_s14  ;;  %3178 = vrot.lane.b32.xlu2 %v3156_v53, %s4209_s1  ;;  %v7099_v54 = vld [vmem:[#allocation13_spill] sm:$0xff] }
0x1120   :  { %1000 = vrot.lane.b32.xlu0 %v4872_v49, %s4208_s14  ;;  %553 = vrot.lane.b32.xlu2 %v7080_v55, %s4208_s14  ;;  %v7083_v49 = vld [vmem:[#allocation22_spill] sm:$0xff] }
0x1128   :  { %1006 = vrot.lane.b32.xlu0 %v4888_v13, %s4208_s14  ;;  %559 = vrot.lane.b32.xlu2 %v7081_v56, %s4208_s14  ;;  %v7084_v13 = vld [vmem:[#allocation15_spill] sm:$0xff] }
0x1130   :  { %1438 = vrot.lane.b32.xlu0 %v5172_v29, %s4208_s14  ;;  %565 = vrot.lane.b32.xlu2 %v7082_v9, %s4208_s14  ;;  %v7086_v29 = vld [vmem:[#allocation21_spill] sm:$0xff]  ;;  %v7100_v9 = vld [vmem:[#allocation14_spill] sm:$0xff] }
0x1138   :  { %1444 = vrot.lane.b32.xlu0 %v5169_v34, %s4208_s14  ;;  %998 = vrot.lane.b32.xlu2 %v4870_v27, %s4208_s14  ;;  %v7085_v27 = vld [vmem:[#allocation17_spill] sm:$0xff] }
0x1140   :  { %1450 = vrot.lane.b32.xlu0 %v5188_v23, %s4208_s14  ;;  %1004 = vrot.lane.b32.xlu2 %v4881_v42, %s4208_s14 }
0x1148   :  { %1882 = vrot.lane.b32.xlu0 %v5416_v62, %s4208_s14  ;;  %1010 = vrot.lane.b32.xlu2 %v4890_v8, %s4208_s14 }
0x1150   :  { %1888 = vrot.lane.b32.xlu0 %v7083_v49, %s4208_s14  ;;  %1442 = vrot.lane.b32.xlu2 %v7084_v13, %s4208_s14 }
0x1158   :  { %1448 = vrot.lane.b32.xlu2 %v7085_v27, %s4208_s14  ;;  %v7101_v27 = vld [vmem:[#allocation16_spill] sm:$0xff] }
0x115f   :  { %v3167_v23 = vpop.permute.xlu1 %3166 }
0x1160   :  { %v3169_v34 = vpop.permute.xlu2 %3168  ;;  %1880 = vrot.lane.b32.xlu2 %v7086_v29, %s4208_s14  ;;  %v6256_v35 = vadd.f32 %v6165_v4, %v3167_v23 }
0x1161   :  { %v6245_v62 = vadd.f32 %v6168_v20, %v3169_v34 }
0x1162   :  { %v3171_v42 = vpop.permute.xlu0 %3170 }
0x1163   :  { %v6248_v8 = vadd.f32 %v6146_v63, %v3171_v42  ;;  %v3238_v33 = vrot.slane %v6245_v62, 7  ;;  %v7102_v42 = vld [vmem:[#allocation18_spill] sm:$0xff] }
0x1165   :  { %v3240_v59 = vrot.slane %v6248_v8, 6  ;;  %v3239_v63 = vsel %vm7088_vm1, %v3238_v33, %v6256_v35 }
0x1167   :  { %v3177_v19 = vpop.permute.xlu1 %3176  ;;  %v3241_v50 = vsel %vm7089_vm2, %v3240_v59, %v3239_v63 }
0x1168   :  { %1886 = vrot.lane.b32.xlu2 %v7087_v58, %s4208_s14  ;;  %v6268_v30 = vadd.f32 %v6177_v36, %v3177_v19  ;;  %v7103_v58 = vld [vmem:[#allocation19_spill] sm:$0xff] }
0x1169   :  { %v3173_v38 = vpop.permute.xlu2 %3172 }
0x116a   :  { %v3175_v47 = vpop.permute.xlu0 %3174  ;;  %v6253_v10 = vadd.f32 %v4137_v28, %v3173_v38  ;;  %v3246_v0 = vrot.slane %v6268_v30, 3 }
0x116b   :  { %v6260_v20 = vadd.f32 %v6152_v37, %v3175_v47 }
0x116c   :  { %v3242_v31 = vrot.slane %v6253_v10, 5 }
0x116d   :  { %v3244_v16 = vrot.slane %v6260_v20, 4 }
0x116e   :  { %v3243_v4 = vsel %vm7090_vm3, %v3242_v31, %v3241_v50 }
0x116f   :  { %v3245_v17 = vsel %vm7091_vm4, %v3244_v16, %v3243_v4 }
0x1170   :  { %v3247_v36 = vsel %vm7092_vm7, %v3246_v0, %v3245_v17  ;;  %v6421_v0 = vld [vmem:[#allocation3 + $0x7] sm:$0x1] }
0x1172   :  { %v3181_v28 = vpop.permute.xlu0 %3180  ;;  %v3179_v37 = vpop.permute.xlu2 %3178 }
0x1173   :  { %v6272_v5 = vadd.f32 %v6160_v24, %v3181_v28  ;;  %v6276_v2 = vadd.f32 %v6185_v57, %v3179_v37 }
0x1175   :  { %v3250_v40 = vrot.slane %v6272_v5, 1  ;;  %v3248_v52 = vrot.slane %v6276_v2, 2 }
0x1177   :  { %v3249_v39 = vsel %vm7093_vm11, %v3248_v52, %v3247_v36  ;;  %v6425_v52 = vld [vmem:[#allocation3 + $0x17] sm:$0x1]  ;;  %v6427_v36 = vld [vmem:[#allocation3 + $0x1f] sm:$0x1] }
0x1178   :  { %v3251_v24 = vsel %vm7094_vm0, %v3250_v40, %v3249_v39  ;;  %v6423_v40 = vld [vmem:[#allocation3 + $0xf] sm:$0x1] }
0x1179   :  { %3252 = vrot.lane.b32.xlu1 %v3251_v24, %s4208_s14 }
0x117a   :  { %v556_v44 = vpop.permute.xlu0 %555  ;;  %v554_v57 = vpop.permute.xlu2 %553 }
0x117b   :  { %579 = vst.msk [vmem:[%s6903_s6 + $0x8] sm:$0x1] %vm577_vm9, %v556_v44 }
0x117c   :  { %578 = vst.msk [vmem:[%s6903_s6] sm:$0x1] %vm577_vm9, %v554_v57 }
0x1181   :  { %557 = vrot.lane.b32.xlu1 %v7095_v15, %s4208_s14 }
0x1182   :  { %v562_v45 = vpop.permute.xlu0 %561  ;;  %v560_v41 = vpop.permute.xlu2 %559 }
0x1183   :  { %582 = vst.msk [vmem:[%s6903_s6 + $0x20] sm:$0x1] %vm577_vm9, %v562_v45  ;;  %v6429_v45 = vld [vmem:[#allocation3 + $0x27] sm:$0x1] }
0x1184   :  { %581 = vst.msk [vmem:[%s6903_s6 + $0x18] sm:$0x1] %vm577_vm9, %v560_v41 }
0x1189   :  { %563 = vrot.lane.b32.xlu1 %v7096_v61, %s4208_s14 }
0x118a   :  { %v568_v43 = vpop.permute.xlu0 %567  ;;  %v566_v51 = vpop.permute.xlu2 %565 }
0x118b   :  { %585 = vst.msk [vmem:[%s6903_s6 + $0x38] sm:$0x1] %vm577_vm9, %v568_v43 }
0x118c   :  { %584 = vst.msk [vmem:[%s6903_s6 + $0x30] sm:$0x1] %vm577_vm9, %v566_v51  ;;  %v6432_v51 = vld [vmem:[#allocation3 + $0x2f] sm:$0x1] }
0x1191   :  { %996 = vrot.lane.b32.xlu1 %v7097_v48, %s4208_s14 }
0x1192   :  { %v1001_v12 = vpop.permute.xlu0 %1000  ;;  %v999_v11 = vpop.permute.xlu2 %998 }
0x1193   :  { %1022 = vst.msk [vmem:[%s6903_s6 + $0x11] sm:$0x1] %vm577_vm9, %v1001_v12  ;;  %v6434_v12 = vld [vmem:[#allocation3 + $0x37] sm:$0x1] }
0x1194   :  { %1021 = vst.msk [vmem:[%s6903_s6 + $0x9] sm:$0x1] %vm577_vm9, %v999_v11 }
0x1199   :  { %1002 = vrot.lane.b32.xlu1 %v7098_v22, %s4208_s14 }
0x119a   :  { %v1007_v14 = vpop.permute.xlu0 %1006  ;;  %v1005_v21 = vpop.permute.xlu2 %1004 }
0x119b   :  { %1025 = vst.msk [vmem:[%s6903_s6 + $0x29] sm:$0x1] %vm577_vm9, %v1007_v14 }
0x119c   :  { %1024 = vst.msk [vmem:[%s6903_s6 + $0x21] sm:$0x1] %vm577_vm9, %v1005_v21  ;;  %v6440_v21 = vld [vmem:[#allocation3 + $0x3f] sm:$0x1] }
0x11a1   :  { %1008 = vrot.lane.b32.xlu1 %v7099_v54, %s4208_s14 }
0x11a2   :  { %v1439_v53 = vpop.permute.xlu0 %1438  ;;  %v1011_v55 = vpop.permute.xlu2 %1010 }
0x11a3   :  { %1462 = vst.msk [vmem:[%s6903_s6 + $0x2] sm:$0x1] %vm577_vm9, %v1439_v53 }
0x11a4   :  { %1027 = vst.msk [vmem:[%s6903_s6 + $0x39] sm:$0x1] %vm577_vm9, %v1011_v55 }
0x11a9   :  { %1440 = vrot.lane.b32.xlu1 %v7100_v9, %s4208_s14 }
0x11aa   :  { %v1445_v56 = vpop.permute.xlu0 %1444  ;;  %v1443_v49 = vpop.permute.xlu2 %1442 }
0x11ab   :  { %1465 = vst.msk [vmem:[%s6903_s6 + $0x1a] sm:$0x1] %vm577_vm9, %v1445_v56 }
0x11ac   :  { %1464 = vst.msk [vmem:[%s6903_s6 + $0x12] sm:$0x1] %vm577_vm9, %v1443_v49 }
0x11b1   :  { %1446 = vrot.lane.b32.xlu1 %v7101_v27, %s4208_s14 }
0x11b2   :  { %v1451_v13 = vpop.permute.xlu0 %1450  ;;  %v1449_v34 = vpop.permute.xlu2 %1448 }
0x11b3   :  { %1468 = vst.msk [vmem:[%s6903_s6 + $0x32] sm:$0x1] %vm577_vm9, %v1451_v13 }
0x11b4   :  { %1467 = vst.msk [vmem:[%s6903_s6 + $0x2a] sm:$0x1] %vm577_vm9, %v1449_v34 }
0x11b9   :  { %1452 = vrot.lane.b32.xlu1 %v7102_v42, %s4208_s14 }
0x11ba   :  { %v1883_v29 = vpop.permute.xlu0 %1882  ;;  %v1881_v23 = vpop.permute.xlu2 %1880 }
0x11bb   :  { %1905 = vst.msk [vmem:[%s6903_s6 + $0xb] sm:$0x1] %vm577_vm9, %v1883_v29 }
0x11bc   :  { %1904 = vst.msk [vmem:[%s6903_s6 + $0x3] sm:$0x1] %vm577_vm9, %v1881_v23 }
0x11c1   :  { %1884 = vrot.lane.b32.xlu1 %v7103_v58, %s4208_s14 }
0x11c2   :  { %v1889_v33 = vpop.permute.xlu0 %1888  ;;  %v1887_v38 = vpop.permute.xlu2 %1886 }
0x11c3   :  { %1908 = vst.msk [vmem:[%s6903_s6 + $0x23] sm:$0x1] %vm577_vm9, %v1889_v33 }
0x11c4   :  { %1907 = vst.msk [vmem:[%s6903_s6 + $0x1b] sm:$0x1] %vm577_vm9, %v1887_v38 }
0x11eb   :  { %v3253_v47 = vpop.permute.xlu1 %3252 }
0x11ec   :  { %3780 = vmatmul.msk.f32.vlgmr.msrb.gmra.mxu3 %vm7104_vm6, %v3253_v47  ;;  %3781 = vmatmul.msk.f32.vlgmr.msrb.gmra.mxu1 %vm7105_vm5, %v3253_v47 }
0x11f3   :  { %v558_v59 = vpop.permute.xlu1 %557 }
0x11f4   :  { %580 = vst.msk [vmem:[%s6903_s6 + $0x10] sm:$0x1] %vm577_vm9, %v558_v59 }
0x11fb   :  { %v564_v63 = vpop.permute.xlu1 %563 }
0x11fc   :  { %583 = vst.msk [vmem:[%s6903_s6 + $0x28] sm:$0x1] %vm577_vm9, %v564_v63 }
0x1203   :  { %v997_v31 = vpop.permute.xlu1 %996 }
0x1204   :  { %1020 = vst.msk [vmem:[%s6903_s6 + $0x1] sm:$0x1] %vm577_vm9, %v997_v31 }
0x120b   :  { %v1003_v19 = vpop.permute.xlu1 %1002 }
0x120c   :  { %1023 = vst.msk [vmem:[%s6903_s6 + $0x19] sm:$0x1] %vm577_vm9, %v1003_v19 }
0x1213   :  { %v1009_v50 = vpop.permute.xlu1 %1008 }
0x1214   :  { %1026 = vst.msk [vmem:[%s6903_s6 + $0x31] sm:$0x1] %vm577_vm9, %v1009_v50 }
0x121b   :  { %v1441_v16 = vpop.permute.xlu1 %1440 }
0x121c   :  { %1463 = vst.msk [vmem:[%s6903_s6 + $0xa] sm:$0x1] %vm577_vm9, %v1441_v16 }
0x1223   :  { %v1447_v4 = vpop.permute.xlu1 %1446 }
0x1224   :  { %1466 = vst.msk [vmem:[%s6903_s6 + $0x22] sm:$0x1] %vm577_vm9, %v1447_v4 }
0x122b   :  { %v1453_v28 = vpop.permute.xlu1 %1452 }
0x122c   :  { %1469 = vst.msk [vmem:[%s6903_s6 + $0x3a] sm:$0x1] %vm577_vm9, %v1453_v28 }
0x1233   :  { %v1885_v37 = vpop.permute.xlu1 %1884 }
0x1234   :  { %1906 = vst.msk [vmem:[%s6903_s6 + $0x13] sm:$0x1] %vm577_vm9, %v1885_v37 }
0x1269   :  { %v3293_v47 = vpop.f32.mrf.mxu1 }
0x126a   :  { %v6456_v4 = vadd.f32 %v6003_v6, %v3293_v47 }
0x126f   :  { %v3273_v17 = vpop.f32.mrf.mxu3 }
0x1270   :  { %v3305_v39 = vrot.slane %v3273_v17, 1  ;;  %v3306_v24 = vrot.slane %v3273_v17, 2  ;;  %v3307_v44 = vrot.slane %v3273_v17, 3  ;;  %v3308_v57 = vrot.slane %v3273_v17, 4 }
0x1271   :  { %v3309_v15 = vrot.slane %v3273_v17, 5  ;;  %v3310_v41 = vrot.slane %v3273_v17, 6  ;;  %v3311_v43 = vrot.slane %v3273_v17, 7  ;;  %v3320_v61 = vadd.f32 %v6421_v0, %v3273_v17 }
0x1272   :  { %v3321_v48 = vadd.f32 %v3305_v39, %v6423_v40  ;;  %v3322_v11 = vadd.f32 %v3306_v24, %v6425_v52  ;;  %v3323_v14 = vadd.f32 %v3307_v44, %v6427_v36  ;;  %v3324_v22 = vadd.f32 %v3308_v57, %v6429_v45 }
0x1273   :  { %v3325_v53 = vadd.f32 %v3309_v15, %v6432_v51  ;;  %v3326_v54 = vadd.f32 %v3310_v41, %v6434_v12  ;;  %v3782_v55 = vmul.f32 -1.442695, %v3320_v61  ;;  %v3327_v56 = vadd.f32 %v3311_v43, %v6440_v21 }
0x1274   :  { %v3783_v9 = vmul.f32 -1.442695, %v3321_v48  ;;  %v3784_v49 = vmul.f32 -1.442695, %v3322_v11  ;;  %v3785_v13 = vmul.f32 -1.442695, %v3323_v14 }
0x1275   :  { %4140 = vpow2.f32 %v3782_v55  ;;  %v3786_v27 = vmul.f32 -1.442695, %v3324_v22  ;;  %v3787_v34 = vmul.f32 -1.442695, %v3325_v53  ;;  %v3788_v29 = vmul.f32 -1.442695, %v3326_v54 }
0x1276   :  { %4142 = vpow2.f32 %v3783_v9  ;;  %v3789_v42 = vmul.f32 -1.442695, %v3327_v56  ;;  %v3481_v14 = vrot.slane %v6456_v4, 1 }
0x1277   :  { %4144 = vpow2.f32 %v3784_v49 }
0x1278   :  { %4146 = vpow2.f32 %v3785_v13 }
0x1279   :  { %4148 = vpow2.f32 %v3786_v27 }
0x127a   :  { %4150 = vpow2.f32 %v3787_v34 }
0x127b   :  { %v4141_v23 = vpop.eup %4140  ;;  %4152 = vpow2.f32 %v3788_v29 }
0x127c   :  { %v4143_v33 = vpop.eup %4142  ;;  %4154 = vpow2.f32 %v3789_v42  ;;  %v6445_v58 = vadd.f32 1.0, %v4141_v23 }
0x127d   :  { %v4145_v38 = vpop.eup %4144  ;;  %v6447_v59 = vadd.f32 1.0, %v4143_v33 }
0x127e   :  { %v4147_v63 = vpop.eup %4146  ;;  %v6449_v31 = vadd.f32 1.0, %v4145_v38  ;;  %4156 = vrcp.f32 %v6445_v58  ;;  %v3369_v39 = vand.u32 2147483647, %v6445_v58  ;;  %v3371_v24 = vand.u32 2147483648, %v6445_v58 }
0x127f   :  { %v4149_v19 = vpop.eup %4148  ;;  %v6452_v50 = vadd.f32 1.0, %v4147_v63  ;;  %4158 = vrcp.f32 %v6447_v59  ;;  %v3384_v15 = vand.u32 2147483647, %v6447_v59  ;;  %v3386_v61 = vand.u32 2147483648, %v6447_v59 }
0x1280   :  { %v4151_v16 = vpop.eup %4150  ;;  %v6458_v28 = vadd.f32 1.0, %v4149_v19  ;;  %4160 = vrcp.f32 %v6449_v31  ;;  %v3401_v6 = vand.u32 2147483648, %v6449_v31  ;;  %v3399_v43 = vand.u32 2147483647, %v6449_v31 }
0x1281   :  { %v4153_v37 = vpop.eup %4152  ;;  %v6461_v17 = vadd.f32 1.0, %v4151_v16  ;;  %4162 = vrcp.f32 %v6452_v50  ;;  %vm3365_vm8 = vweird.f32 %v6445_v58  ;;  %vm3380_vm10 = vweird.f32 %v6447_v59 }
0x1282   :  { %v4155_v44 = vpop.eup %4154  ;;  %v6466_v57 = vadd.f32 1.0, %v4153_v37  ;;  %4164 = vrcp.f32 %v6458_v28  ;;  %vm6482_vm12 = vcmp.eq.f32.partialorder %v3369_v39, 8.507059e+37  ;;  %v3372_v55 = vor.u32 1.1754944e-38, %v3371_v24 }
0x1283   :  { %v6471_v41 = vadd.f32 1.0, %v4155_v44  ;;  %4166 = vrcp.f32 %v6461_v17  ;;  %vm3395_vm13 = vweird.f32 %v6449_v31  ;;  %v3402_v56 = vor.u32 1.1754944e-38, %v3401_v6 }
0x1284   :  { %v4157_v48 = vpop.eup %4156  ;;  %4168 = vrcp.f32 %v6466_v57  ;;  %vm6489_vm14 = vcmp.eq.f32.partialorder %v3384_v15, 8.507059e+37  ;;  %v3446_v27 = vand.u32 2147483648, %v6461_v17  ;;  %vm6497_vm1 = vcmp.eq.f32.partialorder %v3399_v43, 8.507059e+37 }
0x1285   :  { %v4159_v22 = vpop.eup %4158  ;;  %v3361_v53 = vmul.f32 %v4157_v48, %v6445_v58  ;;  %4170 = vrcp.f32 %v6471_v41  ;;  %vm3366_vm15 = vweird.f32 %v4157_v48  ;;  %v3387_v33 = vor.u32 1.1754944e-38, %v3386_v61 }
0x1286   :  { %v4161_v9 = vpop.eup %4160  ;;  %v3376_v49 = vmul.f32 %v4159_v22, %v6447_v59  ;;  %vm3381_vm3 = vweird.f32 %v4159_v22  ;;  %vm3440_vm4 = vweird.f32 %v6461_v17  ;;  %v3444_v63 = vand.u32 2147483647, %v6461_v17  ;;  %vm3367_vm0 = vmor %vm3365_vm8, %vm3366_vm15 }
0x1287   :  { %v6494_v34 = vpop.eup %4162  ;;  %v3362_v29 = vsub.f32 1.0, %v3361_v53  ;;  %v3391_v42 = vmul.f32 %v4161_v9, %v6449_v31  ;;  %vm3396_vm2 = vweird.f32 %v4161_v9  ;;  %vm3425_vm7 = vweird.f32 %v6458_v28  ;;  %vm3382_vm5 = vmor %vm3380_vm10, %vm3381_vm3 }
0x1288   :  { %v6501_v38 = vpop.eup %4164  ;;  %v3377_v47 = vsub.f32 1.0, %v3376_v49  ;;  %v3447_v6 = vor.u32 1.1754944e-38, %v3446_v27  ;;  %v3429_v15 = vand.u32 2147483647, %v6458_v28  ;;  %v3406_v27 = vmul.f32 %v6494_v34, %v6452_v50  ;;  %vm3397_vm8 = vmor %vm3395_vm13, %vm3396_vm2 }
0x1289   :  { %v4167_v19 = vpop.eup %4166  ;;  %v3363_v16 = vmul.f32 %v4157_v48, %v3362_v29  ;;  %v3392_v37 = vsub.f32 1.0, %v3391_v42  ;;  %v3421_v39 = vmul.f32 %v6501_v38, %v6458_v28  ;;  %vm3426_vm11 = vweird.f32 %v6501_v38 }
0x128a   :  { %v3378_v24 = vmul.f32 %v4159_v22, %v3377_v47  ;;  %v3436_v44 = vmul.f32 %v4167_v19, %v6461_v17  ;;  %v6510_v43 = vpop.eup %4168  ;;  %vm3441_vm6 = vweird.f32 %v4167_v19  ;;  %vm6548_vm10 = vmor %vm3425_vm7, %vm3426_vm11  ;;  %vm3410_vm13 = vweird.f32 %v6452_v50 }
0x128b   :  { %v3364_v61 = vadd.f32 %v4157_v48, %v3363_v16  ;;  %v3393_v53 = vmul.f32 %v4161_v9, %v3392_v37  ;;  %v3422_v49 = vsub.f32 1.0, %v3421_v39  ;;  %v6513_v29 = vpop.eup %4170  ;;  %v3431_v37 = vand.u32 2147483648, %v6458_v28 }
0x128c   :  { %v3379_v42 = vadd.f32 %v4159_v22, %v3378_v24  ;;  %v3437_v47 = vsub.f32 1.0, %v3436_v44  ;;  %v3414_v28 = vand.u32 2147483647, %v6452_v50  ;;  %v3416_v23 = vand.u32 2147483648, %v6452_v50 }
0x128d   :  { %v3368_v11 = vsel %vm3367_vm0, %v4157_v48, %v3364_v61  ;;  %v3394_v32 = vadd.f32 %v4161_v9, %v3393_v53  ;;  %v3423_v16 = vmul.f32 %v6501_v38, %v3422_v49  ;;  %v3407_v48 = vsub.f32 1.0, %v3406_v27 }
0x128e   :  { %v6527_v58 = vsel %vm6482_vm12, %v3372_v55, %v3368_v11  ;;  %v3383_v39 = vsel %vm3382_vm5, %v4159_v22, %v3379_v42  ;;  %v3438_v24 = vmul.f32 %v4167_v19, %v3437_v47  ;;  %v7114_v55 = vrot.slane %v6456_v4, 2  ;;  %vm3442_vm12 = vmor %vm3440_vm4, %vm3441_vm6 }
0x128f   :  { %v3496_v44 = vmul.f32 %v6527_v58, %v6456_v4  ;;  %v3398_v59 = vsel %vm3397_vm8, %v4161_v9, %v3394_v32  ;;  %v6536_v61 = vsel %vm6489_vm14, %v3387_v33, %v3383_v39  ;;  %v3424_v53 = vadd.f32 %v6501_v38, %v3423_v16 }
0x1290   :  { %v6541_v11 = vsel %vm6497_vm1, %v3402_v56, %v3398_v59  ;;  %v3497_v31 = vmul.f32 %v3481_v14, %v6536_v61  ;;  %v3439_v54 = vadd.f32 %v4167_v19, %v3438_v24  ;;  %v3408_v32 = vmul.f32 %v6494_v34, %v3407_v48 }
0x1291   :  { %3512 = vrot.lane.b32.xlu0 %v3496_v44, %s4208_s14  ;;  %v3498_v56 = vmul.f32 %v7114_v55, %v6541_v11  ;;  %vm3411_vm14 = vweird.f32 %v6494_v34  ;;  %v3428_v9 = vsel %vm6548_vm10, %v6501_v38, %v3424_v53  ;;  %vm3445_vm15 = vcmp.eq.f32.partialorder %v3444_v63, 8.507059e+37 }
0x1292   :  { %3514 = vrot.lane.b32.xlu1 %v3497_v31, %s4208_s14  ;;  %v3443_v14 = vsel %vm3442_vm12, %v4167_v19, %v3439_v54  ;;  %v3409_v13 = vadd.f32 %v6494_v34, %v3408_v32  ;;  %v3432_v17 = vor.u32 1.1754944e-38, %v3431_v37  ;;  %vm3412_vm1 = vmor %vm3410_vm13, %vm3411_vm14  ;;  %v3466_v33 = vmul.f32 %v6513_v29, %v6471_v41 }
0x1293   :  { %3516 = vrot.lane.b32.xlu2 %v3498_v56, %s4208_s14  ;;  %v6572_v49 = vsel %vm3445_vm15, %v3447_v6, %v3443_v14  ;;  %vm3430_vm2 = vcmp.eq.f32.partialorder %v3429_v15, 8.507059e+37  ;;  %v3417_v42 = vor.u32 1.1754944e-38, %v3416_v23  ;;  %v3485_v38 = vrot.slane %v6456_v4, 5  ;;  %v7115_v23 = vld [vmem:[#allocation23_spill] sm:$0xff] }
0x1294   :  { %v3413_v19 = vsel %vm3412_vm1, %v6494_v34, %v3409_v13  ;;  %v6576_v47 = vsel %vm3430_vm2, %v3432_v17, %v3428_v9  ;;  %vm3415_vm3 = vcmp.eq.f32.partialorder %v3414_v28, 8.507059e+37  ;;  %v3467_v50 = vsub.f32 1.0, %v3466_v33  ;;  %v7118_v17 = vld [vmem:[#allocation28_spill] sm:$0xff]  ;;  %v7119_v33 = vld [vmem:[#allocation26_spill] sm:$0xff] }
0x1295   :  { %v3484_v27 = vrot.slane %v6456_v4, 4  ;;  %v6579_v63 = vsel %vm3415_vm3, %v3417_v42, %v3413_v19  ;;  %v3483_v16 = vrot.slane %v6456_v4, 3  ;;  %v3451_v6 = vmul.f32 %v6510_v43, %v6466_v57  ;;  %v7120_v19 = vld [vmem:[#allocation27_spill] sm:$0xff] }
0x1296   :  { %v3501_v15 = vmul.f32 %v3485_v38, %v6572_v49  ;;  %v3468_v34 = vmul.f32 %v6513_v29, %v3467_v50  ;;  %vm3471_vm4 = vweird.f32 %v6513_v29  ;;  %v3476_v24 = vand.u32 2147483648, %v6471_v41  ;;  %v7121_v42 = vld [vmem:[#allocation31_spill] sm:$0xff]  ;;  %v7123_v38 = vld [vmem:[#allocation30_spill] sm:$0xff]  ;;  %v7124_v50 = vld [vmem:[#allocation32_spill] sm:$0xff] }
0x1297   :  { %v3500_v37 = vmul.f32 %v3484_v27, %v6576_v47  ;;  %v3499_v39 = vmul.f32 %v3483_v16, %v6579_v63  ;;  %v3452_v48 = vsub.f32 1.0, %v3451_v6  ;;  %vm3470_vm7 = vweird.f32 %v6471_v41 }
0x1298   :  { %v3469_v44 = vadd.f32 %v6513_v29, %v3468_v34  ;;  %v3474_v59 = vand.u32 2147483647, %v6471_v41  ;;  %v3461_v53 = vand.u32 2147483648, %v6466_v57  ;;  %vm3472_vm11 = vmor %vm3470_vm7, %vm3471_vm4  ;;  %vm3456_vm0 = vweird.f32 %v6510_v43 }
0x1299   :  { %3522 = vrot.lane.b32.xlu0 %v3501_v15, %s4208_s14  ;;  %v3453_v31 = vmul.f32 %v6510_v43, %v3452_v48  ;;  %v3459_v54 = vand.u32 2147483647, %v6466_v57  ;;  %v3477_v32 = vor.u32 1.1754944e-38, %v3476_v24  ;;  %vm3455_vm6 = vweird.f32 %v6466_v57 }
0x129a   :  { %3518 = vrot.lane.b32.xlu1 %v3499_v39, %s4208_s14  ;;  %v3473_v22 = vsel %vm3472_vm11, %v6513_v29, %v3469_v44  ;;  %vm3475_vm5 = vcmp.eq.f32.partialorder %v3474_v59, 8.507059e+37  ;;  %vm3457_vm8 = vmor %vm3455_vm6, %vm3456_vm0  ;;  %v3462_v41 = vor.u32 1.1754944e-38, %v3461_v53  ;;  %v3486_v14 = vrot.slane %v6456_v4, 6 }
0x129b   :  { %3520 = vrot.lane.b32.xlu2 %v3500_v37, %s4208_s14  ;;  %v3454_v55 = vadd.f32 %v6510_v43, %v3453_v31  ;;  %v6603_v56 = vsel %vm3475_vm5, %v3477_v32, %v3473_v22  ;;  %vm3460_vm10 = vcmp.eq.f32.partialorder %v3459_v54, 8.507059e+37  ;;  %v3487_v9 = vrot.slane %v6456_v4, 7  ;;  %v7117_v4 = vld [vmem:[#allocation24_spill] sm:$0xff] }
0x129c   :  { %vm7126_vm12 = vcmask 1041409   ;;  %vm7127_vm13 = vcmask 1042434   ;;  %vm7128_vm14 = vcmask 1043459   ;;  %vm7129_vm15 = vcmask 1044484  }
0x129d   :  { %v3458_v28 = vsel %vm3457_vm8, %v6510_v43, %v3454_v55  ;;  %v3503_v57 = vmul.f32 %v3487_v9, %v6603_v56  ;;  %v7116_v43 = vld [vmem:[#allocation25_spill] sm:$0xff]  ;;  %vm7130_vm1 = vcmask 1045509   ;;  %vm7131_vm2 = vcmask 1046534  }
0x129e   :  { %v6608_v13 = vsel %vm3460_vm10, %v3462_v41, %v3458_v28  ;;  %vm7132_vm3 = vcmask 1047559   ;;  %vm7133_vm4 = vcmask 261120  }
0x129f   :  { %v3502_v29 = vmul.f32 %v3486_v14, %v6608_v13 }
0x12a1   :  { %1890 = vrot.lane.b32.xlu0 %v7115_v23, %s4208_s14 }
0x12a2   :  { %3524 = vrot.lane.b32.xlu1 %v3502_v29, %s4208_s14 }
0x12a3   :  { %3526 = vrot.lane.b32.xlu2 %v3503_v57, %s4208_s14 }
0x12a9   :  { %2322 = vrot.lane.b32.xlu0 %v5699_v7, %s4208_s14  ;;  %v7122_v7 = vld [vmem:[#allocation29_spill] sm:$0xff] }
0x12aa   :  { %1892 = vrot.lane.b32.xlu1 %v7116_v43, %s4208_s14 }
0x12ab   :  { %1894 = vrot.lane.b32.xlu2 %v7117_v4, %s4208_s14 }
0x12b1   :  { %2328 = vrot.lane.b32.xlu0 %v7118_v17, %s4208_s14 }
0x12b2   :  { %2324 = vrot.lane.b32.xlu1 %v7119_v33, %s4208_s14 }
0x12b3   :  { %2326 = vrot.lane.b32.xlu2 %v7120_v19, %s4208_s14 }
0x12b9   :  { %2336 = vrot.lane.b32.xlu0 %v7121_v42, %s4208_s14 }
0x12ba   :  { %2330 = vrot.lane.b32.xlu1 %v7122_v7, %s4208_s14 }
0x12bb   :  { %2332 = vrot.lane.b32.xlu2 %v7123_v38, %s4208_s14 }
0x12c3   :  { %2334 = vrot.lane.b32.xlu2 %v7124_v50, %s4208_s14 }
0x12ed   :  { %v3517_v27 = vpop.permute.xlu2 %3516 }
0x12ee   :  { %v3538_v16 = vadd.f32 %v3517_v27, %v6425_v52 }
0x12f0   :  { %4172 = vtanh.f32 %v3538_v16 }
0x12f5   :  { %v3521_v6 = vpop.permute.xlu2 %3520 }
0x12f6   :  { %v6637_v15 = vpop.eup %4172  ;;  %v3540_v34 = vadd.f32 %v3521_v6, %v6429_v45 }
0x12f7   :  { %v3554_v37 = vsub.f32 %v6248_v8, %v6637_v15 }
0x12f8   :  { %4174 = vtanh.f32 %v3540_v34 }
0x12f9   :  { %3572 = vrot.lane.b32.xlu1 %v3554_v37, %s4210_s15  ;;  %v7125_v37 = vld [vmem:[#allocation33_spill] sm:$0xff] }
0x12fd   :  { %v3527_v39 = vpop.permute.xlu2 %3526 }
0x12fe   :  { %v6643_v24 = vpop.eup %4174  ;;  %v3543_v48 = vadd.f32 %v3527_v39, %v6440_v21 }
0x12ff   :  { %v3556_v52 = vsub.f32 %v6260_v20, %v6643_v24 }
0x1300   :  { %4176 = vtanh.f32 %v3543_v48 }
0x1301   :  { %3576 = vrot.lane.b32.xlu1 %v3556_v52, %s4210_s15 }
0x1303   :  { %v3513_v44 = vpop.permute.xlu0 %3512 }
0x1304   :  { %v3536_v45 = vadd.f32 %v3513_v44, %v6421_v0  ;;  %v3515_v59 = vpop.permute.xlu1 %3514 }
0x1305   :  { %v1895_v53 = vpop.permute.xlu2 %1894  ;;  %v3537_v31 = vadd.f32 %v3515_v59, %v6423_v40 }
0x1306   :  { %v6651_v54 = vpop.eup %4176  ;;  %4178 = vtanh.f32 %v3536_v45  ;;  %1911 = vst.msk [vmem:[%s6903_s6 + $0x3b] sm:$0x1] %vm577_vm9, %v1895_v53 }
0x1307   :  { %4180 = vtanh.f32 %v3537_v31  ;;  %v3559_v21 = vsub.f32 %v6272_v5, %v6651_v54 }
0x1309   :  { %3582 = vrot.lane.b32.xlu1 %v3559_v21, %s4210_s15 }
0x130b   :  { %v3523_v22 = vpop.permute.xlu0 %3522 }
0x130c   :  { %v6660_v0 = vpop.eup %4178  ;;  %v3541_v32 = vadd.f32 %v3523_v22, %v6432_v51  ;;  %v3519_v40 = vpop.permute.xlu1 %3518 }
0x130d   :  { %v6663_v55 = vpop.eup %4180  ;;  %v2327_v41 = vpop.permute.xlu2 %2326  ;;  %v3539_v28 = vadd.f32 %v3519_v40, %v6427_v36  ;;  %v3552_v14 = vsub.f32 %v6256_v35, %v6660_v0 }
0x130e   :  { %4182 = vtanh.f32 %v3541_v32  ;;  %2348 = vst.msk [vmem:[%s6903_s6 + $0x14] sm:$0x1] %vm577_vm9, %v2327_v41  ;;  %v3553_v9 = vsub.f32 %v6245_v62, %v6663_v55 }
0x130f   :  { %4184 = vtanh.f32 %v3539_v28  ;;  %3568 = vrot.lane.b32.xlu2 %v3552_v14, %s4210_s15 }
0x1310   :  { %3570 = vrot.lane.b32.xlu0 %v3553_v9, %s4210_s15 }
0x1311   :  { %2764 = vrot.lane.b32.xlu1 %v5940_v18, %s4208_s14 }
0x1313   :  { %v1891_v36 = vpop.permute.xlu0 %1890 }
0x1314   :  { %v6678_v51 = vpop.eup %4182  ;;  %1909 = vst.msk [vmem:[%s6903_s6 + $0x2b] sm:$0x1] %vm577_vm9, %v1891_v36  ;;  %v3525_v29 = vpop.permute.xlu1 %3524 }
0x1315   :  { %v6684_v23 = vpop.eup %4184  ;;  %v2333_v57 = vpop.permute.xlu2 %2332  ;;  %v3542_v43 = vadd.f32 %v3525_v29, %v6434_v12  ;;  %v3557_v4 = vsub.f32 %v6268_v30, %v6678_v51 }
0x1316   :  { %2351 = vst.msk [vmem:[%s6903_s6 + $0x2c] sm:$0x1] %vm577_vm9, %v2333_v57  ;;  %v3555_v18 = vsub.f32 %v6253_v10, %v6684_v23 }
0x1317   :  { %4186 = vtanh.f32 %v3542_v43  ;;  %3578 = vrot.lane.b32.xlu2 %v3557_v4, %s4210_s15 }
0x1318   :  { %3574 = vrot.lane.b32.xlu0 %v3555_v18, %s4210_s15 }
0x1319   :  { %2770 = vrot.lane.b32.xlu1 %v5937_v46, %s4208_s14 }
0x131b   :  { %v2323_v12 = vpop.permute.xlu0 %2322 }
0x131c   :  { %2346 = vst.msk [vmem:[%s6903_s6 + $0x4] sm:$0x1] %vm577_vm9, %v2323_v12  ;;  %v1893_v17 = vpop.permute.xlu1 %1892 }
0x131d   :  { %v6703_v33 = vpop.eup %4186  ;;  %v2335_v19 = vpop.permute.xlu2 %2334  ;;  %1910 = vst.msk [vmem:[%s6903_s6 + $0x33] sm:$0x1] %vm577_vm9, %v1893_v17 }
0x131e   :  { %2352 = vst.msk [vmem:[%s6903_s6 + $0x34] sm:$0x1] %vm577_vm9, %v2335_v19  ;;  %v3558_v46 = vsub.f32 %v6276_v2, %v6703_v33 }
0x131f   :  { %2766 = vrot.lane.b32.xlu2 %v5932_v25, %s4208_s14 }
0x1320   :  { %3580 = vrot.lane.b32.xlu0 %v3558_v46, %s4210_s15 }
0x1321   :  { %2772 = vrot.lane.b32.xlu1 %v5943_v60, %s4208_s14 }
0x1323   :  { %v2329_v42 = vpop.permute.xlu0 %2328 }
0x1324   :  { %2349 = vst.msk [vmem:[%s6903_s6 + $0x1c] sm:$0x1] %vm577_vm9, %v2329_v42  ;;  %v2325_v7 = vpop.permute.xlu1 %2324 }
0x1325   :  { %2347 = vst.msk [vmem:[%s6903_s6 + $0xc] sm:$0x1] %vm577_vm9, %v2325_v7 }
0x1327   :  { %2774 = vrot.lane.b32.xlu2 %v5951_v1, %s4208_s14 }
0x1328   :  { %2768 = vrot.lane.b32.xlu0 %v5934_v3, %s4208_s14 }
0x132b   :  { %v2337_v25 = vpop.permute.xlu0 %2336 }
0x132c   :  { %2353 = vst.msk [vmem:[%s6903_s6 + $0x3c] sm:$0x1] %vm577_vm9, %v2337_v25  ;;  %v2331_v60 = vpop.permute.xlu1 %2330 }
0x132d   :  { %2350 = vst.msk [vmem:[%s6903_s6 + $0x24] sm:$0x1] %vm577_vm9, %v2331_v60 }
0x1330   :  { %2776 = vrot.lane.b32.xlu0 %v5957_v26, %s4208_s14 }
0x1369   :  { %v3569_v38 = vpop.permute.xlu2 %3568 }
0x136a   :  { %v3592_v1 = vmul.f32 %v3569_v38, %v6527_v58 }
0x136b   :  { %v3573_v50 = vpop.permute.xlu1 %3572 }
0x136c   :  { %v3594_v3 = vmul.f32 %v3573_v50, %v6541_v11  ;;  %3608 = vrot.lane.b32.xlu1 %v3592_v1, %s4209_s1 }
0x136e   :  { %3612 = vrot.lane.b32.xlu0 %v3594_v3, %s4209_s1 }
0x1371   :  { %v3579_v27 = vpop.permute.xlu2 %3578 }
0x1372   :  { %v3597_v16 = vmul.f32 %v3579_v27, %v6572_v49 }
0x1373   :  { %v3577_v6 = vpop.permute.xlu1 %3576 }
0x1374   :  { %v3596_v34 = vmul.f32 %v3577_v6, %v6576_v47  ;;  %3618 = vrot.lane.b32.xlu1 %v3597_v16, %s4209_s1 }
0x1376   :  { %3616 = vrot.lane.b32.xlu0 %v3596_v34, %s4209_s1 }
0x1379   :  { %v2767_v26 = vpop.permute.xlu2 %2766 }
0x137a   :  { %2789 = vst.msk [vmem:[%s6903_s6 + $0xd] sm:$0x1] %vm577_vm9, %v2767_v26 }
0x137b   :  { %v3583_v58 = vpop.permute.xlu1 %3582 }
0x137c   :  { %v3599_v11 = vmul.f32 %v3583_v58, %v6603_v56  ;;  %2778 = vrot.lane.b32.xlu1 %v7125_v37, %s4208_s14 }
0x137e   :  { %3622 = vrot.lane.b32.xlu0 %v3599_v11, %s4209_s1 }
0x1381   :  { %v2775_v49 = vpop.permute.xlu2 %2774 }
0x1382   :  { %2793 = vst.msk [vmem:[%s6903_s6 + $0x2d] sm:$0x1] %vm577_vm9, %v2775_v49  ;;  %v3571_v47 = vpop.permute.xlu0 %3570 }
0x1383   :  { %v3593_v39 = vmul.f32 %v3571_v47, %v6536_v61  ;;  %v2765_v48 = vpop.permute.xlu1 %2764 }
0x1384   :  { %2788 = vst.msk [vmem:[%s6903_s6 + $0x5] sm:$0x1] %vm577_vm9, %v2765_v48  ;;  %3210 = vrot.lane.b32.xlu1 %v6248_v8, %s4208_s14 }
0x1385   :  { %3610 = vrot.lane.b32.xlu2 %v3593_v39, %s4209_s1 }
0x1386   :  { %3208 = vrot.lane.b32.xlu0 %v6245_v62, %s4208_s14 }
0x138a   :  { %v3575_v56 = vpop.permute.xlu0 %3574 }
0x138b   :  { %v3595_v52 = vmul.f32 %v3575_v56, %v6579_v63  ;;  %v2771_v44 = vpop.permute.xlu1 %2770 }
0x138c   :  { %2791 = vst.msk [vmem:[%s6903_s6 + $0x1d] sm:$0x1] %vm577_vm9, %v2771_v44  ;;  %3216 = vrot.lane.b32.xlu1 %v6268_v30, %s4208_s14 }
0x138d   :  { %3614 = vrot.lane.b32.xlu2 %v3595_v52, %s4209_s1 }
0x138e   :  { %3214 = vrot.lane.b32.xlu0 %v6260_v20, %s4208_s14 }
0x1392   :  { %v3581_v8 = vpop.permute.xlu0 %3580 }
0x1393   :  { %v3598_v62 = vmul.f32 %v3581_v8, %v6608_v13  ;;  %v2773_v61 = vpop.permute.xlu1 %2772 }
0x1394   :  { %2792 = vst.msk [vmem:[%s6903_s6 + $0x25] sm:$0x1] %vm577_vm9, %v2773_v61 }
0x1395   :  { %3620 = vrot.lane.b32.xlu2 %v3598_v62, %s4209_s1 }
0x1396   :  { %3220 = vrot.lane.b32.xlu0 %v6272_v5, %s4208_s14 }
0x139a   :  { %v2769_v30 = vpop.permute.xlu0 %2768 }
0x139b   :  { %2790 = vst.msk [vmem:[%s6903_s6 + $0x15] sm:$0x1] %vm577_vm9, %v2769_v30 }
0x139d   :  { %3206 = vrot.lane.b32.xlu2 %v6256_v35, %s4208_s14 }
0x13a2   :  { %v2777_v20 = vpop.permute.xlu0 %2776 }
0x13a3   :  { %2794 = vst.msk [vmem:[%s6903_s6 + $0x35] sm:$0x1] %vm577_vm9, %v2777_v20 }
0x13a5   :  { %3212 = vrot.lane.b32.xlu2 %v6253_v10, %s4208_s14 }
0x13ad   :  { %3218 = vrot.lane.b32.xlu2 %v6276_v2, %s4208_s14 }
0x13de   :  { %v3609_v5 = vpop.permute.xlu1 %3608 }
0x13df   :  { %v3632_v63 = vadd.f32 %v6660_v0, %v3609_v5  ;;  %v3611_v13 = vpop.permute.xlu2 %3610 }
0x13e0   :  { %v3633_v45 = vadd.f32 %v6663_v55, %v3611_v13  ;;  %v3613_v59 = vpop.permute.xlu0 %3612 }
0x13e1   :  { %v3634_v35 = vadd.f32 %v6637_v15, %v3613_v59  ;;  %3648 = vrot.lane.b32.xlu1 %v3632_v63, %s4208_s14 }
0x13e2   :  { %3650 = vrot.lane.b32.xlu2 %v3633_v45, %s4208_s14  ;;  %v3680_v53 = vrot.slane %v3633_v45, 7 }
0x13e3   :  { %3652 = vrot.lane.b32.xlu0 %v3634_v35, %s4208_s14  ;;  %v3682_v21 = vrot.slane %v3634_v35, 6 }
0x13e4   :  { %v3681_v0 = vsel %vm7126_vm12, %v3680_v53, %v3632_v63 }
0x13e5   :  { %v3683_v55 = vsel %vm7127_vm13, %v3682_v21, %v3681_v0 }
0x13e6   :  { %v3619_v10 = vpop.permute.xlu1 %3618 }
0x13e7   :  { %v3615_v31 = vpop.permute.xlu2 %3614  ;;  %v3637_v32 = vadd.f32 %v6678_v51, %v3619_v10 }
0x13e8   :  { %v3635_v2 = vadd.f32 %v6684_v23, %v3615_v31  ;;  %v3617_v22 = vpop.permute.xlu0 %3616 }
0x13e9   :  { %v3636_v40 = vadd.f32 %v6643_v24, %v3617_v22  ;;  %v3688_v29 = vrot.slane %v3637_v32, 3 }
0x13ea   :  { %v3684_v15 = vrot.slane %v3635_v2, 5  ;;  %3654 = vrot.lane.b32.xlu1 %v3635_v2, %s4208_s14 }
0x13eb   :  { %3656 = vrot.lane.b32.xlu2 %v3636_v40, %s4208_s14  ;;  %3658 = vrot.lane.b32.xlu0 %v3637_v32, %s4208_s14  ;;  %v3686_v41 = vrot.slane %v3636_v40, 4 }
0x13ec   :  { %v3685_v28 = vsel %vm7128_vm14, %v3684_v15, %v3683_v55 }
0x13ed   :  { %v3687_v24 = vsel %vm7129_vm15, %v3686_v41, %v3685_v28 }
0x13ee   :  { %v2779_v14 = vpop.permute.xlu1 %2778  ;;  %v3689_v4 = vsel %vm7130_vm1, %v3688_v29, %v3687_v24 }
0x13ef   :  { %2795 = vst.msk [vmem:[%s6903_s6 + $0x3d] sm:$0x1] %vm577_vm9, %v2779_v14  ;;  %v3621_v9 = vpop.permute.xlu2 %3620 }
0x13f0   :  { %v3638_v36 = vadd.f32 %v6703_v33, %v3621_v9  ;;  %v3623_v51 = vpop.permute.xlu0 %3622 }
0x13f1   :  { %v3639_v23 = vadd.f32 %v6651_v54, %v3623_v51 }
0x13f2   :  { %v3690_v57 = vrot.slane %v3638_v36, 2  ;;  %3660 = vrot.lane.b32.xlu1 %v3638_v36, %s4208_s14 }
0x13f3   :  { %v3692_v43 = vrot.slane %v3639_v23, 1  ;;  %3662 = vrot.lane.b32.xlu2 %v3639_v23, %s4208_s14 }
0x13f4   :  { %v3691_v18 = vsel %vm7131_vm2, %v3690_v57, %v3689_v4 }
0x13f5   :  { %v3693_v12 = vsel %vm7132_vm3, %v3692_v43, %v3691_v18 }
0x13f6   :  { %v3211_v17 = vpop.permute.xlu1 %3210  ;;  %3694 = vrot.lane.b32.xlu0 %v3693_v12, %s4208_s14 }
0x13f7   :  { %3232 = vst.msk [vmem:[%s6903_s6 + $0x16] sm:$0x1] %vm577_vm9, %v3211_v17  ;;  %v3207_v54 = vpop.permute.xlu2 %3206 }
0x13f8   :  { %3230 = vst.msk [vmem:[%s6903_s6 + $0x6] sm:$0x1] %vm577_vm9, %v3207_v54  ;;  %v3209_v33 = vpop.permute.xlu0 %3208 }
0x13f9   :  { %3231 = vst.msk [vmem:[%s6903_s6 + $0xe] sm:$0x1] %vm577_vm9, %v3209_v33 }
0x13fe   :  { %v3217_v19 = vpop.permute.xlu1 %3216 }
0x13ff   :  { %3235 = vst.msk [vmem:[%s6903_s6 + $0x2e] sm:$0x1] %vm577_vm9, %v3217_v19  ;;  %v3213_v46 = vpop.permute.xlu2 %3212 }
0x1400   :  { %3233 = vst.msk [vmem:[%s6903_s6 + $0x1e] sm:$0x1] %vm577_vm9, %v3213_v46  ;;  %v3215_v42 = vpop.permute.xlu0 %3214 }
0x1401   :  { %3234 = vst.msk [vmem:[%s6903_s6 + $0x26] sm:$0x1] %vm577_vm9, %v3215_v42 }
0x1407   :  { %v3219_v7 = vpop.permute.xlu2 %3218 }
0x1408   :  { %3236 = vst.msk [vmem:[%s6903_s6 + $0x36] sm:$0x1] %vm577_vm9, %v3219_v7  ;;  %v3221_v25 = vpop.permute.xlu0 %3220 }
0x1409   :  { %3237 = vst.msk [vmem:[%s6903_s6 + $0x3e] sm:$0x1] %vm577_vm9, %v3221_v25 }
0x143c   :  { %v3651_v60 = vpop.permute.xlu2 %3650 }
0x143d   :  { %3673 = vst.msk [vmem:[%s6903_s6 + $0xf] sm:$0x1] %vm577_vm9, %v3651_v60 }
0x1445   :  { %v3657_v38 = vpop.permute.xlu2 %3656 }
0x1446   :  { %3676 = vst.msk [vmem:[%s6903_s6 + $0x27] sm:$0x1] %vm577_vm9, %v3657_v38 }
0x144d   :  { %v3663_v1 = vpop.permute.xlu2 %3662 }
0x144e   :  { %3679 = vst.msk [vmem:[%s6903_s6 + $0x3f] sm:$0x1] %vm577_vm9, %v3663_v1 }
0x1453   :  { %v3649_v50 = vpop.permute.xlu1 %3648 }
0x1454   :  { %3672 = vst.msk [vmem:[%s6903_s6 + $0x7] sm:$0x1] %vm577_vm9, %v3649_v50 }
0x1455   :  { %v3653_v3 = vpop.permute.xlu0 %3652 }
0x1456   :  { %3674 = vst.msk [vmem:[%s6903_s6 + $0x17] sm:$0x1] %vm577_vm9, %v3653_v3 }
0x145c   :  { %v3655_v27 = vpop.permute.xlu1 %3654 }
0x145d   :  { %v3659_v16 = vpop.permute.xlu0 %3658  ;;  %3675 = vst.msk [vmem:[%s6903_s6 + $0x1f] sm:$0x1] %vm577_vm9, %v3655_v27 }
0x145e   :  { %3677 = vst.msk [vmem:[%s6903_s6 + $0x2f] sm:$0x1] %vm577_vm9, %v3659_v16 }
0x1464   :  { %v3661_v6 = vpop.permute.xlu1 %3660 }
0x1465   :  { %3678 = vst.msk [vmem:[%s6903_s6 + $0x37] sm:$0x1] %vm577_vm9, %v3661_v6 }
0x1468   :  { %v3695_v34 = vpop.permute.xlu0 %3694 }
0x1469   :  { %3697 = vst.msk [vmem:[#allocation2] sm:$0xff] %vm7133_vm4, %v3695_v34 }

</bundles_post_ra>
